<compile_context>
chip_gen: v7x
topology: tpu7x:2x2x1
jax: 0.10.0
libtpu: 0.0.40
codegen_flags: <defaults>
</compile_context>

<pallas_src>
import functools

import jax
import jax.numpy as jnp
from jax.experimental import pallas as pl
from jax.experimental.pallas import tpu as pltpu


LEAKY_SLOPE = 0.2
BN_EPS = 1e-5

# Budget the double-buffered per-step working set well under the smallest scoped VMEM
# across generations (v7x: 64 MiB physical / 32 MiB default scoped).
_TILE_VMEM_BUDGET = 20 * 1024 * 1024
_VMEM_LIMIT_BYTES = 48 * 1024 * 1024


def _round_up(x, m):
    return ((x + m - 1) // m) * m


def _pick_tm(M, K, Np, nk):
    """Largest M tile (multiple of 8, <= 512) whose pipelined working set fits the budget."""
    m_cap = _round_up(max(M, 8), 8)
    tm = 8
    for cand in (512, 256, 128, 64, 32, 16, 8):
        if cand > m_cap:
            continue
        need = 2 * (nk * cand * K * 2        # bf16 X tile (double buffered)
                    + nk * K * Np * 2        # bf16 weight slabs
                    + cand * Np * 2          # bf16 output tile
                    + 2 * 8 * Np * 4)        # f32 stat partials
        need += cand * Np * 4                # f32 accumulator value
        if need <= _TILE_VMEM_BUDGET:
            tm = cand
            break
    # v7x has 2 TensorCores: prefer >= 2 parallel grid blocks when the problem allows it.
    if _round_up(M, tm) // tm < 2 and tm >= 16:
        tm //= 2
    return tm


def _pick_tm_bn(Mp, Np, tm):
    """Row tile for the mem-bound BN+LeakyReLU pass: grow up to 1024 rows while it divides
    Mp and fits comfortably in VMEM; keep >= 2 grid blocks when possible (megacore)."""
    tm_bn = tm
    while (tm_bn * 2 <= 1024
           and Mp % (tm_bn * 2) == 0
           and 8 * (tm_bn * 2) * Np * 2 <= _TILE_VMEM_BUDGET):
        tm_bn *= 2
    if Mp // tm_bn < 2 and tm_bn > tm:
        tm_bn //= 2
    return tm_bn


# ----------------------------- Pallas kernels -------------------------------


def _conv_stats_kernel(nk, act, with_stats, x_ref, w_ref, *out_refs):
    """Fused conv-as-matmul: acc = sum_p x[p] @ w[p] (bf16 in, f32 accumulate), with the
    BatchNorm column statistics and/or activation fused into the epilogue."""
    acc = jnp.zeros((x_ref.shape[1], w_ref.shape[2]), jnp.float32)
    for p in range(nk):  # static unroll over the 4 space-to-depth kernel positions
        acc = acc + jnp.dot(x_ref[p], w_ref[p], preferred_element_type=jnp.float32)

    if with_stats:
        y_ref, sum_ref, sq_ref = out_refs
        # Sublane-fold (tm, Np) -> (tm//8, 8, Np) and reduce the major axis with VALU adds;
        # the tiny final cross-tile reduction happens host-side on (8 * num_tiles, Np).
        folded = acc.reshape(-1, 8, acc.shape[-1])
        sum_ref[...] = jnp.sum(folded, axis=0)
        sq_ref[...] = jnp.sum(folded * folded, axis=0)
    else:
        (y_ref,) = out_refs

    if act == "leaky":
        acc = jnp.where(acc >= 0.0, acc, LEAKY_SLOPE * acc)
    y_ref[...] = acc.astype(y_ref.dtype)


def _bn_leaky_kernel(y_ref, scale_ref, shift_ref, o_ref):
    # Epilogue math in f32 (v5e has no bf16 VPU); inputs/outputs stored bf16.
    z = y_ref[...].astype(jnp.float32) * scale_ref[...] + shift_ref[...]
    o_ref[...] = jnp.where(z >= 0.0, z, LEAKY_SLOPE * z).astype(o_ref.dtype)


# ------------------------- layout glue (plain JAX / XLA) ---------------------


def _space_to_depth_views(x_nhwc):
    """pad=1 + space-to-depth(2): returns the 4 shifted (M, 4*Cin) matrices, stacked."""
    N, H, W, Cin = x_nhwc.shape
    assert H % 2 == 0 and W % 2 == 0
    OH, OW = H // 2, W // 2
    xp = jnp.pad(x_nhwc, ((0, 0), (1, 1), (1, 1), (0, 0)))
    H2, W2 = OH + 1, OW + 1
    # (N, H+2, W+2, C) -> (N, H2, W2, 4*C), channel order (dh, dw, c).
    xs = xp.reshape(N, H2, 2, W2, 2, Cin).transpose(0, 1, 3, 2, 4, 5)
    xs = xs.reshape(N, H2, W2, 4 * Cin)
    M = N * OH * OW
    views = [xs[:, a:a + OH, b:b + OW, :].reshape(M, 4 * Cin)
             for a in (0, 1) for b in (0, 1)]
    return jnp.stack(views, axis=0), (N, OH, OW)


def _weight_slabs(w):
    """PyTorch (Cout, Cin, 4, 4) conv weight -> space-to-depth slabs (4, 4*Cin, Cout)."""
    Cout, Cin, kh, kw = w.shape
    assert kh == 4 and kw == 4
    wt = w.transpose(2, 3, 1, 0)                 # (kh, kw, Cin, Cout)
    wt = wt.reshape(2, 2, 2, 2, Cin, Cout)       # (a, dh, b, dw, Cin, Cout)
    wt = wt.transpose(0, 2, 1, 3, 4, 5)          # (a, b, dh, dw, Cin, Cout)
    return wt.reshape(4, 4 * Cin, Cout)


# ------------------------------ Pallas wrappers ------------------------------


def conv4x4_s2(x_nhwc, w, *, act, with_stats):
    """4x4 / stride-2 / pad-1 conv on NHWC bf16 input via one fused Pallas matmul kernel."""
    Cout = w.shape[0]
    Xk, (N, OH, OW) = _space_to_depth_views(x_nhwc)
    nk, M, K = Xk.shape
    Np = _round_up(Cout, 128)

    tm = _pick_tm(M, K, Np, nk)
    Mp = _round_up(M, tm)
    if Mp > M:
        Xk = jnp.pad(Xk, ((0, 0), (0, Mp - M), (0, 0)))
    Xk = Xk.astype(jnp.bfloat16)
    Wk = jnp.pad(_weight_slabs(w), ((0, 0), (0, 0), (0, Np - Cout))).astype(jnp.bfloat16)

    num_tiles = Mp // tm
    if with_stats:
        out_shape = (jax.ShapeDtypeStruct((Mp, Np), jnp.bfloat16),
                     jax.ShapeDtypeStruct((8 * num_tiles, Np), jnp.float32),
                     jax.ShapeDtypeStruct((8 * num_tiles, Np), jnp.float32))
        out_specs = (pl.BlockSpec((tm, Np), lambda i: (i, 0)),
                     pl.BlockSpec((8, Np), lambda i: (i, 0)),
                     pl.BlockSpec((8, Np), lambda i: (i, 0)))
    else:
        out_shape = jax.ShapeDtypeStruct((Mp, Np), jnp.bfloat16)
        out_specs = pl.BlockSpec((tm, Np), lambda i: (i, 0))

    res = pl.pallas_call(
        functools.partial(_conv_stats_kernel, nk, act, with_stats),
        out_shape=out_shape,
        grid=(num_tiles,),
        in_specs=[
            pl.BlockSpec((nk, tm, K), lambda i: (0, i, 0)),
            pl.BlockSpec((nk, K, Np), lambda i: (0, 0, 0)),
        ],
        out_specs=out_specs,
        compiler_params=pltpu.CompilerParams(
            dimension_semantics=("parallel",),
            vmem_limit_bytes=_VMEM_LIMIT_BYTES,
        ),
    )(Xk, Wk)

    if with_stats:
        y, psum, psq = res
        stats = (psum, psq)
    else:
        y, stats = res, None
    return y, stats, (N, OH, OW, Cout, M, Np, tm)


def pallas_bn_leaky(yp, scale_p, shift_p, tm):
    Mp, Np = yp.shape
    tm_bn = _pick_tm_bn(Mp, Np, tm)
    return pl.pallas_call(
        _bn_leaky_kernel,
        out_shape=jax.ShapeDtypeStruct((Mp, Np), jnp.bfloat16),
        grid=(Mp // tm_bn,),
        in_specs=[
            pl.BlockSpec((tm_bn, Np), lambda i: (i, 0)),
            pl.BlockSpec((1, Np), lambda i: (0, 0)),
            pl.BlockSpec((1, Np), lambda i: (0, 0)),
        ],
        out_specs=pl.BlockSpec((tm_bn, Np), lambda i: (i, 0)),
        compiler_params=pltpu.CompilerParams(
            dimension_semantics=("parallel",),
            vmem_limit_bytes=_VMEM_LIMIT_BYTES,
        ),
    )(yp, scale_p, shift_p)


# -------------------------------- layers -------------------------------------


def conv_leaky(x_nhwc, w):
    y, _, (N, OH, OW, Cout, M, _, _) = conv4x4_s2(x_nhwc, w, act="leaky", with_stats=False)
    return y[:M, :Cout].reshape(N, OH, OW, Cout)


def conv_bn_leaky(x_nhwc, w, gamma, beta):
    # Conv with fused per-channel sum / sum-of-squares, then one normalize+LeakyReLU pass.
    # Stats over the zero-padded rows are exact because padded rows of Xk are zero and no
    # nonlinearity precedes the statistics (act == "none"); the division uses the true M.
    y, (psum, psq), (N, OH, OW, Cout, M, Np, tm) = conv4x4_s2(
        x_nhwc, w, act="none", with_stats=True)
    s = jnp.sum(psum, axis=0)[:Cout]
    q = jnp.sum(psq, axis=0)[:Cout]
    mean = s / M
    var = jnp.maximum(q / M - mean * mean, 0.0)   # biased variance = PyTorch BN training mode
    scale = gamma / jnp.sqrt(var + BN_EPS)        # f32 BN math
    shift = beta - mean * scale
    scale_p = jnp.pad(scale, (0, Np - Cout)).reshape(1, Np)
    shift_p = jnp.pad(shift, (0, Np - Cout)).reshape(1, Np)
    out = pallas_bn_leaky(y, scale_p, shift_p, tm)
    return out[:M, :Cout].reshape(N, OH, OW, Cout)


def final_conv_sigmoid(h_nhwc, w5):
    # 4x4 / stride-4 / no-pad conv to a single channel + sigmoid. This is a tiny dot
    # (M = N*OH5*OW5, Cout = 1): a dedicated pallas_call is pure launch/padding overhead,
    # so it stays in plain JAX (XLA).
    N, H4, W4, C = h_nhwc.shape
    assert H4 % 4 == 0 and W4 % 4 == 0
    OH5, OW5 = H4 // 4, W4 // 4
    patches = h_nhwc.reshape(N, OH5, 4, OW5, 4, C).transpose(0, 1, 3, 2, 4, 5)
    patches = patches.reshape(N * OH5 * OW5, 16 * C).astype(jnp.float32)
    wf = w5.transpose(2, 3, 1, 0).reshape(16 * C, 1).astype(jnp.float32)  # (kh, kw, Cin) order
    return jax.nn.sigmoid(patches @ wf)


# ------------------------------- NetA forward --------------------------------


def make_params(key, nc, ndf):
    ks = jax.random.split(key, 5)
    scale = 0.05
    return {
        "w1": scale * jax.random.normal(ks[0], (ndf, nc * 2, 4, 4), jnp.float32),
        "w2": scale * jax.random.normal(ks[1], (ndf * 2, ndf, 4, 4), jnp.float32),
        "w3": scale * jax.random.normal(ks[2], (ndf * 4, ndf * 2, 4, 4), jnp.float32),
        "w4": scale * jax.random.normal(ks[3], (ndf * 8, ndf * 4, 4, 4), jnp.float32),
        "w5": scale * jax.random.normal(ks[4], (1, ndf * 8, 4, 4), jnp.float32),
        # BatchNorm2d default init: weight=1, bias=0 (training-mode batch statistics).
        "g2": jnp.ones((ndf * 2,), jnp.float32), "b2": jnp.zeros((ndf * 2,), jnp.float32),
        "g3": jnp.ones((ndf * 4,), jnp.float32), "b3": jnp.zeros((ndf * 4,), jnp.float32),
        "g4": jnp.ones((ndf * 8,), jnp.float32), "b4": jnp.zeros((ndf * 8,), jnp.float32),
    }


def net_a_forward(x_nchw, p):
    # Single NCHW -> NHWC transpose at the boundary; activations stay NHWC bf16 afterwards.
    x = jnp.transpose(x_nchw, (0, 2, 3, 1)).astype(jnp.bfloat16)
    h = conv_leaky(x, p["w1"])                                 # Conv + LeakyReLU(0.2)
    h = conv_bn_leaky(h, p["w2"], p["g2"], p["b2"])            # Conv + BN + LeakyReLU
    h = conv_bn_leaky(h, p["w3"], p["g3"], p["b3"])
    h = conv_bn_leaky(h, p["w4"], p["g4"], p["b4"])
    out = final_conv_sigmoid(h, p["w5"])                       # Conv(k4,s4) + Sigmoid
    return out.reshape(-1, 1)                                  # x.view(-1, 1)


if __name__ == "__main__":
    # Small but architecture-consistent shapes: four stride-2 convs followed by the
    # k=4 / s=4 conv need spatial 64 -> 1x1 output.
    nc, ndf = 2, 8
    N, H, W = 2, 64, 64

    key = jax.random.PRNGKey(0)
    kx, kp = jax.random.split(key)
    x = jax.random.normal(kx, (N, nc * 2, H, W), jnp.float32)
    params = make_params(kp, nc, ndf)

    out = jax.jit(net_a_forward)(x, params)
    out = jax.block_until_ready(out)

    assert out.shape == (N, 1), out.shape
    assert bool(jnp.all(jnp.isfinite(out)))
    assert bool(jnp.all((out >= 0.0) & (out <= 1.0)))  # sigmoid output range
    print("KERNEL_OK")
</pallas_src>

<mosaic_0001>
module attributes {stable_mosaic.version = 11 : i64} {
  func.func @_conv_stats_kernel(%arg0: i32, %arg1: memref<4x512x16xbf16, #tpu.memory_space<vmem>>, %arg2: memref<4x16x128xbf16, #tpu.memory_space<vmem>>, %arg3: memref<512x128xbf16, #tpu.memory_space<vmem>>) attributes {dimension_semantics = [#tpu.dimension_semantics<parallel>], iteration_bounds = array<i64: 4>, scalar_prefetch = 0 : i64, scratch_operands = 0 : i64, tpu.core_type = #tpu.core_type<tc>, window_params = [{transform_indices = @transform_0, window_bounds = array<i64: 4, 512, 16>}, {pipeline_mode = #tpu.pipeline_mode<synchronous>, transform_indices = @transform_1, window_bounds = array<i64: 4, 16, 128>}, {transform_indices = @transform_2, window_bounds = array<i64: 512, 128>}]} {
    %cst = arith.constant 0.000000e+00 : f32
    %0 = vector.broadcast %cst : f32 to vector<512x128xf32>
    %c0 = arith.constant 0 : index
    %c0_0 = arith.constant 0 : index
    %c0_1 = arith.constant 0 : index
    %1 = vector.load %arg1[%c0, %c0_0, %c0_1] : memref<4x512x16xbf16, #tpu.memory_space<vmem>>, vector<1x512x16xbf16>
    %2 = vector.shape_cast %1 : vector<1x512x16xbf16> to vector<512x16xbf16>
    %c0_2 = arith.constant 0 : index
    %c0_3 = arith.constant 0 : index
    %c0_4 = arith.constant 0 : index
    %3 = vector.load %arg2[%c0_2, %c0_3, %c0_4] : memref<4x16x128xbf16, #tpu.memory_space<vmem>>, vector<1x16x128xbf16>
    %4 = vector.shape_cast %3 : vector<1x16x128xbf16> to vector<16x128xbf16>
    %cst_5 = arith.constant dense<0.000000e+00> : vector<512x128xf32>
    %5 = tpu.matmul %2, %4, %cst_5 {dimension_numbers = #tpu.dot_dimension_numbers<[1], [0], [0], [1], [0, 0, 1, 1], [], []>} : vector<512x16xbf16>, vector<16x128xbf16>, vector<512x128xf32> -> vector<512x128xf32>
    %6 = arith.addf %0, %5 : vector<512x128xf32>
    %c1 = arith.constant 1 : index
    %c0_6 = arith.constant 0 : index
    %c0_7 = arith.constant 0 : index
    %7 = vector.load %arg1[%c1, %c0_6, %c0_7] : memref<4x512x16xbf16, #tpu.memory_space<vmem>>, vector<1x512x16xbf16>
    %8 = vector.shape_cast %7 : vector<1x512x16xbf16> to vector<512x16xbf16>
    %c1_8 = arith.constant 1 : index
    %c0_9 = arith.constant 0 : index
    %c0_10 = arith.constant 0 : index
    %9 = vector.load %arg2[%c1_8, %c0_9, %c0_10] : memref<4x16x128xbf16, #tpu.memory_space<vmem>>, vector<1x16x128xbf16>
    %10 = vector.shape_cast %9 : vector<1x16x128xbf16> to vector<16x128xbf16>
    %cst_11 = arith.constant dense<0.000000e+00> : vector<512x128xf32>
    %11 = tpu.matmul %8, %10, %cst_11 {dimension_numbers = #tpu.dot_dimension_numbers<[1], [0], [0], [1], [0, 0, 1, 1], [], []>} : vector<512x16xbf16>, vector<16x128xbf16>, vector<512x128xf32> -> vector<512x128xf32>
    %12 = arith.addf %6, %11 : vector<512x128xf32>
    %c2 = arith.constant 2 : index
    %c0_12 = arith.constant 0 : index
    %c0_13 = arith.constant 0 : index
    %13 = vector.load %arg1[%c2, %c0_12, %c0_13] : memref<4x512x16xbf16, #tpu.memory_space<vmem>>, vector<1x512x16xbf16>
    %14 = vector.shape_cast %13 : vector<1x512x16xbf16> to vector<512x16xbf16>
    %c2_14 = arith.constant 2 : index
    %c0_15 = arith.constant 0 : index
    %c0_16 = arith.constant 0 : index
    %15 = vector.load %arg2[%c2_14, %c0_15, %c0_16] : memref<4x16x128xbf16, #tpu.memory_space<vmem>>, vector<1x16x128xbf16>
    %16 = vector.shape_cast %15 : vector<1x16x128xbf16> to vector<16x128xbf16>
    %cst_17 = arith.constant dense<0.000000e+00> : vector<512x128xf32>
    %17 = tpu.matmul %14, %16, %cst_17 {dimension_numbers = #tpu.dot_dimension_numbers<[1], [0], [0], [1], [0, 0, 1, 1], [], []>} : vector<512x16xbf16>, vector<16x128xbf16>, vector<512x128xf32> -> vector<512x128xf32>
    %18 = arith.addf %12, %17 : vector<512x128xf32>
    %c3 = arith.constant 3 : index
    %c0_18 = arith.constant 0 : index
    %c0_19 = arith.constant 0 : index
    %19 = vector.load %arg1[%c3, %c0_18, %c0_19] : memref<4x512x16xbf16, #tpu.memory_space<vmem>>, vector<1x512x16xbf16>
    %20 = vector.shape_cast %19 : vector<1x512x16xbf16> to vector<512x16xbf16>
    %c3_20 = arith.constant 3 : index
    %c0_21 = arith.constant 0 : index
    %c0_22 = arith.constant 0 : index
    %21 = vector.load %arg2[%c3_20, %c0_21, %c0_22] : memref<4x16x128xbf16, #tpu.memory_space<vmem>>, vector<1x16x128xbf16>
    %22 = vector.shape_cast %21 : vector<1x16x128xbf16> to vector<16x128xbf16>
    %cst_23 = arith.constant dense<0.000000e+00> : vector<512x128xf32>
    %23 = tpu.matmul %20, %22, %cst_23 {dimension_numbers = #tpu.dot_dimension_numbers<[1], [0], [0], [1], [0, 0, 1, 1], [], []>} : vector<512x16xbf16>, vector<16x128xbf16>, vector<512x128xf32> -> vector<512x128xf32>
    %24 = arith.addf %18, %23 : vector<512x128xf32>
    %cst_24 = arith.constant 0.000000e+00 : f32
    %25 = vector.broadcast %cst_24 : f32 to vector<512x128xf32>
    %26 = arith.cmpf oge, %24, %25 : vector<512x128xf32>
    %cst_25 = arith.constant 2.000000e-01 : f32
    %27 = vector.broadcast %cst_25 : f32 to vector<512x128xf32>
    %28 = arith.mulf %27, %24 : vector<512x128xf32>
    %29 = arith.select %26, %24, %28 : vector<512x128xi1>, vector<512x128xf32>
    %30 = arith.truncf %29 : vector<512x128xf32> to vector<512x128xbf16>
    %c0_26 = arith.constant 0 : index
    %c0_27 = arith.constant 0 : index
    %31 = vector.load %arg3[%c0_26, %c0_27] : memref<512x128xbf16, #tpu.memory_space<vmem>>, vector<512x128xbf16>
    tpu.vector_store %arg3[%c0_26, %c0_27], %30 {strides = array<i32>} : memref<512x128xbf16, #tpu.memory_space<vmem>>, vector<512x128xbf16>,
    return
  }
  func.func @transform_0(%arg0: i32) -> (i32, i32, i32) {
    %c0_i32 = arith.constant 0 : i32
    %c0_i32_0 = arith.constant 0 : i32
    %c0_i32_1 = arith.constant 0 : i32
    return %c0_i32, %arg0, %c0_i32_0 : i32, i32, i32
  }
  func.func @transform_1(%arg0: i32) -> (i32, i32, i32) {
    %c0_i32 = arith.constant 0 : i32
    %c0_i32_0 = arith.constant 0 : i32
    %c0_i32_1 = arith.constant 0 : i32
    %c0_i32_2 = arith.constant 0 : i32
    return %c0_i32, %c0_i32_0, %c0_i32_1 : i32, i32, i32
  }
  func.func @transform_2(%arg0: i32) -> (i32, i32) {
    %c0_i32 = arith.constant 0 : i32
    %c0_i32_0 = arith.constant 0 : i32
    return %arg0, %c0_i32 : i32, i32
  }
}

module attributes {stable_mosaic.version = 11 : i64} {
  func.func @_conv_stats_kernel(%arg0: i32, %arg1: memref<4x256x32xbf16, #tpu.memory_space<vmem>>, %arg2: memref<4x32x128xbf16, #tpu.memory_space<vmem>>, %arg3: memref<256x128xbf16, #tpu.memory_space<vmem>>, %arg4: memref<8x128xf32, #tpu.memory_space<vmem>>, %arg5: memref<8x128xf32, #tpu.memory_space<vmem>>) attributes {dimension_semantics = [#tpu.dimension_semantics<parallel>], iteration_bounds = array<i64: 2>, scalar_prefetch = 0 : i64, scratch_operands = 0 : i64, tpu.core_type = #tpu.core_type<tc>, window_params = [{transform_indices = @transform_0, window_bounds = array<i64: 4, 256, 32>}, {pipeline_mode = #tpu.pipeline_mode<synchronous>, transform_indices = @transform_1, window_bounds = array<i64: 4, 32, 128>}, {transform_indices = @transform_2, window_bounds = array<i64: 256, 128>}, {transform_indices = @transform_3, window_bounds = array<i64: 8, 128>}, {transform_indices = @transform_4, window_bounds = array<i64: 8, 128>}]} {
    %cst = arith.constant 0.000000e+00 : f32
    %0 = vector.broadcast %cst : f32 to vector<256x128xf32>
    %c0 = arith.constant 0 : index
    %c0_0 = arith.constant 0 : index
    %c0_1 = arith.constant 0 : index
    %1 = vector.load %arg1[%c0, %c0_0, %c0_1] : memref<4x256x32xbf16, #tpu.memory_space<vmem>>, vector<1x256x32xbf16>
    %2 = vector.shape_cast %1 : vector<1x256x32xbf16> to vector<256x32xbf16>
    %c0_2 = arith.constant 0 : index
    %c0_3 = arith.constant 0 : index
    %c0_4 = arith.constant 0 : index
    %3 = vector.load %arg2[%c0_2, %c0_3, %c0_4] : memref<4x32x128xbf16, #tpu.memory_space<vmem>>, vector<1x32x128xbf16>
    %4 = vector.shape_cast %3 : vector<1x32x128xbf16> to vector<32x128xbf16>
    %cst_5 = arith.constant dense<0.000000e+00> : vector<256x128xf32>
    %5 = tpu.matmul %2, %4, %cst_5 {dimension_numbers = #tpu.dot_dimension_numbers<[1], [0], [0], [1], [0, 0, 1, 1], [], []>} : vector<256x32xbf16>, vector<32x128xbf16>, vector<256x128xf32> -> vector<256x128xf32>
    %6 = arith.addf %0, %5 : vector<256x128xf32>
    %c1 = arith.constant 1 : index
    %c0_6 = arith.constant 0 : index
    %c0_7 = arith.constant 0 : index
    %7 = vector.load %arg1[%c1, %c0_6, %c0_7] : memref<4x256x32xbf16, #tpu.memory_space<vmem>>, vector<1x256x32xbf16>
    %8 = vector.shape_cast %7 : vector<1x256x32xbf16> to vector<256x32xbf16>
    %c1_8 = arith.constant 1 : index
    %c0_9 = arith.constant 0 : index
    %c0_10 = arith.constant 0 : index
    %9 = vector.load %arg2[%c1_8, %c0_9, %c0_10] : memref<4x32x128xbf16, #tpu.memory_space<vmem>>, vector<1x32x128xbf16>
    %10 = vector.shape_cast %9 : vector<1x32x128xbf16> to vector<32x128xbf16>
    %cst_11 = arith.constant dense<0.000000e+00> : vector<256x128xf32>
    %11 = tpu.matmul %8, %10, %cst_11 {dimension_numbers = #tpu.dot_dimension_numbers<[1], [0], [0], [1], [0, 0, 1, 1], [], []>} : vector<256x32xbf16>, vector<32x128xbf16>, vector<256x128xf32> -> vector<256x128xf32>
    %12 = arith.addf %6, %11 : vector<256x128xf32>
    %c2 = arith.constant 2 : index
    %c0_12 = arith.constant 0 : index
    %c0_13 = arith.constant 0 : index
    %13 = vector.load %arg1[%c2, %c0_12, %c0_13] : memref<4x256x32xbf16, #tpu.memory_space<vmem>>, vector<1x256x32xbf16>
    %14 = vector.shape_cast %13 : vector<1x256x32xbf16> to vector<256x32xbf16>
    %c2_14 = arith.constant 2 : index
    %c0_15 = arith.constant 0 : index
    %c0_16 = arith.constant 0 : index
    %15 = vector.load %arg2[%c2_14, %c0_15, %c0_16] : memref<4x32x128xbf16, #tpu.memory_space<vmem>>, vector<1x32x128xbf16>
    %16 = vector.shape_cast %15 : vector<1x32x128xbf16> to vector<32x128xbf16>
    %cst_17 = arith.constant dense<0.000000e+00> : vector<256x128xf32>
    %17 = tpu.matmul %14, %16, %cst_17 {dimension_numbers = #tpu.dot_dimension_numbers<[1], [0], [0], [1], [0, 0, 1, 1], [], []>} : vector<256x32xbf16>, vector<32x128xbf16>, vector<256x128xf32> -> vector<256x128xf32>
    %18 = arith.addf %12, %17 : vector<256x128xf32>
    %c3 = arith.constant 3 : index
    %c0_18 = arith.constant 0 : index
    %c0_19 = arith.constant 0 : index
    %19 = vector.load %arg1[%c3, %c0_18, %c0_19] : memref<4x256x32xbf16, #tpu.memory_space<vmem>>, vector<1x256x32xbf16>
    %20 = vector.shape_cast %19 : vector<1x256x32xbf16> to vector<256x32xbf16>
    %c3_20 = arith.constant 3 : index
    %c0_21 = arith.constant 0 : index
    %c0_22 = arith.constant 0 : index
    %21 = vector.load %arg2[%c3_20, %c0_21, %c0_22] : memref<4x32x128xbf16, #tpu.memory_space<vmem>>, vector<1x32x128xbf16>
    %22 = vector.shape_cast %21 : vector<1x32x128xbf16> to vector<32x128xbf16>
    %cst_23 = arith.constant dense<0.000000e+00> : vector<256x128xf32>
    %23 = tpu.matmul %20, %22, %cst_23 {dimension_numbers = #tpu.dot_dimension_numbers<[1], [0], [0], [1], [0, 0, 1, 1], [], []>} : vector<256x32xbf16>, vector<32x128xbf16>, vector<256x128xf32> -> vector<256x128xf32>
    %24 = arith.addf %18, %23 : vector<256x128xf32>
    %25 = vector.shape_cast %24 : vector<256x128xf32> to vector<32x8x128xf32>
    %cst_24 = arith.constant dense<0.000000e+00> : vector<8x128xf32>
    %26 = vector.multi_reduction <add>, %25, %cst_24 [0] : vector<32x8x128xf32> to vector<8x128xf32>
    %c0_25 = arith.constant 0 : index
    %c0_26 = arith.constant 0 : index
    %27 = vector.load %arg4[%c0_25, %c0_26] : memref<8x128xf32, #tpu.memory_space<vmem>>, vector<8x128xf32>
    tpu.vector_store %arg4[%c0_25, %c0_26], %26 {strides = array<i32>} : memref<8x128xf32, #tpu.memory_space<vmem>>, vector<8x128xf32>,
    %28 = arith.mulf %25, %25 : vector<32x8x128xf32>
    %cst_27 = arith.constant dense<0.000000e+00> : vector<8x128xf32>
    %29 = vector.multi_reduction <add>, %28, %cst_27 [0] : vector<32x8x128xf32> to vector<8x128xf32>
    %c0_28 = arith.constant 0 : index
    %c0_29 = arith.constant 0 : index
    %30 = vector.load %arg5[%c0_28, %c0_29] : memref<8x128xf32, #tpu.memory_space<vmem>>, vector<8x128xf32>
    tpu.vector_store %arg5[%c0_28, %c0_29], %29 {strides = array<i32>} : memref<8x128xf32, #tpu.memory_space<vmem>>, vector<8x128xf32>,
    %31 = arith.truncf %24 : vector<256x128xf32> to vector<256x128xbf16>
    %c0_30 = arith.constant 0 : index
    %c0_31 = arith.constant 0 : index
    %32 = vector.load %arg3[%c0_30, %c0_31] : memref<256x128xbf16, #tpu.memory_space<vmem>>, vector<256x128xbf16>
    tpu.vector_store %arg3[%c0_30, %c0_31], %31 {strides = array<i32>} : memref<256x128xbf16, #tpu.memory_space<vmem>>, vector<256x128xbf16>,
    return
  }
  func.func @transform_0(%arg0: i32) -> (i32, i32, i32) {
    %c0_i32 = arith.constant 0 : i32
    %c0_i32_0 = arith.constant 0 : i32
    %c0_i32_1 = arith.constant 0 : i32
    return %c0_i32, %arg0, %c0_i32_0 : i32, i32, i32
  }
  func.func @transform_1(%arg0: i32) -> (i32, i32, i32) {
    %c0_i32 = arith.constant 0 : i32
    %c0_i32_0 = arith.constant 0 : i32
    %c0_i32_1 = arith.constant 0 : i32
    %c0_i32_2 = arith.constant 0 : i32
    return %c0_i32, %c0_i32_0, %c0_i32_1 : i32, i32, i32
  }
  func.func @transform_2(%arg0: i32) -> (i32, i32) {
    %c0_i32 = arith.constant 0 : i32
    %c0_i32_0 = arith.constant 0 : i32
    return %arg0, %c0_i32 : i32, i32
  }
  func.func @transform_3(%arg0: i32) -> (i32, i32) {
    %c0_i32 = arith.constant 0 : i32
    %c0_i32_0 = arith.constant 0 : i32
    return %arg0, %c0_i32 : i32, i32
  }
  func.func @transform_4(%arg0: i32) -> (i32, i32) {
    %c0_i32 = arith.constant 0 : i32
    %c0_i32_0 = arith.constant 0 : i32
    return %arg0, %c0_i32 : i32, i32
  }
}

module attributes {stable_mosaic.version = 11 : i64} {
  func.func @_bn_leaky_kernel(%arg0: i32, %arg1: memref<256x128xbf16, #tpu.memory_space<vmem>>, %arg2: memref<1x128xf32, #tpu.memory_space<vmem>>, %arg3: memref<1x128xf32, #tpu.memory_space<vmem>>, %arg4: memref<256x128xbf16, #tpu.memory_space<vmem>>) attributes {dimension_semantics = [#tpu.dimension_semantics<parallel>], iteration_bounds = array<i64: 2>, scalar_prefetch = 0 : i64, scratch_operands = 0 : i64, tpu.core_type = #tpu.core_type<tc>, window_params = [{transform_indices = @transform_0, window_bounds = array<i64: 256, 128>}, {pipeline_mode = #tpu.pipeline_mode<synchronous>, transform_indices = @transform_1, window_bounds = array<i64: 1, 128>}, {pipeline_mode = #tpu.pipeline_mode<synchronous>, transform_indices = @transform_2, window_bounds = array<i64: 1, 128>}, {transform_indices = @transform_3, window_bounds = array<i64: 256, 128>}]} {
    %c0 = arith.constant 0 : index
    %c0_0 = arith.constant 0 : index
    %0 = vector.load %arg1[%c0, %c0_0] : memref<256x128xbf16, #tpu.memory_space<vmem>>, vector<256x128xbf16>
    %1 = arith.extf %0 : vector<256x128xbf16> to vector<256x128xf32>
    %c0_1 = arith.constant 0 : index
    %c0_2 = arith.constant 0 : index
    %2 = vector.load %arg2[%c0_1, %c0_2] : memref<1x128xf32, #tpu.memory_space<vmem>>, vector<1x128xf32>
    %3 = vector.broadcast %2 : vector<1x128xf32> to vector<256x128xf32>
    %4 = arith.mulf %1, %3 : vector<256x128xf32>
    %c0_3 = arith.constant 0 : index
    %c0_4 = arith.constant 0 : index
    %5 = vector.load %arg3[%c0_3, %c0_4] : memref<1x128xf32, #tpu.memory_space<vmem>>, vector<1x128xf32>
    %6 = vector.broadcast %5 : vector<1x128xf32> to vector<256x128xf32>
    %7 = arith.addf %4, %6 : vector<256x128xf32>
    %cst = arith.constant 0.000000e+00 : f32
    %8 = vector.broadcast %cst : f32 to vector<256x128xf32>
    %9 = arith.cmpf oge, %7, %8 : vector<256x128xf32>
    %cst_5 = arith.constant 2.000000e-01 : f32
    %10 = vector.broadcast %cst_5 : f32 to vector<256x128xf32>
    %11 = arith.mulf %10, %7 : vector<256x128xf32>
    %12 = arith.select %9, %7, %11 : vector<256x128xi1>, vector<256x128xf32>
    %13 = arith.truncf %12 : vector<256x128xf32> to vector<256x128xbf16>
    %c0_6 = arith.constant 0 : index
    %c0_7 = arith.constant 0 : index
    %14 = vector.load %arg4[%c0_6, %c0_7] : memref<256x128xbf16, #tpu.memory_space<vmem>>, vector<256x128xbf16>
    tpu.vector_store %arg4[%c0_6, %c0_7], %13 {strides = array<i32>} : memref<256x128xbf16, #tpu.memory_space<vmem>>, vector<256x128xbf16>,
    return
  }
  func.func @transform_0(%arg0: i32) -> (i32, i32) {
    %c0_i32 = arith.constant 0 : i32
    %c0_i32_0 = arith.constant 0 : i32
    return %arg0, %c0_i32 : i32, i32
  }
  func.func @transform_1(%arg0: i32) -> (i32, i32) {
    %c0_i32 = arith.constant 0 : i32
    %c0_i32_0 = arith.constant 0 : i32
    %c0_i32_1 = arith.constant 0 : i32
    return %c0_i32, %c0_i32_0 : i32, i32
  }
  func.func @transform_2(%arg0: i32) -> (i32, i32) {
    %c0_i32 = arith.constant 0 : i32
    %c0_i32_0 = arith.constant 0 : i32
    %c0_i32_1 = arith.constant 0 : i32
    return %c0_i32, %c0_i32_0 : i32, i32
  }
  func.func @transform_3(%arg0: i32) -> (i32, i32) {
    %c0_i32 = arith.constant 0 : i32
    %c0_i32_0 = arith.constant 0 : i32
    return %arg0, %c0_i32 : i32, i32
  }
}

module attributes {stable_mosaic.version = 11 : i64} {
  func.func @_conv_stats_kernel(%arg0: i32, %arg1: memref<4x64x64xbf16, #tpu.memory_space<vmem>>, %arg2: memref<4x64x128xbf16, #tpu.memory_space<vmem>>, %arg3: memref<64x128xbf16, #tpu.memory_space<vmem>>, %arg4: memref<8x128xf32, #tpu.memory_space<vmem>>, %arg5: memref<8x128xf32, #tpu.memory_space<vmem>>) attributes {dimension_semantics = [#tpu.dimension_semantics<parallel>], iteration_bounds = array<i64: 2>, scalar_prefetch = 0 : i64, scratch_operands = 0 : i64, tpu.core_type = #tpu.core_type<tc>, window_params = [{transform_indices = @transform_0, window_bounds = array<i64: 4, 64, 64>}, {pipeline_mode = #tpu.pipeline_mode<synchronous>, transform_indices = @transform_1, window_bounds = array<i64: 4, 64, 128>}, {transform_indices = @transform_2, window_bounds = array<i64: 64, 128>}, {transform_indices = @transform_3, window_bounds = array<i64: 8, 128>}, {transform_indices = @transform_4, window_bounds = array<i64: 8, 128>}]} {
    %cst = arith.constant 0.000000e+00 : f32
    %0 = vector.broadcast %cst : f32 to vector<64x128xf32>
    %c0 = arith.constant 0 : index
    %c0_0 = arith.constant 0 : index
    %c0_1 = arith.constant 0 : index
    %1 = vector.load %arg1[%c0, %c0_0, %c0_1] : memref<4x64x64xbf16, #tpu.memory_space<vmem>>, vector<1x64x64xbf16>
    %2 = vector.shape_cast %1 : vector<1x64x64xbf16> to vector<64x64xbf16>
    %c0_2 = arith.constant 0 : index
    %c0_3 = arith.constant 0 : index
    %c0_4 = arith.constant 0 : index
    %3 = vector.load %arg2[%c0_2, %c0_3, %c0_4] : memref<4x64x128xbf16, #tpu.memory_space<vmem>>, vector<1x64x128xbf16>
    %4 = vector.shape_cast %3 : vector<1x64x128xbf16> to vector<64x128xbf16>
    %cst_5 = arith.constant dense<0.000000e+00> : vector<64x128xf32>
    %5 = tpu.matmul %2, %4, %cst_5 {dimension_numbers = #tpu.dot_dimension_numbers<[1], [0], [0], [1], [0, 0, 1, 1], [], []>} : vector<64x64xbf16>, vector<64x128xbf16>, vector<64x128xf32> -> vector<64x128xf32>
    %6 = arith.addf %0, %5 : vector<64x128xf32>
    %c1 = arith.constant 1 : index
    %c0_6 = arith.constant 0 : index
    %c0_7 = arith.constant 0 : index
    %7 = vector.load %arg1[%c1, %c0_6, %c0_7] : memref<4x64x64xbf16, #tpu.memory_space<vmem>>, vector<1x64x64xbf16>
    %8 = vector.shape_cast %7 : vector<1x64x64xbf16> to vector<64x64xbf16>
    %c1_8 = arith.constant 1 : index
    %c0_9 = arith.constant 0 : index
    %c0_10 = arith.constant 0 : index
    %9 = vector.load %arg2[%c1_8, %c0_9, %c0_10] : memref<4x64x128xbf16, #tpu.memory_space<vmem>>, vector<1x64x128xbf16>
    %10 = vector.shape_cast %9 : vector<1x64x128xbf16> to vector<64x128xbf16>
    %cst_11 = arith.constant dense<0.000000e+00> : vector<64x128xf32>
    %11 = tpu.matmul %8, %10, %cst_11 {dimension_numbers = #tpu.dot_dimension_numbers<[1], [0], [0], [1], [0, 0, 1, 1], [], []>} : vector<64x64xbf16>, vector<64x128xbf16>, vector<64x128xf32> -> vector<64x128xf32>
    %12 = arith.addf %6, %11 : vector<64x128xf32>
    %c2 = arith.constant 2 : index
    %c0_12 = arith.constant 0 : index
    %c0_13 = arith.constant 0 : index
    %13 = vector.load %arg1[%c2, %c0_12, %c0_13] : memref<4x64x64xbf16, #tpu.memory_space<vmem>>, vector<1x64x64xbf16>
    %14 = vector.shape_cast %13 : vector<1x64x64xbf16> to vector<64x64xbf16>
    %c2_14 = arith.constant 2 : index
    %c0_15 = arith.constant 0 : index
    %c0_16 = arith.constant 0 : index
    %15 = vector.load %arg2[%c2_14, %c0_15, %c0_16] : memref<4x64x128xbf16, #tpu.memory_space<vmem>>, vector<1x64x128xbf16>
    %16 = vector.shape_cast %15 : vector<1x64x128xbf16> to vector<64x128xbf16>
    %cst_17 = arith.constant dense<0.000000e+00> : vector<64x128xf32>
    %17 = tpu.matmul %14, %16, %cst_17 {dimension_numbers = #tpu.dot_dimension_numbers<[1], [0], [0], [1], [0, 0, 1, 1], [], []>} : vector<64x64xbf16>, vector<64x128xbf16>, vector<64x128xf32> -> vector<64x128xf32>
    %18 = arith.addf %12, %17 : vector<64x128xf32>
    %c3 = arith.constant 3 : index
    %c0_18 = arith.constant 0 : index
    %c0_19 = arith.constant 0 : index
    %19 = vector.load %arg1[%c3, %c0_18, %c0_19] : memref<4x64x64xbf16, #tpu.memory_space<vmem>>, vector<1x64x64xbf16>
    %20 = vector.shape_cast %19 : vector<1x64x64xbf16> to vector<64x64xbf16>
    %c3_20 = arith.constant 3 : index
    %c0_21 = arith.constant 0 : index
    %c0_22 = arith.constant 0 : index
    %21 = vector.load %arg2[%c3_20, %c0_21, %c0_22] : memref<4x64x128xbf16, #tpu.memory_space<vmem>>, vector<1x64x128xbf16>
    %22 = vector.shape_cast %21 : vector<1x64x128xbf16> to vector<64x128xbf16>
    %cst_23 = arith.constant dense<0.000000e+00> : vector<64x128xf32>
    %23 = tpu.matmul %20, %22, %cst_23 {dimension_numbers = #tpu.dot_dimension_numbers<[1], [0], [0], [1], [0, 0, 1, 1], [], []>} : vector<64x64xbf16>, vector<64x128xbf16>, vector<64x128xf32> -> vector<64x128xf32>
    %24 = arith.addf %18, %23 : vector<64x128xf32>
    %25 = vector.shape_cast %24 : vector<64x128xf32> to vector<8x8x128xf32>
    %cst_24 = arith.constant dense<0.000000e+00> : vector<8x128xf32>
    %26 = vector.multi_reduction <add>, %25, %cst_24 [0] : vector<8x8x128xf32> to vector<8x128xf32>
    %c0_25 = arith.constant 0 : index
    %c0_26 = arith.constant 0 : index
    %27 = vector.load %arg4[%c0_25, %c0_26] : memref<8x128xf32, #tpu.memory_space<vmem>>, vector<8x128xf32>
    tpu.vector_store %arg4[%c0_25, %c0_26], %26 {strides = array<i32>} : memref<8x128xf32, #tpu.memory_space<vmem>>, vector<8x128xf32>,
    %28 = arith.mulf %25, %25 : vector<8x8x128xf32>
    %cst_27 = arith.constant dense<0.000000e+00> : vector<8x128xf32>
    %29 = vector.multi_reduction <add>, %28, %cst_27 [0] : vector<8x8x128xf32> to vector<8x128xf32>
    %c0_28 = arith.constant 0 : index
    %c0_29 = arith.constant 0 : index
    %30 = vector.load %arg5[%c0_28, %c0_29] : memref<8x128xf32, #tpu.memory_space<vmem>>, vector<8x128xf32>
    tpu.vector_store %arg5[%c0_28, %c0_29], %29 {strides = array<i32>} : memref<8x128xf32, #tpu.memory_space<vmem>>, vector<8x128xf32>,
    %31 = arith.truncf %24 : vector<64x128xf32> to vector<64x128xbf16>
    %c0_30 = arith.constant 0 : index
    %c0_31 = arith.constant 0 : index
    %32 = vector.load %arg3[%c0_30, %c0_31] : memref<64x128xbf16, #tpu.memory_space<vmem>>, vector<64x128xbf16>
    tpu.vector_store %arg3[%c0_30, %c0_31], %31 {strides = array<i32>} : memref<64x128xbf16, #tpu.memory_space<vmem>>, vector<64x128xbf16>,
    return
  }
  func.func @transform_0(%arg0: i32) -> (i32, i32, i32) {
    %c0_i32 = arith.constant 0 : i32
    %c0_i32_0 = arith.constant 0 : i32
    %c0_i32_1 = arith.constant 0 : i32
    return %c0_i32, %arg0, %c0_i32_0 : i32, i32, i32
  }
  func.func @transform_1(%arg0: i32) -> (i32, i32, i32) {
    %c0_i32 = arith.constant 0 : i32
    %c0_i32_0 = arith.constant 0 : i32
    %c0_i32_1 = arith.constant 0 : i32
    %c0_i32_2 = arith.constant 0 : i32
    return %c0_i32, %c0_i32_0, %c0_i32_1 : i32, i32, i32
  }
  func.func @transform_2(%arg0: i32) -> (i32, i32) {
    %c0_i32 = arith.constant 0 : i32
    %c0_i32_0 = arith.constant 0 : i32
    return %arg0, %c0_i32 : i32, i32
  }
  func.func @transform_3(%arg0: i32) -> (i32, i32) {
    %c0_i32 = arith.constant 0 : i32
    %c0_i32_0 = arith.constant 0 : i32
    return %arg0, %c0_i32 : i32, i32
  }
  func.func @transform_4(%arg0: i32) -> (i32, i32) {
    %c0_i32 = arith.constant 0 : i32
    %c0_i32_0 = arith.constant 0 : i32
    return %arg0, %c0_i32 : i32, i32
  }
}

module attributes {stable_mosaic.version = 11 : i64} {
  func.func @_bn_leaky_kernel(%arg0: i32, %arg1: memref<64x128xbf16, #tpu.memory_space<vmem>>, %arg2: memref<1x128xf32, #tpu.memory_space<vmem>>, %arg3: memref<1x128xf32, #tpu.memory_space<vmem>>, %arg4: memref<64x128xbf16, #tpu.memory_space<vmem>>) attributes {dimension_semantics = [#tpu.dimension_semantics<parallel>], iteration_bounds = array<i64: 2>, scalar_prefetch = 0 : i64, scratch_operands = 0 : i64, tpu.core_type = #tpu.core_type<tc>, window_params = [{transform_indices = @transform_0, window_bounds = array<i64: 64, 128>}, {pipeline_mode = #tpu.pipeline_mode<synchronous>, transform_indices = @transform_1, window_bounds = array<i64: 1, 128>}, {pipeline_mode = #tpu.pipeline_mode<synchronous>, transform_indices = @transform_2, window_bounds = array<i64: 1, 128>}, {transform_indices = @transform_3, window_bounds = array<i64: 64, 128>}]} {
    %c0 = arith.constant 0 : index
    %c0_0 = arith.constant 0 : index
    %0 = vector.load %arg1[%c0, %c0_0] : memref<64x128xbf16, #tpu.memory_space<vmem>>, vector<64x128xbf16>
    %1 = arith.extf %0 : vector<64x128xbf16> to vector<64x128xf32>
    %c0_1 = arith.constant 0 : index
    %c0_2 = arith.constant 0 : index
    %2 = vector.load %arg2[%c0_1, %c0_2] : memref<1x128xf32, #tpu.memory_space<vmem>>, vector<1x128xf32>
    %3 = vector.broadcast %2 : vector<1x128xf32> to vector<64x128xf32>
    %4 = arith.mulf %1, %3 : vector<64x128xf32>
    %c0_3 = arith.constant 0 : index
    %c0_4 = arith.constant 0 : index
    %5 = vector.load %arg3[%c0_3, %c0_4] : memref<1x128xf32, #tpu.memory_space<vmem>>, vector<1x128xf32>
    %6 = vector.broadcast %5 : vector<1x128xf32> to vector<64x128xf32>
    %7 = arith.addf %4, %6 : vector<64x128xf32>
    %cst = arith.constant 0.000000e+00 : f32
    %8 = vector.broadcast %cst : f32 to vector<64x128xf32>
    %9 = arith.cmpf oge, %7, %8 : vector<64x128xf32>
    %cst_5 = arith.constant 2.000000e-01 : f32
    %10 = vector.broadcast %cst_5 : f32 to vector<64x128xf32>
    %11 = arith.mulf %10, %7 : vector<64x128xf32>
    %12 = arith.select %9, %7, %11 : vector<64x128xi1>, vector<64x128xf32>
    %13 = arith.truncf %12 : vector<64x128xf32> to vector<64x128xbf16>
    %c0_6 = arith.constant 0 : index
    %c0_7 = arith.constant 0 : index
    %14 = vector.load %arg4[%c0_6, %c0_7] : memref<64x128xbf16, #tpu.memory_space<vmem>>, vector<64x128xbf16>
    tpu.vector_store %arg4[%c0_6, %c0_7], %13 {strides = array<i32>} : memref<64x128xbf16, #tpu.memory_space<vmem>>, vector<64x128xbf16>,
    return
  }
  func.func @transform_0(%arg0: i32) -> (i32, i32) {
    %c0_i32 = arith.constant 0 : i32
    %c0_i32_0 = arith.constant 0 : i32
    return %arg0, %c0_i32 : i32, i32
  }
  func.func @transform_1(%arg0: i32) -> (i32, i32) {
    %c0_i32 = arith.constant 0 : i32
    %c0_i32_0 = arith.constant 0 : i32
    %c0_i32_1 = arith.constant 0 : i32
    return %c0_i32, %c0_i32_0 : i32, i32
  }
  func.func @transform_2(%arg0: i32) -> (i32, i32) {
    %c0_i32 = arith.constant 0 : i32
    %c0_i32_0 = arith.constant 0 : i32
    %c0_i32_1 = arith.constant 0 : i32
    return %c0_i32, %c0_i32_0 : i32, i32
  }
  func.func @transform_3(%arg0: i32) -> (i32, i32) {
    %c0_i32 = arith.constant 0 : i32
    %c0_i32_0 = arith.constant 0 : i32
    return %arg0, %c0_i32 : i32, i32
  }
}

module attributes {stable_mosaic.version = 11 : i64} {
  func.func @_conv_stats_kernel(%arg0: i32, %arg1: memref<4x16x128xbf16, #tpu.memory_space<vmem>>, %arg2: memref<4x128x128xbf16, #tpu.memory_space<vmem>>, %arg3: memref<16x128xbf16, #tpu.memory_space<vmem>>, %arg4: memref<8x128xf32, #tpu.memory_space<vmem>>, %arg5: memref<8x128xf32, #tpu.memory_space<vmem>>) attributes {dimension_semantics = [#tpu.dimension_semantics<parallel>], iteration_bounds = array<i64: 2>, scalar_prefetch = 0 : i64, scratch_operands = 0 : i64, tpu.core_type = #tpu.core_type<tc>, window_params = [{transform_indices = @transform_0, window_bounds = array<i64: 4, 16, 128>}, {pipeline_mode = #tpu.pipeline_mode<synchronous>, transform_indices = @transform_1, window_bounds = array<i64: 4, 128, 128>}, {transform_indices = @transform_2, window_bounds = array<i64: 16, 128>}, {transform_indices = @transform_3, window_bounds = array<i64: 8, 128>}, {transform_indices = @transform_4, window_bounds = array<i64: 8, 128>}]} {
    %cst = arith.constant 0.000000e+00 : f32
    %0 = vector.broadcast %cst : f32 to vector<16x128xf32>
    %c0 = arith.constant 0 : index
    %c0_0 = arith.constant 0 : index
    %c0_1 = arith.constant 0 : index
    %1 = vector.load %arg1[%c0, %c0_0, %c0_1] : memref<4x16x128xbf16, #tpu.memory_space<vmem>>, vector<1x16x128xbf16>
    %2 = vector.shape_cast %1 : vector<1x16x128xbf16> to vector<16x128xbf16>
    %c0_2 = arith.constant 0 : index
    %c0_3 = arith.constant 0 : index
    %c0_4 = arith.constant 0 : index
    %3 = vector.load %arg2[%c0_2, %c0_3, %c0_4] : memref<4x128x128xbf16, #tpu.memory_space<vmem>>, vector<1x128x128xbf16>
    %4 = vector.shape_cast %3 : vector<1x128x128xbf16> to vector<128x128xbf16>
    %cst_5 = arith.constant dense<0.000000e+00> : vector<16x128xf32>
    %5 = tpu.matmul %2, %4, %cst_5 {dimension_numbers = #tpu.dot_dimension_numbers<[1], [0], [0], [1], [0, 0, 1, 1], [], []>} : vector<16x128xbf16>, vector<128x128xbf16>, vector<16x128xf32> -> vector<16x128xf32>
    %6 = arith.addf %0, %5 : vector<16x128xf32>
    %c1 = arith.constant 1 : index
    %c0_6 = arith.constant 0 : index
    %c0_7 = arith.constant 0 : index
    %7 = vector.load %arg1[%c1, %c0_6, %c0_7] : memref<4x16x128xbf16, #tpu.memory_space<vmem>>, vector<1x16x128xbf16>
    %8 = vector.shape_cast %7 : vector<1x16x128xbf16> to vector<16x128xbf16>
    %c1_8 = arith.constant 1 : index
    %c0_9 = arith.constant 0 : index
    %c0_10 = arith.constant 0 : index
    %9 = vector.load %arg2[%c1_8, %c0_9, %c0_10] : memref<4x128x128xbf16, #tpu.memory_space<vmem>>, vector<1x128x128xbf16>
    %10 = vector.shape_cast %9 : vector<1x128x128xbf16> to vector<128x128xbf16>
    %cst_11 = arith.constant dense<0.000000e+00> : vector<16x128xf32>
    %11 = tpu.matmul %8, %10, %cst_11 {dimension_numbers = #tpu.dot_dimension_numbers<[1], [0], [0], [1], [0, 0, 1, 1], [], []>} : vector<16x128xbf16>, vector<128x128xbf16>, vector<16x128xf32> -> vector<16x128xf32>
    %12 = arith.addf %6, %11 : vector<16x128xf32>
    %c2 = arith.constant 2 : index
    %c0_12 = arith.constant 0 : index
    %c0_13 = arith.constant 0 : index
    %13 = vector.load %arg1[%c2, %c0_12, %c0_13] : memref<4x16x128xbf16, #tpu.memory_space<vmem>>, vector<1x16x128xbf16>
    %14 = vector.shape_cast %13 : vector<1x16x128xbf16> to vector<16x128xbf16>
    %c2_14 = arith.constant 2 : index
    %c0_15 = arith.constant 0 : index
    %c0_16 = arith.constant 0 : index
    %15 = vector.load %arg2[%c2_14, %c0_15, %c0_16] : memref<4x128x128xbf16, #tpu.memory_space<vmem>>, vector<1x128x128xbf16>
    %16 = vector.shape_cast %15 : vector<1x128x128xbf16> to vector<128x128xbf16>
    %cst_17 = arith.constant dense<0.000000e+00> : vector<16x128xf32>
    %17 = tpu.matmul %14, %16, %cst_17 {dimension_numbers = #tpu.dot_dimension_numbers<[1], [0], [0], [1], [0, 0, 1, 1], [], []>} : vector<16x128xbf16>, vector<128x128xbf16>, vector<16x128xf32> -> vector<16x128xf32>
    %18 = arith.addf %12, %17 : vector<16x128xf32>
    %c3 = arith.constant 3 : index
    %c0_18 = arith.constant 0 : index
    %c0_19 = arith.constant 0 : index
    %19 = vector.load %arg1[%c3, %c0_18, %c0_19] : memref<4x16x128xbf16, #tpu.memory_space<vmem>>, vector<1x16x128xbf16>
    %20 = vector.shape_cast %19 : vector<1x16x128xbf16> to vector<16x128xbf16>
    %c3_20 = arith.constant 3 : index
    %c0_21 = arith.constant 0 : index
    %c0_22 = arith.constant 0 : index
    %21 = vector.load %arg2[%c3_20, %c0_21, %c0_22] : memref<4x128x128xbf16, #tpu.memory_space<vmem>>, vector<1x128x128xbf16>
    %22 = vector.shape_cast %21 : vector<1x128x128xbf16> to vector<128x128xbf16>
    %cst_23 = arith.constant dense<0.000000e+00> : vector<16x128xf32>
    %23 = tpu.matmul %20, %22, %cst_23 {dimension_numbers = #tpu.dot_dimension_numbers<[1], [0], [0], [1], [0, 0, 1, 1], [], []>} : vector<16x128xbf16>, vector<128x128xbf16>, vector<16x128xf32> -> vector<16x128xf32>
    %24 = arith.addf %18, %23 : vector<16x128xf32>
    %25 = vector.shape_cast %24 : vector<16x128xf32> to vector<2x8x128xf32>
    %cst_24 = arith.constant dense<0.000000e+00> : vector<8x128xf32>
    %26 = vector.multi_reduction <add>, %25, %cst_24 [0] : vector<2x8x128xf32> to vector<8x128xf32>
    %c0_25 = arith.constant 0 : index
    %c0_26 = arith.constant 0 : index
    %27 = vector.load %arg4[%c0_25, %c0_26] : memref<8x128xf32, #tpu.memory_space<vmem>>, vector<8x128xf32>
    tpu.vector_store %arg4[%c0_25, %c0_26], %26 {strides = array<i32>} : memref<8x128xf32, #tpu.memory_space<vmem>>, vector<8x128xf32>,
    %28 = arith.mulf %25, %25 : vector<2x8x128xf32>
    %cst_27 = arith.constant dense<0.000000e+00> : vector<8x128xf32>
    %29 = vector.multi_reduction <add>, %28, %cst_27 [0] : vector<2x8x128xf32> to vector<8x128xf32>
    %c0_28 = arith.constant 0 : index
    %c0_29 = arith.constant 0 : index
    %30 = vector.load %arg5[%c0_28, %c0_29] : memref<8x128xf32, #tpu.memory_space<vmem>>, vector<8x128xf32>
    tpu.vector_store %arg5[%c0_28, %c0_29], %29 {strides = array<i32>} : memref<8x128xf32, #tpu.memory_space<vmem>>, vector<8x128xf32>,
    %31 = arith.truncf %24 : vector<16x128xf32> to vector<16x128xbf16>
    %c0_30 = arith.constant 0 : index
    %c0_31 = arith.constant 0 : index
    %32 = vector.load %arg3[%c0_30, %c0_31] : memref<16x128xbf16, #tpu.memory_space<vmem>>, vector<16x128xbf16>
    tpu.vector_store %arg3[%c0_30, %c0_31], %31 {strides = array<i32>} : memref<16x128xbf16, #tpu.memory_space<vmem>>, vector<16x128xbf16>,
    return
  }
  func.func @transform_0(%arg0: i32) -> (i32, i32, i32) {
    %c0_i32 = arith.constant 0 : i32
    %c0_i32_0 = arith.constant 0 : i32
    %c0_i32_1 = arith.constant 0 : i32
    return %c0_i32, %arg0, %c0_i32_0 : i32, i32, i32
  }
  func.func @transform_1(%arg0: i32) -> (i32, i32, i32) {
    %c0_i32 = arith.constant 0 : i32
    %c0_i32_0 = arith.constant 0 : i32
    %c0_i32_1 = arith.constant 0 : i32
    %c0_i32_2 = arith.constant 0 : i32
    return %c0_i32, %c0_i32_0, %c0_i32_1 : i32, i32, i32
  }
  func.func @transform_2(%arg0: i32) -> (i32, i32) {
    %c0_i32 = arith.constant 0 : i32
    %c0_i32_0 = arith.constant 0 : i32
    return %arg0, %c0_i32 : i32, i32
  }
  func.func @transform_3(%arg0: i32) -> (i32, i32) {
    %c0_i32 = arith.constant 0 : i32
    %c0_i32_0 = arith.constant 0 : i32
    return %arg0, %c0_i32 : i32, i32
  }
  func.func @transform_4(%arg0: i32) -> (i32, i32) {
    %c0_i32 = arith.constant 0 : i32
    %c0_i32_0 = arith.constant 0 : i32
    return %arg0, %c0_i32 : i32, i32
  }
}

module attributes {stable_mosaic.version = 11 : i64} {
  func.func @_bn_leaky_kernel(%arg0: i32, %arg1: memref<16x128xbf16, #tpu.memory_space<vmem>>, %arg2: memref<1x128xf32, #tpu.memory_space<vmem>>, %arg3: memref<1x128xf32, #tpu.memory_space<vmem>>, %arg4: memref<16x128xbf16, #tpu.memory_space<vmem>>) attributes {dimension_semantics = [#tpu.dimension_semantics<parallel>], iteration_bounds = array<i64: 2>, scalar_prefetch = 0 : i64, scratch_operands = 0 : i64, tpu.core_type = #tpu.core_type<tc>, window_params = [{transform_indices = @transform_0, window_bounds = array<i64: 16, 128>}, {pipeline_mode = #tpu.pipeline_mode<synchronous>, transform_indices = @transform_1, window_bounds = array<i64: 1, 128>}, {pipeline_mode = #tpu.pipeline_mode<synchronous>, transform_indices = @transform_2, window_bounds = array<i64: 1, 128>}, {transform_indices = @transform_3, window_bounds = array<i64: 16, 128>}]} {
    %c0 = arith.constant 0 : index
    %c0_0 = arith.constant 0 : index
    %0 = vector.load %arg1[%c0, %c0_0] : memref<16x128xbf16, #tpu.memory_space<vmem>>, vector<16x128xbf16>
    %1 = arith.extf %0 : vector<16x128xbf16> to vector<16x128xf32>
    %c0_1 = arith.constant 0 : index
    %c0_2 = arith.constant 0 : index
    %2 = vector.load %arg2[%c0_1, %c0_2] : memref<1x128xf32, #tpu.memory_space<vmem>>, vector<1x128xf32>
    %3 = vector.broadcast %2 : vector<1x128xf32> to vector<16x128xf32>
    %4 = arith.mulf %1, %3 : vector<16x128xf32>
    %c0_3 = arith.constant 0 : index
    %c0_4 = arith.constant 0 : index
    %5 = vector.load %arg3[%c0_3, %c0_4] : memref<1x128xf32, #tpu.memory_space<vmem>>, vector<1x128xf32>
    %6 = vector.broadcast %5 : vector<1x128xf32> to vector<16x128xf32>
    %7 = arith.addf %4, %6 : vector<16x128xf32>
    %cst = arith.constant 0.000000e+00 : f32
    %8 = vector.broadcast %cst : f32 to vector<16x128xf32>
    %9 = arith.cmpf oge, %7, %8 : vector<16x128xf32>
    %cst_5 = arith.constant 2.000000e-01 : f32
    %10 = vector.broadcast %cst_5 : f32 to vector<16x128xf32>
    %11 = arith.mulf %10, %7 : vector<16x128xf32>
    %12 = arith.select %9, %7, %11 : vector<16x128xi1>, vector<16x128xf32>
    %13 = arith.truncf %12 : vector<16x128xf32> to vector<16x128xbf16>
    %c0_6 = arith.constant 0 : index
    %c0_7 = arith.constant 0 : index
    %14 = vector.load %arg4[%c0_6, %c0_7] : memref<16x128xbf16, #tpu.memory_space<vmem>>, vector<16x128xbf16>
    tpu.vector_store %arg4[%c0_6, %c0_7], %13 {strides = array<i32>} : memref<16x128xbf16, #tpu.memory_space<vmem>>, vector<16x128xbf16>,
    return
  }
  func.func @transform_0(%arg0: i32) -> (i32, i32) {
    %c0_i32 = arith.constant 0 : i32
    %c0_i32_0 = arith.constant 0 : i32
    return %arg0, %c0_i32 : i32, i32
  }
  func.func @transform_1(%arg0: i32) -> (i32, i32) {
    %c0_i32 = arith.constant 0 : i32
    %c0_i32_0 = arith.constant 0 : i32
    %c0_i32_1 = arith.constant 0 : i32
    return %c0_i32, %c0_i32_0 : i32, i32
  }
  func.func @transform_2(%arg0: i32) -> (i32, i32) {
    %c0_i32 = arith.constant 0 : i32
    %c0_i32_0 = arith.constant 0 : i32
    %c0_i32_1 = arith.constant 0 : i32
    return %c0_i32, %c0_i32_0 : i32, i32
  }
  func.func @transform_3(%arg0: i32) -> (i32, i32) {
    %c0_i32 = arith.constant 0 : i32
    %c0_i32_0 = arith.constant 0 : i32
    return %arg0, %c0_i32 : i32, i32
  }
}

</mosaic_0001>

<bundles_post_ra>
// kernel: net_a_forward.7
= control target key start
LH: loop header
LB: loop body
LE: loop exit
PB: predicated region body
PF: predicated region fallthrough
CT: control target
= control target key end

     0   :  { %s5960_s9 = smov 0   ;;  %s5962_s10 = smov 0   ;;  %s6576_s0 = inlined_call_operand.vmem [shape: bf16[4,2048,16], index: 0, kind: input, shape index: {}]   ;;  %s6577_s1 = inlined_call_operand.vmem [shape: bf16[4,16,128], index: 1, kind: input, shape index: {}]   ;;  %s6578_s2 = inlined_call_operand.vmem [shape: bf16[2048,128], index: 2, kind: output, shape index: {}]  }
   0x1   :  { %s5964_s11 = smov 0  }
   0x2 LB: > { %s4386_s12 = sadd.s32 4294967295, %s5943_s11   ;;  %s5977_s13 = sadd.s32 1, %s5943_s11   ;;  %s5943_s11 = sphi %s5964_s11, %s6581_s11   ;;  %s5939_s10 = sphi %s5962_s10, %s6580_s10   ;;  %s5935_s9 = sphi %s5960_s9, %s6579_s9  }
   0x3   : > { %s16_s14 = ssub.s32 %s5943_s11, %s5977_s13  ;;  %s19_s15 = sadd.s32 1, %s5939_s10 }
   0x4   : > { %p17_p0 = scmp.eq.s32.totalorder %s16_s14, 0  ;;  %p26_p1 = scmp.ne.s32.totalorder %s5939_s10, %s5935_s9 }
   0x5   : > { %p27_p2 = scmp.eq.s32.totalorder %s5943_s11, 0  ;;  %p4389_p4 = scmp.ge.s32.totalorder %s5943_s11, 4 }
   0x6   : > { %s5986_s16 = scalar_select %p17_p0, %s5939_s10, %s19_s15  }
   0x7   : > { %p28_p3 = por %p27_p2, %p26_p1  ;;  %102 = sbr.rel (%p4389_p4) target bundleno = 82 (0x52), region = 20 }
   0xe   : > { %105 = sbr.rel (!%p28_p3) target bundleno = 82 (0x52), region = 24  ;;  %s107_s17 = sand.u32 (%p28_p3), 1, %s5939_s10  }
   0xf   : > { %s4921_s18 = sshll.u32 (%p28_p3), %s5943_s11, 8  ;;  %s4390_s19 = sshll.u32 (%p28_p3), %s107_s17, 10 }
  0x10   : > { %s5994_s22 = scalar_lea.vmem (%p28_p3), %s6576_s0, %s4921_s18  ;;  %s5999_s23 = scalar_lea.vmem (%p28_p3), [#allocation2], %s4390_s19 }
  0x11   : > { %v128_v0 = vld [vmem:[%s5994_s22] sm:$0xff] (%p28_p3)   ;;  %v132_v1 = vld [vmem:[%s5994_s22 + $0x8] sm:$0xff] (%p28_p3)   ;;  %v136_v2 = vld [vmem:[%s5994_s22 + $0x10] sm:$0xff] (%p28_p3)  }
  0x12   : > { %129 = vst [vmem:[%s5999_s23] sm:$0xff] (%p28_p3), %v128_v0   ;;  %133 = vst [vmem:[%s5999_s23 + $0x8] sm:$0xff] (%p28_p3), %v132_v1   ;;  %v140_v3 = vld [vmem:[%s5994_s22 + $0x18] sm:$0xff] (%p28_p3)   ;;  %v144_v4 = vld [vmem:[%s5994_s22 + $0x20] sm:$0xff] (%p28_p3)  }
  0x13   : > { %137 = vst [vmem:[%s5999_s23 + $0x10] sm:$0xff] (%p28_p3), %v136_v2   ;;  %v148_v5 = vld [vmem:[%s5994_s22 + $0x28] sm:$0xff] (%p28_p3)   ;;  %141 = vst [vmem:[%s5999_s23 + $0x18] sm:$0xff] (%p28_p3), %v140_v3   ;;  %v152_v6 = vld [vmem:[%s5994_s22 + $0x30] sm:$0xff] (%p28_p3)  }
  0x14   : > { %145 = vst [vmem:[%s5999_s23 + $0x20] sm:$0xff] (%p28_p3), %v144_v4   ;;  %149 = vst [vmem:[%s5999_s23 + $0x28] sm:$0xff] (%p28_p3), %v148_v5   ;;  %v156_v7 = vld [vmem:[%s5994_s22 + $0x38] sm:$0xff] (%p28_p3)   ;;  %v160_v8 = vld [vmem:[%s5994_s22 + $0x40] sm:$0xff] (%p28_p3)  }
  0x15   : > { %153 = vst [vmem:[%s5999_s23 + $0x30] sm:$0xff] %v152_v6   ;;  %157 = vst [vmem:[%s5999_s23 + $0x38] sm:$0xff] %v156_v7   ;;  %v164_v9 = vld [vmem:[%s5994_s22 + $0x48] sm:$0xff]   ;;  %v168_v10 = vld [vmem:[%s5994_s22 + $0x50] sm:$0xff]  }
  0x16   : > { %161 = vst [vmem:[%s5999_s23 + $0x40] sm:$0xff] %v160_v8   ;;  %v172_v11 = vld [vmem:[%s5994_s22 + $0x58] sm:$0xff]   ;;  %165 = vst [vmem:[%s5999_s23 + $0x48] sm:$0xff] %v164_v9   ;;  %v176_v12 = vld [vmem:[%s5994_s22 + $0x60] sm:$0xff]  }
  0x17   : > { %169 = vst [vmem:[%s5999_s23 + $0x50] sm:$0xff] %v168_v10   ;;  %173 = vst [vmem:[%s5999_s23 + $0x58] sm:$0xff] %v172_v11   ;;  %v180_v13 = vld [vmem:[%s5994_s22 + $0x68] sm:$0xff]   ;;  %v184_v14 = vld [vmem:[%s5994_s22 + $0x70] sm:$0xff]  }
  0x18   : > { %177 = vst [vmem:[%s5999_s23 + $0x60] sm:$0xff] %v176_v12   ;;  %181 = vst [vmem:[%s5999_s23 + $0x68] sm:$0xff] %v180_v13   ;;  %v188_v15 = vld [vmem:[%s5994_s22 + $0x78] sm:$0xff]   ;;  %v192_v16 = vld [vmem:[%s5994_s22 + $0x80] sm:$0xff]  }
  0x19   : > { %185 = vst [vmem:[%s5999_s23 + $0x70] sm:$0xff] %v184_v14   ;;  %v196_v17 = vld [vmem:[%s5994_s22 + $0x88] sm:$0xff]   ;;  %189 = vst [vmem:[%s5999_s23 + $0x78] sm:$0xff] %v188_v15   ;;  %v200_v18 = vld [vmem:[%s5994_s22 + $0x90] sm:$0xff]  }
  0x1a   : > { %193 = vst [vmem:[%s5999_s23 + $0x80] sm:$0xff] %v192_v16   ;;  %197 = vst [vmem:[%s5999_s23 + $0x88] sm:$0xff] %v196_v17   ;;  %v204_v19 = vld [vmem:[%s5994_s22 + $0x98] sm:$0xff]   ;;  %v208_v20 = vld [vmem:[%s5994_s22 + $0xa0] sm:$0xff]  }
  0x1b   : > { %201 = vst [vmem:[%s5999_s23 + $0x90] sm:$0xff] %v200_v18   ;;  %205 = vst [vmem:[%s5999_s23 + $0x98] sm:$0xff] %v204_v19   ;;  %v212_v21 = vld [vmem:[%s5994_s22 + $0xa8] sm:$0xff]   ;;  %v216_v22 = vld [vmem:[%s5994_s22 + $0xb0] sm:$0xff]  }
  0x1c   : > { %209 = vst [vmem:[%s5999_s23 + $0xa0] sm:$0xff] %v208_v20   ;;  %v220_v23 = vld [vmem:[%s5994_s22 + $0xb8] sm:$0xff]   ;;  %213 = vst [vmem:[%s5999_s23 + $0xa8] sm:$0xff] %v212_v21   ;;  %v224_v24 = vld [vmem:[%s5994_s22 + $0xc0] sm:$0xff]  }
  0x1d   : > { %217 = vst [vmem:[%s5999_s23 + $0xb0] sm:$0xff] %v216_v22   ;;  %221 = vst [vmem:[%s5999_s23 + $0xb8] sm:$0xff] %v220_v23   ;;  %v228_v25 = vld [vmem:[%s5994_s22 + $0xc8] sm:$0xff]   ;;  %v232_v26 = vld [vmem:[%s5994_s22 + $0xd0] sm:$0xff]  }
  0x1e   : > { %225 = vst [vmem:[%s5999_s23 + $0xc0] sm:$0xff] %v224_v24   ;;  %229 = vst [vmem:[%s5999_s23 + $0xc8] sm:$0xff] %v228_v25   ;;  %v236_v27 = vld [vmem:[%s5994_s22 + $0xd8] sm:$0xff]   ;;  %v240_v28 = vld [vmem:[%s5994_s22 + $0xe0] sm:$0xff]  }
  0x1f   : > { %233 = vst [vmem:[%s5999_s23 + $0xd0] sm:$0xff] %v232_v26   ;;  %v244_v29 = vld [vmem:[%s5994_s22 + $0xe8] sm:$0xff]   ;;  %237 = vst [vmem:[%s5999_s23 + $0xd8] sm:$0xff] %v236_v27   ;;  %v248_v30 = vld [vmem:[%s5994_s22 + $0xf0] sm:$0xff]  }
  0x20   : > { %241 = vst [vmem:[%s5999_s23 + $0xe0] sm:$0xff] %v240_v28   ;;  %245 = vst [vmem:[%s5999_s23 + $0xe8] sm:$0xff] %v244_v29   ;;  %v252_v31 = vld [vmem:[%s5994_s22 + $0xf8] sm:$0xff]   ;;  %v256_v32 = vld [vmem:[%s5994_s22 + $0x400] sm:$0xff]  }
  0x21   : > { %249 = vst [vmem:[%s5999_s23 + $0xf0] sm:$0xff] %v248_v30   ;;  %253 = vst [vmem:[%s5999_s23 + $0xf8] sm:$0xff] %v252_v31   ;;  %v260_v33 = vld [vmem:[%s5994_s22 + $0x408] sm:$0xff]   ;;  %v264_v34 = vld [vmem:[%s5994_s22 + $0x410] sm:$0xff]  }
  0x22   : > { %257 = vst [vmem:[%s5999_s23 + $0x100] sm:$0xff] %v256_v32   ;;  %v268_v35 = vld [vmem:[%s5994_s22 + $0x418] sm:$0xff]   ;;  %261 = vst [vmem:[%s5999_s23 + $0x108] sm:$0xff] %v260_v33   ;;  %v272_v36 = vld [vmem:[%s5994_s22 + $0x420] sm:$0xff]  }
  0x23   : > { %265 = vst [vmem:[%s5999_s23 + $0x110] sm:$0xff] %v264_v34   ;;  %269 = vst [vmem:[%s5999_s23 + $0x118] sm:$0xff] %v268_v35   ;;  %v276_v37 = vld [vmem:[%s5994_s22 + $0x428] sm:$0xff]   ;;  %v280_v38 = vld [vmem:[%s5994_s22 + $0x430] sm:$0xff]  }
  0x24   : > { %273 = vst [vmem:[%s5999_s23 + $0x120] sm:$0xff] %v272_v36   ;;  %277 = vst [vmem:[%s5999_s23 + $0x128] sm:$0xff] %v276_v37   ;;  %v284_v39 = vld [vmem:[%s5994_s22 + $0x438] sm:$0xff]   ;;  %v288_v40 = vld [vmem:[%s5994_s22 + $0x440] sm:$0xff]  }
  0x25   : > { %281 = vst [vmem:[%s5999_s23 + $0x130] sm:$0xff] %v280_v38   ;;  %v292_v41 = vld [vmem:[%s5994_s22 + $0x448] sm:$0xff]   ;;  %285 = vst [vmem:[%s5999_s23 + $0x138] sm:$0xff] %v284_v39   ;;  %v296_v42 = vld [vmem:[%s5994_s22 + $0x450] sm:$0xff]  }
  0x26   : > { %289 = vst [vmem:[%s5999_s23 + $0x140] sm:$0xff] %v288_v40   ;;  %293 = vst [vmem:[%s5999_s23 + $0x148] sm:$0xff] %v292_v41   ;;  %v300_v43 = vld [vmem:[%s5994_s22 + $0x458] sm:$0xff]   ;;  %v304_v44 = vld [vmem:[%s5994_s22 + $0x460] sm:$0xff]  }
  0x27   : > { %297 = vst [vmem:[%s5999_s23 + $0x150] sm:$0xff] %v296_v42   ;;  %301 = vst [vmem:[%s5999_s23 + $0x158] sm:$0xff] %v300_v43   ;;  %v308_v45 = vld [vmem:[%s5994_s22 + $0x468] sm:$0xff]   ;;  %v312_v46 = vld [vmem:[%s5994_s22 + $0x470] sm:$0xff]  }
  0x28   : > { %305 = vst [vmem:[%s5999_s23 + $0x160] sm:$0xff] %v304_v44   ;;  %v316_v47 = vld [vmem:[%s5994_s22 + $0x478] sm:$0xff]   ;;  %309 = vst [vmem:[%s5999_s23 + $0x168] sm:$0xff] %v308_v45   ;;  %v320_v48 = vld [vmem:[%s5994_s22 + $0x480] sm:$0xff]  }
  0x29   : > { %313 = vst [vmem:[%s5999_s23 + $0x170] sm:$0xff] %v312_v46   ;;  %317 = vst [vmem:[%s5999_s23 + $0x178] sm:$0xff] %v316_v47   ;;  %v324_v49 = vld [vmem:[%s5994_s22 + $0x488] sm:$0xff]   ;;  %v328_v50 = vld [vmem:[%s5994_s22 + $0x490] sm:$0xff]  }
  0x2a   : > { %321 = vst [vmem:[%s5999_s23 + $0x180] sm:$0xff] %v320_v48   ;;  %325 = vst [vmem:[%s5999_s23 + $0x188] sm:$0xff] %v324_v49   ;;  %v332_v51 = vld [vmem:[%s5994_s22 + $0x498] sm:$0xff]   ;;  %v336_v52 = vld [vmem:[%s5994_s22 + $0x4a0] sm:$0xff]  }
  0x2b   : > { %329 = vst [vmem:[%s5999_s23 + $0x190] sm:$0xff] %v328_v50   ;;  %v340_v53 = vld [vmem:[%s5994_s22 + $0x4a8] sm:$0xff]   ;;  %333 = vst [vmem:[%s5999_s23 + $0x198] sm:$0xff] %v332_v51   ;;  %v344_v54 = vld [vmem:[%s5994_s22 + $0x4b0] sm:$0xff]  }
  0x2c   : > { %337 = vst [vmem:[%s5999_s23 + $0x1a0] sm:$0xff] %v336_v52   ;;  %341 = vst [vmem:[%s5999_s23 + $0x1a8] sm:$0xff] %v340_v53   ;;  %v348_v55 = vld [vmem:[%s5994_s22 + $0x4b8] sm:$0xff]   ;;  %v352_v56 = vld [vmem:[%s5994_s22 + $0x4c0] sm:$0xff]  }
  0x2d   : > { %345 = vst [vmem:[%s5999_s23 + $0x1b0] sm:$0xff] %v344_v54   ;;  %349 = vst [vmem:[%s5999_s23 + $0x1b8] sm:$0xff] %v348_v55   ;;  %v356_v57 = vld [vmem:[%s5994_s22 + $0x4c8] sm:$0xff]   ;;  %v360_v58 = vld [vmem:[%s5994_s22 + $0x4d0] sm:$0xff]  }
  0x2e   : > { %353 = vst [vmem:[%s5999_s23 + $0x1c0] sm:$0xff] %v352_v56   ;;  %v364_v59 = vld [vmem:[%s5994_s22 + $0x4d8] sm:$0xff]   ;;  %357 = vst [vmem:[%s5999_s23 + $0x1c8] sm:$0xff] %v356_v57   ;;  %v368_v60 = vld [vmem:[%s5994_s22 + $0x4e0] sm:$0xff]  }
  0x2f   : > { %361 = vst [vmem:[%s5999_s23 + $0x1d0] sm:$0xff] %v360_v58   ;;  %365 = vst [vmem:[%s5999_s23 + $0x1d8] sm:$0xff] %v364_v59   ;;  %v372_v61 = vld [vmem:[%s5994_s22 + $0x4e8] sm:$0xff]   ;;  %v376_v62 = vld [vmem:[%s5994_s22 + $0x4f0] sm:$0xff]  }
  0x30   : > { %369 = vst [vmem:[%s5999_s23 + $0x1e0] sm:$0xff] %v368_v60   ;;  %373 = vst [vmem:[%s5999_s23 + $0x1e8] sm:$0xff] %v372_v61   ;;  %v380_v63 = vld [vmem:[%s5994_s22 + $0x4f8] sm:$0xff]   ;;  %v384_v0 = vld [vmem:[%s5994_s22 + $0x800] sm:$0xff]  }
  0x31   : > { %377 = vst [vmem:[%s5999_s23 + $0x1f0] sm:$0xff] %v376_v62   ;;  %v388_v1 = vld [vmem:[%s5994_s22 + $0x808] sm:$0xff]   ;;  %381 = vst [vmem:[%s5999_s23 + $0x1f8] sm:$0xff] %v380_v63   ;;  %v392_v2 = vld [vmem:[%s5994_s22 + $0x810] sm:$0xff]  }
  0x32   : > { %385 = vst [vmem:[%s5999_s23 + $0x200] sm:$0xff] %v384_v0   ;;  %389 = vst [vmem:[%s5999_s23 + $0x208] sm:$0xff] %v388_v1   ;;  %v396_v3 = vld [vmem:[%s5994_s22 + $0x818] sm:$0xff]   ;;  %v400_v4 = vld [vmem:[%s5994_s22 + $0x820] sm:$0xff]  }
  0x33   : > { %393 = vst [vmem:[%s5999_s23 + $0x210] sm:$0xff] %v392_v2   ;;  %397 = vst [vmem:[%s5999_s23 + $0x218] sm:$0xff] %v396_v3   ;;  %v404_v5 = vld [vmem:[%s5994_s22 + $0x828] sm:$0xff]   ;;  %v408_v6 = vld [vmem:[%s5994_s22 + $0x830] sm:$0xff]  }
  0x34   : > { %401 = vst [vmem:[%s5999_s23 + $0x220] sm:$0xff] %v400_v4   ;;  %v412_v7 = vld [vmem:[%s5994_s22 + $0x838] sm:$0xff]   ;;  %405 = vst [vmem:[%s5999_s23 + $0x228] sm:$0xff] %v404_v5   ;;  %v416_v8 = vld [vmem:[%s5994_s22 + $0x840] sm:$0xff]  }
  0x35   : > { %409 = vst [vmem:[%s5999_s23 + $0x230] sm:$0xff] %v408_v6   ;;  %413 = vst [vmem:[%s5999_s23 + $0x238] sm:$0xff] %v412_v7   ;;  %v420_v9 = vld [vmem:[%s5994_s22 + $0x848] sm:$0xff]   ;;  %v424_v10 = vld [vmem:[%s5994_s22 + $0x850] sm:$0xff]  }
  0x36   : > { %417 = vst [vmem:[%s5999_s23 + $0x240] sm:$0xff] %v416_v8   ;;  %421 = vst [vmem:[%s5999_s23 + $0x248] sm:$0xff] %v420_v9   ;;  %v428_v11 = vld [vmem:[%s5994_s22 + $0x858] sm:$0xff]   ;;  %v432_v12 = vld [vmem:[%s5994_s22 + $0x860] sm:$0xff]  }
  0x37   : > { %425 = vst [vmem:[%s5999_s23 + $0x250] sm:$0xff] %v424_v10   ;;  %v436_v13 = vld [vmem:[%s5994_s22 + $0x868] sm:$0xff]   ;;  %429 = vst [vmem:[%s5999_s23 + $0x258] sm:$0xff] %v428_v11   ;;  %v440_v14 = vld [vmem:[%s5994_s22 + $0x870] sm:$0xff]  }
  0x38   : > { %433 = vst [vmem:[%s5999_s23 + $0x260] sm:$0xff] %v432_v12   ;;  %437 = vst [vmem:[%s5999_s23 + $0x268] sm:$0xff] %v436_v13   ;;  %v444_v15 = vld [vmem:[%s5994_s22 + $0x878] sm:$0xff]   ;;  %v448_v16 = vld [vmem:[%s5994_s22 + $0x880] sm:$0xff]  }
  0x39   : > { %441 = vst [vmem:[%s5999_s23 + $0x270] sm:$0xff] %v440_v14   ;;  %445 = vst [vmem:[%s5999_s23 + $0x278] sm:$0xff] %v444_v15   ;;  %v452_v17 = vld [vmem:[%s5994_s22 + $0x888] sm:$0xff]   ;;  %v456_v18 = vld [vmem:[%s5994_s22 + $0x890] sm:$0xff]  }
  0x3a   : > { %449 = vst [vmem:[%s5999_s23 + $0x280] sm:$0xff] %v448_v16   ;;  %v460_v19 = vld [vmem:[%s5994_s22 + $0x898] sm:$0xff]   ;;  %453 = vst [vmem:[%s5999_s23 + $0x288] sm:$0xff] %v452_v17   ;;  %v464_v20 = vld [vmem:[%s5994_s22 + $0x8a0] sm:$0xff]  }
  0x3b   : > { %457 = vst [vmem:[%s5999_s23 + $0x290] sm:$0xff] %v456_v18   ;;  %461 = vst [vmem:[%s5999_s23 + $0x298] sm:$0xff] %v460_v19   ;;  %v468_v21 = vld [vmem:[%s5994_s22 + $0x8a8] sm:$0xff]   ;;  %v472_v22 = vld [vmem:[%s5994_s22 + $0x8b0] sm:$0xff]  }
  0x3c   : > { %465 = vst [vmem:[%s5999_s23 + $0x2a0] sm:$0xff] %v464_v20   ;;  %469 = vst [vmem:[%s5999_s23 + $0x2a8] sm:$0xff] %v468_v21   ;;  %v476_v23 = vld [vmem:[%s5994_s22 + $0x8b8] sm:$0xff]   ;;  %v480_v24 = vld [vmem:[%s5994_s22 + $0x8c0] sm:$0xff]  }
  0x3d   : > { %473 = vst [vmem:[%s5999_s23 + $0x2b0] sm:$0xff] %v472_v22   ;;  %v484_v25 = vld [vmem:[%s5994_s22 + $0x8c8] sm:$0xff]   ;;  %477 = vst [vmem:[%s5999_s23 + $0x2b8] sm:$0xff] %v476_v23   ;;  %v488_v26 = vld [vmem:[%s5994_s22 + $0x8d0] sm:$0xff]  }
  0x3e   : > { %481 = vst [vmem:[%s5999_s23 + $0x2c0] sm:$0xff] %v480_v24   ;;  %485 = vst [vmem:[%s5999_s23 + $0x2c8] sm:$0xff] %v484_v25   ;;  %v492_v27 = vld [vmem:[%s5994_s22 + $0x8d8] sm:$0xff]   ;;  %v496_v28 = vld [vmem:[%s5994_s22 + $0x8e0] sm:$0xff]  }
  0x3f   : > { %489 = vst [vmem:[%s5999_s23 + $0x2d0] sm:$0xff] %v488_v26   ;;  %493 = vst [vmem:[%s5999_s23 + $0x2d8] sm:$0xff] %v492_v27   ;;  %v500_v29 = vld [vmem:[%s5994_s22 + $0x8e8] sm:$0xff]   ;;  %v504_v30 = vld [vmem:[%s5994_s22 + $0x8f0] sm:$0xff]  }
  0x40   : > { %497 = vst [vmem:[%s5999_s23 + $0x2e0] sm:$0xff] %v496_v28   ;;  %v508_v31 = vld [vmem:[%s5994_s22 + $0x8f8] sm:$0xff]   ;;  %501 = vst [vmem:[%s5999_s23 + $0x2e8] sm:$0xff] %v500_v29   ;;  %v512_v32 = vld [vmem:[%s5994_s22 + $0xc00] sm:$0xff]  }
  0x41   : > { %505 = vst [vmem:[%s5999_s23 + $0x2f0] sm:$0xff] %v504_v30   ;;  %509 = vst [vmem:[%s5999_s23 + $0x2f8] sm:$0xff] %v508_v31   ;;  %v516_v33 = vld [vmem:[%s5994_s22 + $0xc08] sm:$0xff]   ;;  %v520_v34 = vld [vmem:[%s5994_s22 + $0xc10] sm:$0xff]  }
  0x42   : > { %513 = vst [vmem:[%s5999_s23 + $0x300] sm:$0xff] %v512_v32   ;;  %517 = vst [vmem:[%s5999_s23 + $0x308] sm:$0xff] %v516_v33   ;;  %v524_v35 = vld [vmem:[%s5994_s22 + $0xc18] sm:$0xff]   ;;  %v528_v36 = vld [vmem:[%s5994_s22 + $0xc20] sm:$0xff]  }
  0x43   : > { %521 = vst [vmem:[%s5999_s23 + $0x310] sm:$0xff] %v520_v34   ;;  %v532_v37 = vld [vmem:[%s5994_s22 + $0xc28] sm:$0xff]   ;;  %525 = vst [vmem:[%s5999_s23 + $0x318] sm:$0xff] %v524_v35   ;;  %v536_v38 = vld [vmem:[%s5994_s22 + $0xc30] sm:$0xff]  }
  0x44   : > { %529 = vst [vmem:[%s5999_s23 + $0x320] sm:$0xff] %v528_v36   ;;  %533 = vst [vmem:[%s5999_s23 + $0x328] sm:$0xff] %v532_v37   ;;  %v540_v39 = vld [vmem:[%s5994_s22 + $0xc38] sm:$0xff]   ;;  %v544_v40 = vld [vmem:[%s5994_s22 + $0xc40] sm:$0xff]  }
  0x45   : > { %537 = vst [vmem:[%s5999_s23 + $0x330] sm:$0xff] %v536_v38   ;;  %541 = vst [vmem:[%s5999_s23 + $0x338] sm:$0xff] %v540_v39   ;;  %v548_v41 = vld [vmem:[%s5994_s22 + $0xc48] sm:$0xff]   ;;  %v552_v42 = vld [vmem:[%s5994_s22 + $0xc50] sm:$0xff]  }
  0x46   : > { %545 = vst [vmem:[%s5999_s23 + $0x340] sm:$0xff] %v544_v40   ;;  %v556_v43 = vld [vmem:[%s5994_s22 + $0xc58] sm:$0xff]   ;;  %549 = vst [vmem:[%s5999_s23 + $0x348] sm:$0xff] %v548_v41   ;;  %v560_v44 = vld [vmem:[%s5994_s22 + $0xc60] sm:$0xff]  }
  0x47   : > { %553 = vst [vmem:[%s5999_s23 + $0x350] sm:$0xff] %v552_v42   ;;  %557 = vst [vmem:[%s5999_s23 + $0x358] sm:$0xff] %v556_v43   ;;  %v564_v45 = vld [vmem:[%s5994_s22 + $0xc68] sm:$0xff]   ;;  %v568_v46 = vld [vmem:[%s5994_s22 + $0xc70] sm:$0xff]  }
  0x48   : > { %561 = vst [vmem:[%s5999_s23 + $0x360] sm:$0xff] %v560_v44   ;;  %565 = vst [vmem:[%s5999_s23 + $0x368] sm:$0xff] %v564_v45   ;;  %v572_v47 = vld [vmem:[%s5994_s22 + $0xc78] sm:$0xff]   ;;  %v576_v48 = vld [vmem:[%s5994_s22 + $0xc80] sm:$0xff]  }
  0x49   : > { %569 = vst [vmem:[%s5999_s23 + $0x370] sm:$0xff] %v568_v46   ;;  %v580_v49 = vld [vmem:[%s5994_s22 + $0xc88] sm:$0xff]   ;;  %573 = vst [vmem:[%s5999_s23 + $0x378] sm:$0xff] %v572_v47   ;;  %v584_v50 = vld [vmem:[%s5994_s22 + $0xc90] sm:$0xff]  }
  0x4a   : > { %577 = vst [vmem:[%s5999_s23 + $0x380] sm:$0xff] %v576_v48   ;;  %581 = vst [vmem:[%s5999_s23 + $0x388] sm:$0xff] %v580_v49   ;;  %v588_v51 = vld [vmem:[%s5994_s22 + $0xc98] sm:$0xff]   ;;  %v592_v52 = vld [vmem:[%s5994_s22 + $0xca0] sm:$0xff]  }
  0x4b   : > { %585 = vst [vmem:[%s5999_s23 + $0x390] sm:$0xff] %v584_v50   ;;  %589 = vst [vmem:[%s5999_s23 + $0x398] sm:$0xff] %v588_v51   ;;  %v596_v53 = vld [vmem:[%s5994_s22 + $0xca8] sm:$0xff]   ;;  %v600_v54 = vld [vmem:[%s5994_s22 + $0xcb0] sm:$0xff]  }
  0x4c   : > { %593 = vst [vmem:[%s5999_s23 + $0x3a0] sm:$0xff] %v592_v52   ;;  %v604_v55 = vld [vmem:[%s5994_s22 + $0xcb8] sm:$0xff]   ;;  %597 = vst [vmem:[%s5999_s23 + $0x3a8] sm:$0xff] %v596_v53   ;;  %v608_v56 = vld [vmem:[%s5994_s22 + $0xcc0] sm:$0xff]  }
  0x4d   : > { %601 = vst [vmem:[%s5999_s23 + $0x3b0] sm:$0xff] %v600_v54   ;;  %605 = vst [vmem:[%s5999_s23 + $0x3b8] sm:$0xff] %v604_v55   ;;  %v612_v57 = vld [vmem:[%s5994_s22 + $0xcc8] sm:$0xff]   ;;  %v616_v58 = vld [vmem:[%s5994_s22 + $0xcd0] sm:$0xff]  }
  0x4e   : > { %609 = vst [vmem:[%s5999_s23 + $0x3c0] sm:$0xff] %v608_v56   ;;  %613 = vst [vmem:[%s5999_s23 + $0x3c8] sm:$0xff] %v612_v57   ;;  %v620_v59 = vld [vmem:[%s5994_s22 + $0xcd8] sm:$0xff]   ;;  %v624_v60 = vld [vmem:[%s5994_s22 + $0xce0] sm:$0xff]  }
  0x4f   : > { %617 = vst [vmem:[%s5999_s23 + $0x3d0] sm:$0xff] %v616_v58   ;;  %v628_v61 = vld [vmem:[%s5994_s22 + $0xce8] sm:$0xff]   ;;  %621 = vst [vmem:[%s5999_s23 + $0x3d8] sm:$0xff] %v620_v59   ;;  %v632_v62 = vld [vmem:[%s5994_s22 + $0xcf0] sm:$0xff]  }
  0x50   : > { %625 = vst [vmem:[%s5999_s23 + $0x3e0] sm:$0xff] %v624_v60   ;;  %629 = vst [vmem:[%s5999_s23 + $0x3e8] sm:$0xff] %v628_v61   ;;  %v636_v63 = vld [vmem:[%s5994_s22 + $0xcf8] sm:$0xff]  }
  0x51   : > { %633 = vst [vmem:[%s5999_s23 + $0x3f0] sm:$0xff] %v632_v62   ;;  %637 = vst [vmem:[%s5999_s23 + $0x3f8] sm:$0xff] %v636_v63  }
  0x52 PF: > { %p4393_p5 = scmp.ge.s32.totalorder %s5943_s11, 1  ;;  %p1173_p6 = scmp.lt.s32.totalorder %s5943_s11, 5 }
  0x54   : > { %p1174_p7 = pnand %p4393_p5, %p1173_p6 }
  0x55   : > { %v5789_v0 = vld [vmem:[%s6577_s1 + $0x8] sm:$0xff] (!%p1174_p7)   ;;  %s1180_s26 = sand.u32 (!%p1174_p7), 1, %s5935_s9   ;;  %v5790_v1 = vld [vmem:[%s6577_s1 + $0x10] sm:$0xff] (!%p1174_p7)   ;;  %vm1509_vm0 = vcmask (!%p1174_p7), 130048   ;;  %v5794_v5 = vld [vmem:[%s6577_s1] sm:$0xff] (!%p1174_p7)   ;;  %s4395_s7 = sshll.u32 (!%p1174_p7), %s4386_s12, 6 }
  0x56   : > { %1177 = sbr.rel (%p1174_p7) target bundleno = 562 (0x232), region = 65  ;;  %s4394_s29 = sshll.u32 (!%p1174_p7), %s1180_s26, 10  ;;  %5309 = vmatprep.subr.bf16.mxu1 (!%p1174_p7), %v5789_v0  ;;  %5441 = vmatprep.subr.bf16.mxu0 (!%p1174_p7), %v5790_v1  ;;  %v5796_v7 = vld [vmem:[%s6577_s1 + $0x18] sm:$0xff] (!%p1174_p7)  }
  0x57   : > { %5310 = vmatpush3.bf16.msra.mxu1 (!%p1174_p7), %v5789_v0  ;;  %s6263_s30 = scalar_lea.vmem (!%p1174_p7), [#allocation2], %s4394_s29  ;;  %5442 = vmatpush3.bf16.msra.mxu0 (!%p1174_p7), %v5790_v1  ;;  %p1203_p8 = scmp.lt.s32.totalorder (!%p1174_p7), %s4395_s7, 255 }
  0x58   : > { %v5791_v2 = vld [vmem:[%s6263_s30 + $0x100] sm:$0xff] (!%p1174_p7)   ;;  %v5793_v4 = vld [vmem:[%s6263_s30 + $0x108] sm:$0xff] (!%p1174_p7)   ;;  %5375 = vmatprep.subr.bf16.mxu1 (!%p1174_p7), %v5794_v5  ;;  %v5797_v8 = vld [vmem:[%s6263_s30 + $0x110] sm:$0xff] (!%p1174_p7)   ;;  %5507 = vmatprep.subr.bf16.mxu0 (!%p1174_p7), %v5796_v7 }
  0x59   : > { %v5792_v3 = vld [vmem:[%s6263_s30 + $0x200] sm:$0xff] (!%p1174_p7)   ;;  %5311 = vmatprep.mubr.msk.bf16.mxu1 (!%p1174_p7), %vm1509_vm0, %v5791_v2  ;;  %v5795_v6 = vld [vmem:[%s6263_s30 + $0x208] sm:$0xff] (!%p1174_p7)   ;;  %v5798_v9 = vld [vmem:[%s6263_s30 + $0x210] sm:$0xff] (!%p1174_p7)  }
  0x5a   : > { %5443 = vmatprep.mubr.msk.bf16.mxu0 (!%p1174_p7), %vm1509_vm0, %v5792_v3  ;;  %5312 = vmatmul.mubr.msk.bf16.vlgmr.msra.gmra.mrb[0].mxu1 (!%p1174_p7), %vm1509_vm0, %v5793_v4  ;;  %v5799_v10 = vld [vmem:[%s6263_s30 + $0x118] sm:$0xff] (!%p1174_p7)   ;;  %v5801_v12 = vld [vmem:[%s6263_s30 + $0x120] sm:$0xff] (!%p1174_p7)   ;;  %v5803_v14 = vld [vmem:[%s6263_s30 + $0x128] sm:$0xff] (!%p1174_p7)  }
  0x5b   : > { %5444 = vmatmul.mubr.msk.bf16.vlgmr.msra.gmra.mrb[0].mxu0 (!%p1174_p7), %vm1509_vm0, %v5795_v6  ;;  %5376 = vmatpush3.bf16.msra.mxu1 (!%p1174_p7), %v5794_v5  ;;  %v5800_v11 = vld [vmem:[%s6263_s30 + $0x218] sm:$0xff] (!%p1174_p7)   ;;  %v5802_v13 = vld [vmem:[%s6263_s30 + $0x220] sm:$0xff] (!%p1174_p7)   ;;  %v5805_v15 = vld [vmem:[%s6263_s30 + $0x130] sm:$0xff] (!%p1174_p7)  }
  0x5c   : > { %5508 = vmatpush3.bf16.msra.mxu0 (!%p1174_p7), %v5796_v7  ;;  %5315 = vmatprep.mubr.msk.bf16.mxu1 (!%p1174_p7), %vm1509_vm0, %v5797_v8  ;;  %v5804_v16 = vld [vmem:[%s6263_s30 + $0x228] sm:$0xff] (!%p1174_p7)   ;;  %v5806_v17 = vld [vmem:[%s6263_s30 + $0x230] sm:$0xff] (!%p1174_p7)   ;;  %v5807_v18 = vld [vmem:[%s6263_s30 + $0x138] sm:$0xff] (!%p1174_p7)  }
  0x5d   : > { %5447 = vmatprep.mubr.msk.bf16.mxu0 %vm1509_vm0, %v5798_v9  ;;  %v5809_v19 = vld [vmem:[%s6263_s30 + $0x140] sm:$0xff]   ;;  %v5808_v20 = vld [vmem:[%s6263_s30 + $0x238] sm:$0xff]   ;;  %v5811_v22 = vld [vmem:[%s6263_s30 + $0x148] sm:$0xff]   ;;  %s6583_s7 = smov (!%p1203_p8, %s4395_s7), 255 }
  0x5e   : > { %v5810_v21 = vld [vmem:[%s6263_s30 + $0x240] sm:$0xff]   ;;  %v5813_v23 = vld [vmem:[%s6263_s30 + $0x150] sm:$0xff]   ;;  %v5812_v24 = vld [vmem:[%s6263_s30 + $0x248] sm:$0xff]   ;;  %s4396_s8 = sshll.u32 %s6583_s7, 2 }
  0x5f   : > { %v5814_v25 = vld [vmem:[%s6263_s30 + $0x250] sm:$0xff]   ;;  %v5815_v26 = vld [vmem:[%s6263_s30 + $0x158] sm:$0xff]   ;;  %v5817_v27 = vld [vmem:[%s6263_s30 + $0x160] sm:$0xff]   ;;  %s6532_s12 = scalar_lea.vmem %s6578_s2, %s4396_s8 }
  0x60   : > { %v5816_v28 = vld [vmem:[%s6263_s30 + $0x258] sm:$0xff]   ;;  %v5818_v29 = vld [vmem:[%s6263_s30 + $0x260] sm:$0xff]   ;;  %v5819_v30 = vld [vmem:[%s6263_s30 + $0x168] sm:$0xff]  }
  0x61   : > { %v5821_v31 = vld [vmem:[%s6263_s30 + $0x170] sm:$0xff]   ;;  %v5820_v32 = vld [vmem:[%s6263_s30 + $0x268] sm:$0xff]   ;;  %v5823_v34 = vld [vmem:[%s6263_s30 + $0x178] sm:$0xff]  }
  0x62   : > { %5316 = vmatmul.mubr.msk.bf16.gmra.mrb[4].mxu1 %vm1509_vm0, %v5799_v10  ;;  %v5822_v33 = vld [vmem:[%s6263_s30 + $0x270] sm:$0xff]   ;;  %v5825_v35 = vld [vmem:[%s6263_s30 + $0x180] sm:$0xff]   ;;  %v5824_v36 = vld [vmem:[%s6263_s30 + $0x278] sm:$0xff]  }
  0x63   : > { %5319 = vmatprep.mubr.msk.bf16.mxu1 %vm1509_vm0, %v5801_v12  ;;  %5448 = vmatmul.mubr.msk.bf16.gmra.mrb[4].mxu0 %vm1509_vm0, %v5800_v11  ;;  %v5826_v37 = vld [vmem:[%s6263_s30 + $0x280] sm:$0xff]   ;;  %v5827_v38 = vld [vmem:[%s6263_s30 + $0x188] sm:$0xff]   ;;  %v5829_v39 = vld [vmem:[%s6263_s30 + $0x190] sm:$0xff]  }
  0x64   : > { %5451 = vmatprep.mubr.msk.bf16.mxu0 %vm1509_vm0, %v5802_v13  ;;  %v5828_v40 = vld [vmem:[%s6263_s30 + $0x288] sm:$0xff]   ;;  %v5830_v41 = vld [vmem:[%s6263_s30 + $0x290] sm:$0xff]   ;;  %v5831_v42 = vld [vmem:[%s6263_s30 + $0x198] sm:$0xff]  }
  0x65   : > { %v5833_v43 = vld [vmem:[%s6263_s30 + $0x1a0] sm:$0xff]   ;;  %v5832_v44 = vld [vmem:[%s6263_s30 + $0x298] sm:$0xff]   ;;  %v5835_v46 = vld [vmem:[%s6263_s30 + $0x1a8] sm:$0xff]  }
  0x66   : > { %v5834_v45 = vld [vmem:[%s6263_s30 + $0x2a0] sm:$0xff]   ;;  %v5837_v47 = vld [vmem:[%s6263_s30 + $0x1b0] sm:$0xff]   ;;  %v5836_v48 = vld [vmem:[%s6263_s30 + $0x2a8] sm:$0xff]  }
  0x67   : > { %v5838_v49 = vld [vmem:[%s6263_s30 + $0x2b0] sm:$0xff]   ;;  %v5839_v50 = vld [vmem:[%s6263_s30 + $0x1b8] sm:$0xff]   ;;  %v5841_v51 = vld [vmem:[%s6263_s30 + $0x1c0] sm:$0xff]  }
  0x68   : > { %v5840_v52 = vld [vmem:[%s6263_s30 + $0x2b8] sm:$0xff]   ;;  %v5842_v53 = vld [vmem:[%s6263_s30 + $0x2c0] sm:$0xff]   ;;  %v5843_v54 = vld [vmem:[%s6263_s30 + $0x1c8] sm:$0xff]  }
  0x69   : > { %v5845_v55 = vld [vmem:[%s6263_s30 + $0x1d0] sm:$0xff]   ;;  %v5844_v56 = vld [vmem:[%s6263_s30 + $0x2c8] sm:$0xff]   ;;  %v5847_v58 = vld [vmem:[%s6263_s30 + $0x1d8] sm:$0xff]  }
  0x6a   : > { %5320 = vmatmul.mubr.msk.bf16.gmra.mrb[8].mxu1 %vm1509_vm0, %v5803_v14  ;;  %v5846_v57 = vld [vmem:[%s6263_s30 + $0x2d0] sm:$0xff]   ;;  %v5849_v59 = vld [vmem:[%s6263_s30 + $0x1e0] sm:$0xff]   ;;  %v5848_v60 = vld [vmem:[%s6263_s30 + $0x2d8] sm:$0xff]  }
  0x6b   : > { %5323 = vmatprep.mubr.msk.bf16.mxu1 %vm1509_vm0, %v5805_v15  ;;  %5452 = vmatmul.mubr.msk.bf16.gmra.mrb[8].mxu0 %vm1509_vm0, %v5804_v16  ;;  %v5850_v61 = vld [vmem:[%s6263_s30 + $0x2e0] sm:$0xff]   ;;  %v5851_v62 = vld [vmem:[%s6263_s30 + $0x1e8] sm:$0xff]   ;;  %v5853_v63 = vld [vmem:[%s6263_s30 + $0x1f0] sm:$0xff]  }
  0x6c   : > { %5455 = vmatprep.mubr.msk.bf16.mxu0 %vm1509_vm0, %v5806_v17  ;;  %v5852_v0 = vld [vmem:[%s6263_s30 + $0x2e8] sm:$0xff]   ;;  %v5854_v1 = vld [vmem:[%s6263_s30 + $0x2f0] sm:$0xff]   ;;  %v5855_v2 = vld [vmem:[%s6263_s30 + $0x1f8] sm:$0xff]  }
  0x6d   : > { %v5857_v3 = vld [vmem:[%s6263_s30] sm:$0xff]   ;;  %v5856_v4 = vld [vmem:[%s6263_s30 + $0x2f8] sm:$0xff]   ;;  %v5859_v6 = vld [vmem:[%s6263_s30 + $0x8] sm:$0xff]  }
  0x6e   : > { %v5858_v5 = vld [vmem:[%s6263_s30 + $0x300] sm:$0xff]   ;;  %v5861_v7 = vld [vmem:[%s6263_s30 + $0x10] sm:$0xff]   ;;  %v5860_v8 = vld [vmem:[%s6263_s30 + $0x308] sm:$0xff]  }
  0x6f   : > { %v5862_v9 = vld [vmem:[%s6263_s30 + $0x310] sm:$0xff]   ;;  %v5863_v10 = vld [vmem:[%s6263_s30 + $0x18] sm:$0xff]   ;;  %v5865_v11 = vld [vmem:[%s6263_s30 + $0x20] sm:$0xff]  }
  0x70   : > { %v5864_v12 = vld [vmem:[%s6263_s30 + $0x318] sm:$0xff]   ;;  %v5866_v13 = vld [vmem:[%s6263_s30 + $0x320] sm:$0xff]   ;;  %v5867_v14 = vld [vmem:[%s6263_s30 + $0x28] sm:$0xff]  }
  0x71   : > { %v5869_v15 = vld [vmem:[%s6263_s30 + $0x30] sm:$0xff]   ;;  %v5868_v16 = vld [vmem:[%s6263_s30 + $0x328] sm:$0xff]  }
  0x72   : > { %5324 = vmatmul.mubr.msk.bf16.gmra.mrb[12].mxu1 %vm1509_vm0, %v5807_v18  ;;  %v5870_v17 = vld [vmem:[%s6263_s30 + $0x330] sm:$0xff]   ;;  %v5871_v18 = vld [vmem:[%s6263_s30 + $0x38] sm:$0xff]  }
  0x73   : > { %5327 = vmatprep.mubr.msk.bf16.mxu1 %vm1509_vm0, %v5809_v19  ;;  %5456 = vmatmul.mubr.msk.bf16.gmra.mrb[12].mxu0 %vm1509_vm0, %v5808_v20  ;;  %v5873_v19 = vld [vmem:[%s6263_s30 + $0x40] sm:$0xff]   ;;  %v5872_v20 = vld [vmem:[%s6263_s30 + $0x338] sm:$0xff]  }
  0x74   : > { %5459 = vmatprep.mubr.msk.bf16.mxu0 %vm1509_vm0, %v5810_v21  ;;  %v5874_v21 = vld [vmem:[%s6263_s30 + $0x340] sm:$0xff]  }
  0x7a   : > { %5328 = vmatmul.mubr.msk.bf16.gmra.mrb[16].mxu1 %vm1509_vm0, %v5811_v22  ;;  %v5875_v22 = vld [vmem:[%s6263_s30 + $0x48] sm:$0xff]  }
  0x7b   : > { %5331 = vmatprep.mubr.msk.bf16.mxu1 %vm1509_vm0, %v5813_v23  ;;  %5460 = vmatmul.mubr.msk.bf16.gmra.mrb[16].mxu0 %vm1509_vm0, %v5812_v24  ;;  %v5877_v23 = vld [vmem:[%s6263_s30 + $0x50] sm:$0xff]   ;;  %v5876_v24 = vld [vmem:[%s6263_s30 + $0x348] sm:$0xff]  }
  0x7c   : > { %5463 = vmatprep.mubr.msk.bf16.mxu0 %vm1509_vm0, %v5814_v25  ;;  %v5878_v25 = vld [vmem:[%s6263_s30 + $0x350] sm:$0xff]  }
  0x82   : > { %5332 = vmatmul.mubr.msk.bf16.gmra.mrb[20].mxu1 %vm1509_vm0, %v5815_v26  ;;  %v5879_v26 = vld [vmem:[%s6263_s30 + $0x58] sm:$0xff]  }
  0x83   : > { %5335 = vmatprep.mubr.msk.bf16.mxu1 %vm1509_vm0, %v5817_v27  ;;  %5464 = vmatmul.mubr.msk.bf16.gmra.mrb[20].mxu0 %vm1509_vm0, %v5816_v28  ;;  %v5881_v27 = vld [vmem:[%s6263_s30 + $0x60] sm:$0xff]   ;;  %v5880_v28 = vld [vmem:[%s6263_s30 + $0x358] sm:$0xff]  }
  0x84   : > { %5467 = vmatprep.mubr.msk.bf16.mxu0 %vm1509_vm0, %v5818_v29  ;;  %v5882_v29 = vld [vmem:[%s6263_s30 + $0x360] sm:$0xff]  }
  0x8a   : > { %5336 = vmatmul.mubr.msk.bf16.gmra.mrb[24].mxu1 %vm1509_vm0, %v5819_v30  ;;  %v5883_v30 = vld [vmem:[%s6263_s30 + $0x68] sm:$0xff]  }
  0x8b   : > { %5339 = vmatprep.mubr.msk.bf16.mxu1 %vm1509_vm0, %v5821_v31  ;;  %5468 = vmatmul.mubr.msk.bf16.gmra.mrb[24].mxu0 %vm1509_vm0, %v5820_v32  ;;  %v5885_v31 = vld [vmem:[%s6263_s30 + $0x70] sm:$0xff]   ;;  %v5884_v32 = vld [vmem:[%s6263_s30 + $0x368] sm:$0xff]  }
  0x8c   : > { %5471 = vmatprep.mubr.msk.bf16.mxu0 %vm1509_vm0, %v5822_v33  ;;  %v5886_v33 = vld [vmem:[%s6263_s30 + $0x370] sm:$0xff]  }
  0x92   : > { %5340 = vmatmul.mubr.msk.bf16.gmra.mrb[28].mxu1 %vm1509_vm0, %v5823_v34  ;;  %v5887_v34 = vld [vmem:[%s6263_s30 + $0x78] sm:$0xff]  }
  0x93   : > { %5343 = vmatprep.mubr.msk.bf16.mxu1 %vm1509_vm0, %v5825_v35  ;;  %5472 = vmatmul.mubr.msk.bf16.gmra.mrb[28].mxu0 %vm1509_vm0, %v5824_v36  ;;  %v5889_v35 = vld [vmem:[%s6263_s30 + $0x80] sm:$0xff]   ;;  %v5888_v36 = vld [vmem:[%s6263_s30 + $0x378] sm:$0xff]  }
  0x94   : > { %5475 = vmatprep.mubr.msk.bf16.mxu0 %vm1509_vm0, %v5826_v37  ;;  %v5890_v37 = vld [vmem:[%s6263_s30 + $0x380] sm:$0xff]  }
  0x9a   : > { %5344 = vmatmul.mubr.msk.bf16.gmra.mrb[32].mxu1 %vm1509_vm0, %v5827_v38  ;;  %v5891_v38 = vld [vmem:[%s6263_s30 + $0x88] sm:$0xff]  }
  0x9b   : > { %5347 = vmatprep.mubr.msk.bf16.mxu1 %vm1509_vm0, %v5829_v39  ;;  %5476 = vmatmul.mubr.msk.bf16.gmra.mrb[32].mxu0 %vm1509_vm0, %v5828_v40  ;;  %v5893_v39 = vld [vmem:[%s6263_s30 + $0x90] sm:$0xff]   ;;  %v5892_v40 = vld [vmem:[%s6263_s30 + $0x388] sm:$0xff]  }
  0x9c   : > { %5479 = vmatprep.mubr.msk.bf16.mxu0 %vm1509_vm0, %v5830_v41  ;;  %v5894_v41 = vld [vmem:[%s6263_s30 + $0x390] sm:$0xff]  }
  0xa2   : > { %5348 = vmatmul.mubr.msk.bf16.gmra.mrb[36].mxu1 %vm1509_vm0, %v5831_v42  ;;  %v5895_v42 = vld [vmem:[%s6263_s30 + $0x98] sm:$0xff]  }
  0xa3   : > { %5351 = vmatprep.mubr.msk.bf16.mxu1 %vm1509_vm0, %v5833_v43  ;;  %5480 = vmatmul.mubr.msk.bf16.gmra.mrb[36].mxu0 %vm1509_vm0, %v5832_v44  ;;  %v5897_v43 = vld [vmem:[%s6263_s30 + $0xa0] sm:$0xff]   ;;  %v5896_v44 = vld [vmem:[%s6263_s30 + $0x398] sm:$0xff]  }
  0xa4   : > { %5483 = vmatprep.mubr.msk.bf16.mxu0 %vm1509_vm0, %v5834_v45  ;;  %v5898_v45 = vld [vmem:[%s6263_s30 + $0x3a0] sm:$0xff]  }
  0xaa   : > { %5352 = vmatmul.mubr.msk.bf16.gmra.mrb[40].mxu1 %vm1509_vm0, %v5835_v46  ;;  %v5899_v46 = vld [vmem:[%s6263_s30 + $0xa8] sm:$0xff]  }
  0xab   : > { %5355 = vmatprep.mubr.msk.bf16.mxu1 %vm1509_vm0, %v5837_v47  ;;  %5484 = vmatmul.mubr.msk.bf16.gmra.mrb[40].mxu0 %vm1509_vm0, %v5836_v48  ;;  %v5901_v47 = vld [vmem:[%s6263_s30 + $0xb0] sm:$0xff]   ;;  %v5900_v48 = vld [vmem:[%s6263_s30 + $0x3a8] sm:$0xff]  }
  0xac   : > { %5487 = vmatprep.mubr.msk.bf16.mxu0 %vm1509_vm0, %v5838_v49  ;;  %v5902_v49 = vld [vmem:[%s6263_s30 + $0x3b0] sm:$0xff]  }
  0xb2   : > { %5356 = vmatmul.mubr.msk.bf16.gmra.mrb[44].mxu1 %vm1509_vm0, %v5839_v50  ;;  %v5903_v50 = vld [vmem:[%s6263_s30 + $0xb8] sm:$0xff]  }
  0xb3   : > { %5359 = vmatprep.mubr.msk.bf16.mxu1 %vm1509_vm0, %v5841_v51  ;;  %5488 = vmatmul.mubr.msk.bf16.gmra.mrb[44].mxu0 %vm1509_vm0, %v5840_v52  ;;  %v5905_v51 = vld [vmem:[%s6263_s30 + $0xc0] sm:$0xff]   ;;  %v5904_v52 = vld [vmem:[%s6263_s30 + $0x3b8] sm:$0xff]  }
  0xb4   : > { %5491 = vmatprep.mubr.msk.bf16.mxu0 %vm1509_vm0, %v5842_v53  ;;  %v5906_v53 = vld [vmem:[%s6263_s30 + $0x3c0] sm:$0xff]  }
  0xba   : > { %5360 = vmatmul.mubr.msk.bf16.gmra.mrb[48].mxu1 %vm1509_vm0, %v5843_v54  ;;  %v5907_v54 = vld [vmem:[%s6263_s30 + $0xc8] sm:$0xff]  }
  0xbb   : > { %5363 = vmatprep.mubr.msk.bf16.mxu1 %vm1509_vm0, %v5845_v55  ;;  %5492 = vmatmul.mubr.msk.bf16.gmra.mrb[48].mxu0 %vm1509_vm0, %v5844_v56  ;;  %v5909_v55 = vld [vmem:[%s6263_s30 + $0xd0] sm:$0xff]   ;;  %v5908_v56 = vld [vmem:[%s6263_s30 + $0x3c8] sm:$0xff]  }
  0xbc   : > { %5495 = vmatprep.mubr.msk.bf16.mxu0 %vm1509_vm0, %v5846_v57  ;;  %v5910_v57 = vld [vmem:[%s6263_s30 + $0x3d0] sm:$0xff]  }
  0xc2   : > { %5364 = vmatmul.mubr.msk.bf16.gmra.mrb[52].mxu1 %vm1509_vm0, %v5847_v58  ;;  %v5911_v58 = vld [vmem:[%s6263_s30 + $0xd8] sm:$0xff]  }
  0xc3   : > { %5367 = vmatprep.mubr.msk.bf16.mxu1 %vm1509_vm0, %v5849_v59  ;;  %5496 = vmatmul.mubr.msk.bf16.gmra.mrb[52].mxu0 %vm1509_vm0, %v5848_v60  ;;  %v5913_v59 = vld [vmem:[%s6263_s30 + $0xe0] sm:$0xff]   ;;  %v5912_v60 = vld [vmem:[%s6263_s30 + $0x3d8] sm:$0xff]  }
  0xc4   : > { %5499 = vmatprep.mubr.msk.bf16.mxu0 %vm1509_vm0, %v5850_v61  ;;  %v5914_v61 = vld [vmem:[%s6263_s30 + $0x3e0] sm:$0xff]  }
  0xca   : > { %5368 = vmatmul.mubr.msk.bf16.gmra.mrb[56].mxu1 %vm1509_vm0, %v5851_v62  ;;  %v5915_v62 = vld [vmem:[%s6263_s30 + $0xe8] sm:$0xff]  }
  0xcb   : > { %5371 = vmatprep.mubr.msk.bf16.mxu1 %vm1509_vm0, %v5853_v63  ;;  %5500 = vmatmul.mubr.msk.bf16.gmra.mrb[56].mxu0 %vm1509_vm0, %v5852_v0  ;;  %v5917_v63 = vld [vmem:[%s6263_s30 + $0xf0] sm:$0xff]   ;;  %v5916_v0 = vld [vmem:[%s6263_s30 + $0x3e8] sm:$0xff]  }
  0xcc   : > { %5503 = vmatprep.mubr.msk.bf16.mxu0 %vm1509_vm0, %v5854_v1  ;;  %v5918_v1 = vld [vmem:[%s6263_s30 + $0x3f0] sm:$0xff]  }
  0xd2   : > { %5372 = vmatmul.mubr.msk.bf16.gmra.mrb[60].mxu1 %vm1509_vm0, %v5855_v2  ;;  %v5919_v2 = vld [vmem:[%s6263_s30 + $0xf8] sm:$0xff]  }
  0xd3   : > { %5377 = vmatprep.mubr.msk.bf16.mxu1 %vm1509_vm0, %v5857_v3  ;;  %5504 = vmatmul.mubr.msk.bf16.gmra.mrb[60].mxu0 %vm1509_vm0, %v5856_v4  ;;  %v5920_v3 = vld [vmem:[%s6263_s30 + $0x3f8] sm:$0xff]  }
  0xd4   : > { %5509 = vmatprep.mubr.msk.bf16.mxu0 %vm1509_vm0, %v5858_v5 }
  0xda   : > { %5378 = vmatmul.mubr.msk.bf16.vlgmr.msra.gmra.mrb[0].mxu1 %vm1509_vm0, %v5859_v6 }
  0xdb   : > { %5381 = vmatprep.mubr.msk.bf16.mxu1 %vm1509_vm0, %v5861_v7  ;;  %5510 = vmatmul.mubr.msk.bf16.vlgmr.msra.gmra.mrb[0].mxu0 %vm1509_vm0, %v5860_v8 }
  0xdc   : > { %5513 = vmatprep.mubr.msk.bf16.mxu0 %vm1509_vm0, %v5862_v9 }
  0xe2   : > { %5382 = vmatmul.mubr.msk.bf16.gmra.mrb[4].mxu1 %vm1509_vm0, %v5863_v10 }
  0xe3   : > { %5385 = vmatprep.mubr.msk.bf16.mxu1 %vm1509_vm0, %v5865_v11  ;;  %5514 = vmatmul.mubr.msk.bf16.gmra.mrb[4].mxu0 %vm1509_vm0, %v5864_v12 }
  0xe4   : > { %5517 = vmatprep.mubr.msk.bf16.mxu0 %vm1509_vm0, %v5866_v13 }
  0xea   : > { %5386 = vmatmul.mubr.msk.bf16.gmra.mrb[8].mxu1 %vm1509_vm0, %v5867_v14 }
  0xeb   : > { %5389 = vmatprep.mubr.msk.bf16.mxu1 %vm1509_vm0, %v5869_v15  ;;  %5518 = vmatmul.mubr.msk.bf16.gmra.mrb[8].mxu0 %vm1509_vm0, %v5868_v16 }
  0xec   : > { %5521 = vmatprep.mubr.msk.bf16.mxu0 %vm1509_vm0, %v5870_v17 }
  0xf2   : > { %5390 = vmatmul.mubr.msk.bf16.gmra.mrb[12].mxu1 %vm1509_vm0, %v5871_v18 }
  0xf3   : > { %5393 = vmatprep.mubr.msk.bf16.mxu1 %vm1509_vm0, %v5873_v19  ;;  %5522 = vmatmul.mubr.msk.bf16.gmra.mrb[12].mxu0 %vm1509_vm0, %v5872_v20 }
  0xf4   : > { %5525 = vmatprep.mubr.msk.bf16.mxu0 %vm1509_vm0, %v5874_v21 }
  0xfa   : > { %5394 = vmatmul.mubr.msk.bf16.gmra.mrb[16].mxu1 %vm1509_vm0, %v5875_v22 }
  0xfb   : > { %5397 = vmatprep.mubr.msk.bf16.mxu1 %vm1509_vm0, %v5877_v23  ;;  %5526 = vmatmul.mubr.msk.bf16.gmra.mrb[16].mxu0 %vm1509_vm0, %v5876_v24 }
  0xfc   : > { %5529 = vmatprep.mubr.msk.bf16.mxu0 %vm1509_vm0, %v5878_v25 }
 0x102   : > { %5398 = vmatmul.mubr.msk.bf16.gmra.mrb[20].mxu1 %vm1509_vm0, %v5879_v26 }
 0x103   : > { %5401 = vmatprep.mubr.msk.bf16.mxu1 %vm1509_vm0, %v5881_v27  ;;  %5530 = vmatmul.mubr.msk.bf16.gmra.mrb[20].mxu0 %vm1509_vm0, %v5880_v28 }
 0x104   : > { %5533 = vmatprep.mubr.msk.bf16.mxu0 %vm1509_vm0, %v5882_v29 }
 0x10a   : > { %5402 = vmatmul.mubr.msk.bf16.gmra.mrb[24].mxu1 %vm1509_vm0, %v5883_v30 }
 0x10b   : > { %5405 = vmatprep.mubr.msk.bf16.mxu1 %vm1509_vm0, %v5885_v31  ;;  %5534 = vmatmul.mubr.msk.bf16.gmra.mrb[24].mxu0 %vm1509_vm0, %v5884_v32 }
 0x10c   : > { %5537 = vmatprep.mubr.msk.bf16.mxu0 %vm1509_vm0, %v5886_v33 }
 0x112   : > { %5406 = vmatmul.mubr.msk.bf16.gmra.mrb[28].mxu1 %vm1509_vm0, %v5887_v34 }
 0x113   : > { %5409 = vmatprep.mubr.msk.bf16.mxu1 %vm1509_vm0, %v5889_v35  ;;  %5538 = vmatmul.mubr.msk.bf16.gmra.mrb[28].mxu0 %vm1509_vm0, %v5888_v36 }
 0x114   : > { %5541 = vmatprep.mubr.msk.bf16.mxu0 %vm1509_vm0, %v5890_v37 }
 0x11a   : > { %5410 = vmatmul.mubr.msk.bf16.gmra.mrb[32].mxu1 %vm1509_vm0, %v5891_v38 }
 0x11b   : > { %5413 = vmatprep.mubr.msk.bf16.mxu1 %vm1509_vm0, %v5893_v39  ;;  %5542 = vmatmul.mubr.msk.bf16.gmra.mrb[32].mxu0 %vm1509_vm0, %v5892_v40 }
 0x11c   : > { %5545 = vmatprep.mubr.msk.bf16.mxu0 %vm1509_vm0, %v5894_v41 }
 0x122   : > { %5414 = vmatmul.mubr.msk.bf16.gmra.mrb[36].mxu1 %vm1509_vm0, %v5895_v42 }
 0x123   : > { %5417 = vmatprep.mubr.msk.bf16.mxu1 %vm1509_vm0, %v5897_v43  ;;  %5546 = vmatmul.mubr.msk.bf16.gmra.mrb[36].mxu0 %vm1509_vm0, %v5896_v44 }
 0x124   : > { %5549 = vmatprep.mubr.msk.bf16.mxu0 %vm1509_vm0, %v5898_v45 }
 0x12a   : > { %5418 = vmatmul.mubr.msk.bf16.gmra.mrb[40].mxu1 %vm1509_vm0, %v5899_v46 }
 0x12b   : > { %5421 = vmatprep.mubr.msk.bf16.mxu1 %vm1509_vm0, %v5901_v47  ;;  %5550 = vmatmul.mubr.msk.bf16.gmra.mrb[40].mxu0 %vm1509_vm0, %v5900_v48 }
 0x12c   : > { %5553 = vmatprep.mubr.msk.bf16.mxu0 %vm1509_vm0, %v5902_v49 }
 0x132   : > { %5422 = vmatmul.mubr.msk.bf16.gmra.mrb[44].mxu1 %vm1509_vm0, %v5903_v50 }
 0x133   : > { %5425 = vmatprep.mubr.msk.bf16.mxu1 %vm1509_vm0, %v5905_v51  ;;  %5554 = vmatmul.mubr.msk.bf16.gmra.mrb[44].mxu0 %vm1509_vm0, %v5904_v52 }
 0x134   : > { %5557 = vmatprep.mubr.msk.bf16.mxu0 %vm1509_vm0, %v5906_v53 }
 0x13a   : > { %5426 = vmatmul.mubr.msk.bf16.gmra.mrb[48].mxu1 %vm1509_vm0, %v5907_v54 }
 0x13b   : > { %5429 = vmatprep.mubr.msk.bf16.mxu1 %vm1509_vm0, %v5909_v55  ;;  %5558 = vmatmul.mubr.msk.bf16.gmra.mrb[48].mxu0 %vm1509_vm0, %v5908_v56 }
 0x13c   : > { %5561 = vmatprep.mubr.msk.bf16.mxu0 %vm1509_vm0, %v5910_v57 }
 0x142   : > { %5430 = vmatmul.mubr.msk.bf16.gmra.mrb[52].mxu1 %vm1509_vm0, %v5911_v58 }
 0x143   : > { %5433 = vmatprep.mubr.msk.bf16.mxu1 %vm1509_vm0, %v5913_v59  ;;  %5562 = vmatmul.mubr.msk.bf16.gmra.mrb[52].mxu0 %vm1509_vm0, %v5912_v60 }
 0x144   : > { %5565 = vmatprep.mubr.msk.bf16.mxu0 %vm1509_vm0, %v5914_v61 }
 0x14a   : > { %5434 = vmatmul.mubr.msk.bf16.gmra.mrb[56].mxu1 %vm1509_vm0, %v5915_v62 }
 0x14b   : > { %5437 = vmatprep.mubr.msk.bf16.mxu1 %vm1509_vm0, %v5917_v63  ;;  %5566 = vmatmul.mubr.msk.bf16.gmra.mrb[56].mxu0 %vm1509_vm0, %v5916_v0 }
 0x14c   : > { %5569 = vmatprep.mubr.msk.bf16.mxu0 %vm1509_vm0, %v5918_v1 }
 0x152   : > { %5438 = vmatmul.mubr.msk.bf16.gmra.mrb[60].mxu1 %vm1509_vm0, %v5919_v2 }
 0x153   : > { %5570 = vmatmul.mubr.msk.bf16.gmra.mrb[60].mxu0 %vm1509_vm0, %v5920_v3 }
 0x1ad   : > { %v5379_v4 = vpop.f32.mrb[0].mxu1 }
 0x1ae   : > { %v2191_v5 = vpop.f32.mrb[1].mxu1  ;;  %v5511_v6 = vpop.f32.mrb[0].mxu0 }
 0x1af   : > { %v5380_v7 = vpop.f32.mrb[2].mxu1  ;;  %v5573_v8 = vadd.f32 %v5511_v6, %v5379_v4  ;;  %v3493_v9 = vpop.f32.mrb[1].mxu0 }
 0x1b0   : > { %v2194_v10 = vpop.f32.mrb[3].mxu1  ;;  %v5574_v11 = vadd.f32 %v3493_v9, %v2191_v5  ;;  %v5512_v12 = vpop.f32.mrb[2].mxu0 }
 0x1b1   : > { %v3878_v13 = vmul.f32 0.2, %v5573_v8  ;;  %v5575_v14 = vadd.f32 %v5512_v12, %v5380_v7  ;;  %v3496_v15 = vpop.f32.mrb[3].mxu0  ;;  %vm3814_vm1 = vcmp.ge.f32.partialorder %v5573_v8, 0.0 }
 0x1b2   : > { %v3876_v16 = vmul.f32 0.2, %v5574_v11  ;;  %v5576_v17 = vadd.f32 %v3496_v15, %v2194_v10  ;;  %vm3812_vm2 = vcmp.ge.f32.partialorder %v5574_v11, 0.0 }
 0x1b3   : > { %vm3815_vm3 = vcmp.ge.f32.partialorder %v5575_v14, 0.0  ;;  %v3879_v18 = vmul.f32 0.2, %v5575_v14  ;;  %v3942_v21 = vsel %vm3814_vm1, %v5573_v8, %v3878_v13 }
 0x1b4   : > { %vm3813_vm4 = vcmp.ge.f32.partialorder %v5576_v17, 0.0  ;;  %v3877_v19 = vmul.f32 0.2, %v5576_v17  ;;  %v3940_v24 = vsel %vm3812_vm2, %v5574_v11, %v3876_v16 }
 0x1b5   : > { %v5383_v20 = vpop.f32.mrb[4].mxu1  ;;  %v3943_v22 = vsel %vm3815_vm3, %v5575_v14, %v3879_v18 }
 0x1b6   : > { %v2207_v23 = vpop.f32.mrb[5].mxu1  ;;  %v4994_v25 = vpack.c.bf16 %v3943_v22, %v3942_v21  ;;  %v3941_v26 = vsel %vm3813_vm4, %v5576_v17, %v3877_v19  ;;  %v5515_v27 = vpop.f32.mrb[4].mxu0 }
 0x1b7   : > { %v5384_v28 = vpop.f32.mrb[6].mxu1  ;;  %v4989_v29 = vpack.c.bf16 %v3941_v26, %v3940_v24  ;;  %v5577_v30 = vadd.f32 %v5515_v27, %v5383_v20  ;;  %v3509_v31 = vpop.f32.mrb[5].mxu0 }
 0x1b8   : > { %v2210_v32 = vpop.f32.mrb[7].mxu1  ;;  %5146 = vst [vmem:[%s6532_s12 + $0x8] sm:$0xff] %v4994_v25   ;;  %v5578_v33 = vadd.f32 %v3509_v31, %v2207_v23  ;;  %v5516_v34 = vpop.f32.mrb[6].mxu0 }
 0x1b9   : > { %4990 = vst [vmem:[%s6532_s12] sm:$0xff] %v4989_v29   ;;  %v3882_v35 = vmul.f32 0.2, %v5577_v30  ;;  %v5579_v36 = vadd.f32 %v5516_v34, %v5384_v28  ;;  %v3512_v37 = vpop.f32.mrb[7].mxu0  ;;  %vm3818_vm5 = vcmp.ge.f32.partialorder %v5577_v30, 0.0 }
 0x1ba   : > { %v3880_v38 = vmul.f32 0.2, %v5578_v33  ;;  %v5580_v39 = vadd.f32 %v3512_v37, %v2210_v32  ;;  %vm3816_vm6 = vcmp.ge.f32.partialorder %v5578_v33, 0.0 }
 0x1bb   : > { %vm3819_vm7 = vcmp.ge.f32.partialorder %v5579_v36, 0.0  ;;  %v3883_v40 = vmul.f32 0.2, %v5579_v36  ;;  %v3946_v43 = vsel %vm3818_vm5, %v5577_v30, %v3882_v35 }
 0x1bc   : > { %vm3817_vm8 = vcmp.ge.f32.partialorder %v5580_v39, 0.0  ;;  %v3881_v41 = vmul.f32 0.2, %v5580_v39  ;;  %v3944_v46 = vsel %vm3816_vm6, %v5578_v33, %v3880_v38 }
 0x1bd   : > { %v5387_v42 = vpop.f32.mrb[8].mxu1  ;;  %v3947_v44 = vsel %vm3819_vm7, %v5579_v36, %v3883_v40 }
 0x1be   : > { %v2223_v45 = vpop.f32.mrb[9].mxu1  ;;  %v5004_v47 = vpack.c.bf16 %v3947_v44, %v3946_v43  ;;  %v3945_v48 = vsel %vm3817_vm8, %v5580_v39, %v3881_v41  ;;  %v5519_v49 = vpop.f32.mrb[8].mxu0 }
 0x1bf   : > { %v5388_v50 = vpop.f32.mrb[10].mxu1  ;;  %v4999_v51 = vpack.c.bf16 %v3945_v48, %v3944_v46  ;;  %v5581_v52 = vadd.f32 %v5519_v49, %v5387_v42  ;;  %v3525_v53 = vpop.f32.mrb[9].mxu0 }
 0x1c0   : > { %v2226_v54 = vpop.f32.mrb[11].mxu1  ;;  %5148 = vst [vmem:[%s6532_s12 + $0x18] sm:$0xff] %v5004_v47   ;;  %v5582_v55 = vadd.f32 %v3525_v53, %v2223_v45  ;;  %v5520_v56 = vpop.f32.mrb[10].mxu0 }
 0x1c1   : > { %5147 = vst [vmem:[%s6532_s12 + $0x10] sm:$0xff] %v4999_v51   ;;  %v3886_v57 = vmul.f32 0.2, %v5581_v52  ;;  %v5583_v58 = vadd.f32 %v5520_v56, %v5388_v50  ;;  %v3528_v59 = vpop.f32.mrb[11].mxu0  ;;  %vm3822_vm9 = vcmp.ge.f32.partialorder %v5581_v52, 0.0 }
 0x1c2   : > { %v3884_v60 = vmul.f32 0.2, %v5582_v55  ;;  %v5584_v61 = vadd.f32 %v3528_v59, %v2226_v54  ;;  %vm3820_vm10 = vcmp.ge.f32.partialorder %v5582_v55, 0.0 }
 0x1c3   : > { %vm3823_vm11 = vcmp.ge.f32.partialorder %v5583_v58, 0.0  ;;  %v3887_v62 = vmul.f32 0.2, %v5583_v58  ;;  %v3950_v1 = vsel %vm3822_vm9, %v5581_v52, %v3886_v57 }
 0x1c4   : > { %vm3821_vm12 = vcmp.ge.f32.partialorder %v5584_v61, 0.0  ;;  %v3885_v63 = vmul.f32 0.2, %v5584_v61  ;;  %v3948_v4 = vsel %vm3820_vm10, %v5582_v55, %v3884_v60 }
 0x1c5   : > { %v5391_v0 = vpop.f32.mrb[12].mxu1  ;;  %v3951_v2 = vsel %vm3823_vm11, %v5583_v58, %v3887_v62 }
 0x1c6   : > { %v2239_v3 = vpop.f32.mrb[13].mxu1  ;;  %v5014_v5 = vpack.c.bf16 %v3951_v2, %v3950_v1  ;;  %v3949_v6 = vsel %vm3821_vm12, %v5584_v61, %v3885_v63  ;;  %v5523_v7 = vpop.f32.mrb[12].mxu0 }
 0x1c7   : > { %v5392_v8 = vpop.f32.mrb[14].mxu1  ;;  %v5009_v9 = vpack.c.bf16 %v3949_v6, %v3948_v4  ;;  %v5585_v10 = vadd.f32 %v5523_v7, %v5391_v0  ;;  %v3541_v11 = vpop.f32.mrb[13].mxu0 }
 0x1c8   : > { %v2242_v12 = vpop.f32.mrb[15].mxu1  ;;  %5150 = vst [vmem:[%s6532_s12 + $0x28] sm:$0xff] %v5014_v5   ;;  %v5586_v13 = vadd.f32 %v3541_v11, %v2239_v3  ;;  %v5524_v14 = vpop.f32.mrb[14].mxu0 }
 0x1c9   : > { %5149 = vst [vmem:[%s6532_s12 + $0x20] sm:$0xff] %v5009_v9   ;;  %v3890_v15 = vmul.f32 0.2, %v5585_v10  ;;  %v5587_v16 = vadd.f32 %v5524_v14, %v5392_v8  ;;  %v3544_v17 = vpop.f32.mrb[15].mxu0  ;;  %vm3826_vm13 = vcmp.ge.f32.partialorder %v5585_v10, 0.0 }
 0x1ca   : > { %v3888_v18 = vmul.f32 0.2, %v5586_v13  ;;  %v5588_v19 = vadd.f32 %v3544_v17, %v2242_v12  ;;  %vm3824_vm14 = vcmp.ge.f32.partialorder %v5586_v13, 0.0 }
 0x1cb   : > { %vm3827_vm15 = vcmp.ge.f32.partialorder %v5587_v16, 0.0  ;;  %v3891_v20 = vmul.f32 0.2, %v5587_v16  ;;  %v3954_v23 = vsel %vm3826_vm13, %v5585_v10, %v3890_v15 }
 0x1cc   : > { %vm3825_vm0 = vcmp.ge.f32.partialorder %v5588_v19, 0.0  ;;  %v3889_v21 = vmul.f32 0.2, %v5588_v19  ;;  %v3952_v26 = vsel %vm3824_vm14, %v5586_v13, %v3888_v18 }
 0x1cd   : > { %v5395_v22 = vpop.f32.mrb[16].mxu1  ;;  %v3955_v24 = vsel %vm3827_vm15, %v5587_v16, %v3891_v20 }
 0x1ce   : > { %v2255_v25 = vpop.f32.mrb[17].mxu1  ;;  %v5024_v27 = vpack.c.bf16 %v3955_v24, %v3954_v23  ;;  %v3953_v28 = vsel %vm3825_vm0, %v5588_v19, %v3889_v21  ;;  %v5527_v29 = vpop.f32.mrb[16].mxu0 }
 0x1cf   : > { %v5396_v30 = vpop.f32.mrb[18].mxu1  ;;  %v5019_v31 = vpack.c.bf16 %v3953_v28, %v3952_v26  ;;  %v5589_v32 = vadd.f32 %v5527_v29, %v5395_v22  ;;  %v3557_v33 = vpop.f32.mrb[17].mxu0 }
 0x1d0   : > { %v2258_v34 = vpop.f32.mrb[19].mxu1  ;;  %5152 = vst [vmem:[%s6532_s12 + $0x38] sm:$0xff] %v5024_v27   ;;  %v5590_v35 = vadd.f32 %v3557_v33, %v2255_v25  ;;  %v5528_v36 = vpop.f32.mrb[18].mxu0 }
 0x1d1   : > { %5151 = vst [vmem:[%s6532_s12 + $0x30] sm:$0xff] %v5019_v31   ;;  %v3894_v37 = vmul.f32 0.2, %v5589_v32  ;;  %v5591_v38 = vadd.f32 %v5528_v36, %v5396_v30  ;;  %v3560_v39 = vpop.f32.mrb[19].mxu0  ;;  %vm3830_vm1 = vcmp.ge.f32.partialorder %v5589_v32, 0.0 }
 0x1d2   : > { %v3892_v40 = vmul.f32 0.2, %v5590_v35  ;;  %v5592_v41 = vadd.f32 %v3560_v39, %v2258_v34  ;;  %vm3828_vm2 = vcmp.ge.f32.partialorder %v5590_v35, 0.0 }
 0x1d3   : > { %vm3831_vm3 = vcmp.ge.f32.partialorder %v5591_v38, 0.0  ;;  %v3895_v42 = vmul.f32 0.2, %v5591_v38  ;;  %v3958_v45 = vsel %vm3830_vm1, %v5589_v32, %v3894_v37 }
 0x1d4   : > { %vm3829_vm4 = vcmp.ge.f32.partialorder %v5592_v41, 0.0  ;;  %v3893_v43 = vmul.f32 0.2, %v5592_v41  ;;  %v3956_v48 = vsel %vm3828_vm2, %v5590_v35, %v3892_v40 }
 0x1d5   : > { %v5399_v44 = vpop.f32.mrb[20].mxu1  ;;  %v3959_v46 = vsel %vm3831_vm3, %v5591_v38, %v3895_v42 }
 0x1d6   : > { %v2271_v47 = vpop.f32.mrb[21].mxu1  ;;  %v5034_v49 = vpack.c.bf16 %v3959_v46, %v3958_v45  ;;  %v3957_v50 = vsel %vm3829_vm4, %v5592_v41, %v3893_v43  ;;  %v5531_v51 = vpop.f32.mrb[20].mxu0 }
 0x1d7   : > { %v5400_v52 = vpop.f32.mrb[22].mxu1  ;;  %v5029_v53 = vpack.c.bf16 %v3957_v50, %v3956_v48  ;;  %v5593_v54 = vadd.f32 %v5531_v51, %v5399_v44  ;;  %v3573_v55 = vpop.f32.mrb[21].mxu0 }
 0x1d8   : > { %v2274_v56 = vpop.f32.mrb[23].mxu1  ;;  %5154 = vst [vmem:[%s6532_s12 + $0x48] sm:$0xff] %v5034_v49   ;;  %v5594_v57 = vadd.f32 %v3573_v55, %v2271_v47  ;;  %v5532_v58 = vpop.f32.mrb[22].mxu0 }
 0x1d9   : > { %5153 = vst [vmem:[%s6532_s12 + $0x40] sm:$0xff] %v5029_v53   ;;  %v3898_v59 = vmul.f32 0.2, %v5593_v54  ;;  %v5595_v60 = vadd.f32 %v5532_v58, %v5400_v52  ;;  %v3576_v61 = vpop.f32.mrb[23].mxu0  ;;  %vm3834_vm5 = vcmp.ge.f32.partialorder %v5593_v54, 0.0 }
 0x1da   : > { %v3896_v62 = vmul.f32 0.2, %v5594_v57  ;;  %v5596_v63 = vadd.f32 %v3576_v61, %v2274_v56  ;;  %vm3832_vm6 = vcmp.ge.f32.partialorder %v5594_v57, 0.0 }
 0x1db   : > { %vm3835_vm7 = vcmp.ge.f32.partialorder %v5595_v60, 0.0  ;;  %v3899_v0 = vmul.f32 0.2, %v5595_v60  ;;  %v3962_v3 = vsel %vm3834_vm5, %v5593_v54, %v3898_v59 }
 0x1dc   : > { %vm3833_vm8 = vcmp.ge.f32.partialorder %v5596_v63, 0.0  ;;  %v3897_v1 = vmul.f32 0.2, %v5596_v63  ;;  %v3960_v6 = vsel %vm3832_vm6, %v5594_v57, %v3896_v62 }
 0x1dd   : > { %v5403_v2 = vpop.f32.mrb[24].mxu1  ;;  %v3963_v4 = vsel %vm3835_vm7, %v5595_v60, %v3899_v0 }
 0x1de   : > { %v2287_v5 = vpop.f32.mrb[25].mxu1  ;;  %v5044_v7 = vpack.c.bf16 %v3963_v4, %v3962_v3  ;;  %v3961_v8 = vsel %vm3833_vm8, %v5596_v63, %v3897_v1  ;;  %v5535_v9 = vpop.f32.mrb[24].mxu0 }
 0x1df   : > { %v5404_v10 = vpop.f32.mrb[26].mxu1  ;;  %v5039_v11 = vpack.c.bf16 %v3961_v8, %v3960_v6  ;;  %v5597_v12 = vadd.f32 %v5535_v9, %v5403_v2  ;;  %v3589_v13 = vpop.f32.mrb[25].mxu0 }
 0x1e0   : > { %v2290_v14 = vpop.f32.mrb[27].mxu1  ;;  %5156 = vst [vmem:[%s6532_s12 + $0x58] sm:$0xff] %v5044_v7   ;;  %v5598_v15 = vadd.f32 %v3589_v13, %v2287_v5  ;;  %v5536_v16 = vpop.f32.mrb[26].mxu0 }
 0x1e1   : > { %5155 = vst [vmem:[%s6532_s12 + $0x50] sm:$0xff] %v5039_v11   ;;  %v3902_v17 = vmul.f32 0.2, %v5597_v12  ;;  %v5599_v18 = vadd.f32 %v5536_v16, %v5404_v10  ;;  %v3592_v19 = vpop.f32.mrb[27].mxu0  ;;  %vm3838_vm9 = vcmp.ge.f32.partialorder %v5597_v12, 0.0 }
 0x1e2   : > { %v3900_v20 = vmul.f32 0.2, %v5598_v15  ;;  %v5600_v21 = vadd.f32 %v3592_v19, %v2290_v14  ;;  %vm3836_vm10 = vcmp.ge.f32.partialorder %v5598_v15, 0.0 }
 0x1e3   : > { %vm3839_vm11 = vcmp.ge.f32.partialorder %v5599_v18, 0.0  ;;  %v3903_v22 = vmul.f32 0.2, %v5599_v18  ;;  %v3966_v25 = vsel %vm3838_vm9, %v5597_v12, %v3902_v17 }
 0x1e4   : > { %vm3837_vm12 = vcmp.ge.f32.partialorder %v5600_v21, 0.0  ;;  %v3901_v23 = vmul.f32 0.2, %v5600_v21  ;;  %v3964_v28 = vsel %vm3836_vm10, %v5598_v15, %v3900_v20 }
 0x1e5   : > { %v5407_v24 = vpop.f32.mrb[28].mxu1  ;;  %v3967_v26 = vsel %vm3839_vm11, %v5599_v18, %v3903_v22 }
 0x1e6   : > { %v2303_v27 = vpop.f32.mrb[29].mxu1  ;;  %v5054_v29 = vpack.c.bf16 %v3967_v26, %v3966_v25  ;;  %v3965_v30 = vsel %vm3837_vm12, %v5600_v21, %v3901_v23  ;;  %v5539_v31 = vpop.f32.mrb[28].mxu0 }
 0x1e7   : > { %v5408_v32 = vpop.f32.mrb[30].mxu1  ;;  %v5049_v33 = vpack.c.bf16 %v3965_v30, %v3964_v28  ;;  %v5601_v34 = vadd.f32 %v5539_v31, %v5407_v24  ;;  %v3605_v35 = vpop.f32.mrb[29].mxu0 }
 0x1e8   : > { %v2306_v36 = vpop.f32.mrb[31].mxu1  ;;  %5158 = vst [vmem:[%s6532_s12 + $0x68] sm:$0xff] %v5054_v29   ;;  %v5602_v37 = vadd.f32 %v3605_v35, %v2303_v27  ;;  %v5540_v38 = vpop.f32.mrb[30].mxu0 }
 0x1e9   : > { %5157 = vst [vmem:[%s6532_s12 + $0x60] sm:$0xff] %v5049_v33   ;;  %v3906_v39 = vmul.f32 0.2, %v5601_v34  ;;  %v5603_v40 = vadd.f32 %v5540_v38, %v5408_v32  ;;  %v3608_v41 = vpop.f32.mrb[31].mxu0  ;;  %vm3842_vm13 = vcmp.ge.f32.partialorder %v5601_v34, 0.0 }
 0x1ea   : > { %v3904_v42 = vmul.f32 0.2, %v5602_v37  ;;  %v5604_v43 = vadd.f32 %v3608_v41, %v2306_v36  ;;  %vm3840_vm14 = vcmp.ge.f32.partialorder %v5602_v37, 0.0 }
 0x1eb   : > { %vm3843_vm15 = vcmp.ge.f32.partialorder %v5603_v40, 0.0  ;;  %v3907_v44 = vmul.f32 0.2, %v5603_v40  ;;  %v3970_v47 = vsel %vm3842_vm13, %v5601_v34, %v3906_v39 }
 0x1ec   : > { %vm3841_vm0 = vcmp.ge.f32.partialorder %v5604_v43, 0.0  ;;  %v3905_v45 = vmul.f32 0.2, %v5604_v43  ;;  %v3968_v50 = vsel %vm3840_vm14, %v5602_v37, %v3904_v42 }
 0x1ed   : > { %v5411_v46 = vpop.f32.mrb[32].mxu1  ;;  %v3971_v48 = vsel %vm3843_vm15, %v5603_v40, %v3907_v44 }
 0x1ee   : > { %v2319_v49 = vpop.f32.mrb[33].mxu1  ;;  %v5064_v51 = vpack.c.bf16 %v3971_v48, %v3970_v47  ;;  %v3969_v52 = vsel %vm3841_vm0, %v5604_v43, %v3905_v45  ;;  %v5543_v53 = vpop.f32.mrb[32].mxu0 }
 0x1ef   : > { %v5412_v54 = vpop.f32.mrb[34].mxu1  ;;  %v5059_v55 = vpack.c.bf16 %v3969_v52, %v3968_v50  ;;  %v5605_v56 = vadd.f32 %v5543_v53, %v5411_v46  ;;  %v3621_v57 = vpop.f32.mrb[33].mxu0 }
 0x1f0   : > { %v2322_v58 = vpop.f32.mrb[35].mxu1  ;;  %5160 = vst [vmem:[%s6532_s12 + $0x78] sm:$0xff] %v5064_v51   ;;  %v5606_v59 = vadd.f32 %v3621_v57, %v2319_v49  ;;  %v5544_v60 = vpop.f32.mrb[34].mxu0 }
 0x1f1   : > { %5159 = vst [vmem:[%s6532_s12 + $0x70] sm:$0xff] %v5059_v55   ;;  %v3910_v61 = vmul.f32 0.2, %v5605_v56  ;;  %v5607_v62 = vadd.f32 %v5544_v60, %v5412_v54  ;;  %v3624_v63 = vpop.f32.mrb[35].mxu0  ;;  %vm3846_vm1 = vcmp.ge.f32.partialorder %v5605_v56, 0.0 }
 0x1f2   : > { %v3908_v0 = vmul.f32 0.2, %v5606_v59  ;;  %v5608_v1 = vadd.f32 %v3624_v63, %v2322_v58  ;;  %vm3844_vm2 = vcmp.ge.f32.partialorder %v5606_v59, 0.0 }
 0x1f3   : > { %vm3847_vm3 = vcmp.ge.f32.partialorder %v5607_v62, 0.0  ;;  %v3911_v2 = vmul.f32 0.2, %v5607_v62  ;;  %v3974_v5 = vsel %vm3846_vm1, %v5605_v56, %v3910_v61 }
 0x1f4   : > { %vm3845_vm4 = vcmp.ge.f32.partialorder %v5608_v1, 0.0  ;;  %v3909_v3 = vmul.f32 0.2, %v5608_v1  ;;  %v3972_v8 = vsel %vm3844_vm2, %v5606_v59, %v3908_v0 }
 0x1f5   : > { %v5415_v4 = vpop.f32.mrb[36].mxu1  ;;  %v3975_v6 = vsel %vm3847_vm3, %v5607_v62, %v3911_v2 }
 0x1f6   : > { %v2335_v7 = vpop.f32.mrb[37].mxu1  ;;  %v5074_v9 = vpack.c.bf16 %v3975_v6, %v3974_v5  ;;  %v3973_v10 = vsel %vm3845_vm4, %v5608_v1, %v3909_v3  ;;  %v5547_v11 = vpop.f32.mrb[36].mxu0 }
 0x1f7   : > { %v5416_v12 = vpop.f32.mrb[38].mxu1  ;;  %v5069_v13 = vpack.c.bf16 %v3973_v10, %v3972_v8  ;;  %v5609_v14 = vadd.f32 %v5547_v11, %v5415_v4  ;;  %v3637_v15 = vpop.f32.mrb[37].mxu0 }
 0x1f8   : > { %v2338_v16 = vpop.f32.mrb[39].mxu1  ;;  %5162 = vst [vmem:[%s6532_s12 + $0x88] sm:$0xff] %v5074_v9   ;;  %v5610_v17 = vadd.f32 %v3637_v15, %v2335_v7  ;;  %v5548_v18 = vpop.f32.mrb[38].mxu0 }
 0x1f9   : > { %5161 = vst [vmem:[%s6532_s12 + $0x80] sm:$0xff] %v5069_v13   ;;  %v3914_v19 = vmul.f32 0.2, %v5609_v14  ;;  %v5611_v20 = vadd.f32 %v5548_v18, %v5416_v12  ;;  %v3640_v21 = vpop.f32.mrb[39].mxu0  ;;  %vm3850_vm5 = vcmp.ge.f32.partialorder %v5609_v14, 0.0 }
 0x1fa   : > { %v3912_v22 = vmul.f32 0.2, %v5610_v17  ;;  %v5612_v23 = vadd.f32 %v3640_v21, %v2338_v16  ;;  %vm3848_vm6 = vcmp.ge.f32.partialorder %v5610_v17, 0.0 }
 0x1fb   : > { %vm3851_vm7 = vcmp.ge.f32.partialorder %v5611_v20, 0.0  ;;  %v3915_v24 = vmul.f32 0.2, %v5611_v20  ;;  %v3978_v27 = vsel %vm3850_vm5, %v5609_v14, %v3914_v19 }
 0x1fc   : > { %vm3849_vm8 = vcmp.ge.f32.partialorder %v5612_v23, 0.0  ;;  %v3913_v25 = vmul.f32 0.2, %v5612_v23  ;;  %v3976_v30 = vsel %vm3848_vm6, %v5610_v17, %v3912_v22 }
 0x1fd   : > { %v5419_v26 = vpop.f32.mrb[40].mxu1  ;;  %v3979_v28 = vsel %vm3851_vm7, %v5611_v20, %v3915_v24 }
 0x1fe   : > { %v2351_v29 = vpop.f32.mrb[41].mxu1  ;;  %v5084_v31 = vpack.c.bf16 %v3979_v28, %v3978_v27  ;;  %v3977_v32 = vsel %vm3849_vm8, %v5612_v23, %v3913_v25  ;;  %v5551_v33 = vpop.f32.mrb[40].mxu0 }
 0x1ff   : > { %v5420_v34 = vpop.f32.mrb[42].mxu1  ;;  %v5079_v35 = vpack.c.bf16 %v3977_v32, %v3976_v30  ;;  %v5613_v36 = vadd.f32 %v5551_v33, %v5419_v26  ;;  %v3653_v37 = vpop.f32.mrb[41].mxu0 }
 0x200   : > { %v2354_v38 = vpop.f32.mrb[43].mxu1  ;;  %5164 = vst [vmem:[%s6532_s12 + $0x98] sm:$0xff] %v5084_v31   ;;  %v5614_v39 = vadd.f32 %v3653_v37, %v2351_v29  ;;  %v5552_v40 = vpop.f32.mrb[42].mxu0 }
 0x201   : > { %5163 = vst [vmem:[%s6532_s12 + $0x90] sm:$0xff] %v5079_v35   ;;  %v3918_v41 = vmul.f32 0.2, %v5613_v36  ;;  %v5615_v42 = vadd.f32 %v5552_v40, %v5420_v34  ;;  %v3656_v43 = vpop.f32.mrb[43].mxu0  ;;  %vm3854_vm9 = vcmp.ge.f32.partialorder %v5613_v36, 0.0 }
 0x202   : > { %v3916_v44 = vmul.f32 0.2, %v5614_v39  ;;  %v5616_v45 = vadd.f32 %v3656_v43, %v2354_v38  ;;  %vm3852_vm10 = vcmp.ge.f32.partialorder %v5614_v39, 0.0 }
 0x203   : > { %vm3855_vm11 = vcmp.ge.f32.partialorder %v5615_v42, 0.0  ;;  %v3919_v46 = vmul.f32 0.2, %v5615_v42  ;;  %v3982_v49 = vsel %vm3854_vm9, %v5613_v36, %v3918_v41 }
 0x204   : > { %vm3853_vm12 = vcmp.ge.f32.partialorder %v5616_v45, 0.0  ;;  %v3917_v47 = vmul.f32 0.2, %v5616_v45  ;;  %v3980_v52 = vsel %vm3852_vm10, %v5614_v39, %v3916_v44 }
 0x205   : > { %v5423_v48 = vpop.f32.mrb[44].mxu1  ;;  %v3983_v50 = vsel %vm3855_vm11, %v5615_v42, %v3919_v46 }
 0x206   : > { %v2367_v51 = vpop.f32.mrb[45].mxu1  ;;  %v5094_v53 = vpack.c.bf16 %v3983_v50, %v3982_v49  ;;  %v3981_v54 = vsel %vm3853_vm12, %v5616_v45, %v3917_v47  ;;  %v5555_v55 = vpop.f32.mrb[44].mxu0 }
 0x207   : > { %v5424_v56 = vpop.f32.mrb[46].mxu1  ;;  %v5089_v57 = vpack.c.bf16 %v3981_v54, %v3980_v52  ;;  %v5617_v58 = vadd.f32 %v5555_v55, %v5423_v48  ;;  %v3669_v59 = vpop.f32.mrb[45].mxu0 }
 0x208   : > { %v2370_v60 = vpop.f32.mrb[47].mxu1  ;;  %5166 = vst [vmem:[%s6532_s12 + $0xa8] sm:$0xff] %v5094_v53   ;;  %v5618_v61 = vadd.f32 %v3669_v59, %v2367_v51  ;;  %v5556_v62 = vpop.f32.mrb[46].mxu0 }
 0x209   : > { %5165 = vst [vmem:[%s6532_s12 + $0xa0] sm:$0xff] %v5089_v57   ;;  %v3922_v63 = vmul.f32 0.2, %v5617_v58  ;;  %v5619_v0 = vadd.f32 %v5556_v62, %v5424_v56  ;;  %v3672_v1 = vpop.f32.mrb[47].mxu0  ;;  %vm3858_vm13 = vcmp.ge.f32.partialorder %v5617_v58, 0.0 }
 0x20a   : > { %v3920_v2 = vmul.f32 0.2, %v5618_v61  ;;  %v5620_v3 = vadd.f32 %v3672_v1, %v2370_v60  ;;  %vm3856_vm14 = vcmp.ge.f32.partialorder %v5618_v61, 0.0 }
 0x20b   : > { %vm3859_vm15 = vcmp.ge.f32.partialorder %v5619_v0, 0.0  ;;  %v3923_v4 = vmul.f32 0.2, %v5619_v0  ;;  %v3986_v7 = vsel %vm3858_vm13, %v5617_v58, %v3922_v63 }
 0x20c   : > { %vm3857_vm0 = vcmp.ge.f32.partialorder %v5620_v3, 0.0  ;;  %v3921_v5 = vmul.f32 0.2, %v5620_v3  ;;  %v3984_v10 = vsel %vm3856_vm14, %v5618_v61, %v3920_v2 }
 0x20d   : > { %v5427_v6 = vpop.f32.mrb[48].mxu1  ;;  %v3987_v8 = vsel %vm3859_vm15, %v5619_v0, %v3923_v4 }
 0x20e   : > { %v2383_v9 = vpop.f32.mrb[49].mxu1  ;;  %v5104_v11 = vpack.c.bf16 %v3987_v8, %v3986_v7  ;;  %v3985_v12 = vsel %vm3857_vm0, %v5620_v3, %v3921_v5  ;;  %v5559_v13 = vpop.f32.mrb[48].mxu0 }
 0x20f   : > { %v5428_v14 = vpop.f32.mrb[50].mxu1  ;;  %v5099_v15 = vpack.c.bf16 %v3985_v12, %v3984_v10  ;;  %v5621_v16 = vadd.f32 %v5559_v13, %v5427_v6  ;;  %v3685_v17 = vpop.f32.mrb[49].mxu0 }
 0x210   : > { %v2386_v18 = vpop.f32.mrb[51].mxu1  ;;  %5168 = vst [vmem:[%s6532_s12 + $0xb8] sm:$0xff] %v5104_v11   ;;  %v5622_v19 = vadd.f32 %v3685_v17, %v2383_v9  ;;  %v5560_v20 = vpop.f32.mrb[50].mxu0 }
 0x211   : > { %5167 = vst [vmem:[%s6532_s12 + $0xb0] sm:$0xff] %v5099_v15   ;;  %v3926_v21 = vmul.f32 0.2, %v5621_v16  ;;  %v5623_v22 = vadd.f32 %v5560_v20, %v5428_v14  ;;  %v3688_v23 = vpop.f32.mrb[51].mxu0  ;;  %vm3862_vm1 = vcmp.ge.f32.partialorder %v5621_v16, 0.0 }
 0x212   : > { %v3924_v24 = vmul.f32 0.2, %v5622_v19  ;;  %v5624_v25 = vadd.f32 %v3688_v23, %v2386_v18  ;;  %vm3860_vm2 = vcmp.ge.f32.partialorder %v5622_v19, 0.0 }
 0x213   : > { %vm3863_vm3 = vcmp.ge.f32.partialorder %v5623_v22, 0.0  ;;  %v3927_v26 = vmul.f32 0.2, %v5623_v22  ;;  %v3990_v29 = vsel %vm3862_vm1, %v5621_v16, %v3926_v21 }
 0x214   : > { %vm3861_vm4 = vcmp.ge.f32.partialorder %v5624_v25, 0.0  ;;  %v3925_v27 = vmul.f32 0.2, %v5624_v25  ;;  %v3988_v32 = vsel %vm3860_vm2, %v5622_v19, %v3924_v24 }
 0x215   : > { %v5431_v28 = vpop.f32.mrb[52].mxu1  ;;  %v3991_v30 = vsel %vm3863_vm3, %v5623_v22, %v3927_v26 }
 0x216   : > { %v2399_v31 = vpop.f32.mrb[53].mxu1  ;;  %v5114_v33 = vpack.c.bf16 %v3991_v30, %v3990_v29  ;;  %v3989_v34 = vsel %vm3861_vm4, %v5624_v25, %v3925_v27  ;;  %v5563_v35 = vpop.f32.mrb[52].mxu0 }
 0x217   : > { %v5432_v36 = vpop.f32.mrb[54].mxu1  ;;  %v5109_v37 = vpack.c.bf16 %v3989_v34, %v3988_v32  ;;  %v5625_v38 = vadd.f32 %v5563_v35, %v5431_v28  ;;  %v3701_v39 = vpop.f32.mrb[53].mxu0 }
 0x218   : > { %v2402_v40 = vpop.f32.mrb[55].mxu1  ;;  %5170 = vst [vmem:[%s6532_s12 + $0xc8] sm:$0xff] %v5114_v33   ;;  %v5626_v41 = vadd.f32 %v3701_v39, %v2399_v31  ;;  %v5564_v42 = vpop.f32.mrb[54].mxu0 }
 0x219   : > { %5169 = vst [vmem:[%s6532_s12 + $0xc0] sm:$0xff] %v5109_v37   ;;  %v3930_v43 = vmul.f32 0.2, %v5625_v38  ;;  %v5627_v44 = vadd.f32 %v5564_v42, %v5432_v36  ;;  %v3704_v45 = vpop.f32.mrb[55].mxu0  ;;  %vm3866_vm5 = vcmp.ge.f32.partialorder %v5625_v38, 0.0 }
 0x21a   : > { %v3928_v46 = vmul.f32 0.2, %v5626_v41  ;;  %v5628_v47 = vadd.f32 %v3704_v45, %v2402_v40  ;;  %vm3864_vm6 = vcmp.ge.f32.partialorder %v5626_v41, 0.0 }
 0x21b   : > { %vm3867_vm7 = vcmp.ge.f32.partialorder %v5627_v44, 0.0  ;;  %v3931_v48 = vmul.f32 0.2, %v5627_v44  ;;  %v3994_v51 = vsel %vm3866_vm5, %v5625_v38, %v3930_v43 }
 0x21c   : > { %vm3865_vm8 = vcmp.ge.f32.partialorder %v5628_v47, 0.0  ;;  %v3929_v49 = vmul.f32 0.2, %v5628_v47  ;;  %v3992_v54 = vsel %vm3864_vm6, %v5626_v41, %v3928_v46 }
 0x21d   : > { %v5435_v50 = vpop.f32.mrb[56].mxu1  ;;  %v3995_v52 = vsel %vm3867_vm7, %v5627_v44, %v3931_v48 }
 0x21e   : > { %v2415_v53 = vpop.f32.mrb[57].mxu1  ;;  %v5124_v55 = vpack.c.bf16 %v3995_v52, %v3994_v51  ;;  %v3993_v56 = vsel %vm3865_vm8, %v5628_v47, %v3929_v49  ;;  %v5567_v57 = vpop.f32.mrb[56].mxu0 }
 0x21f   : > { %v5436_v58 = vpop.f32.mrb[58].mxu1  ;;  %v5119_v59 = vpack.c.bf16 %v3993_v56, %v3992_v54  ;;  %v5629_v60 = vadd.f32 %v5567_v57, %v5435_v50  ;;  %v3717_v61 = vpop.f32.mrb[57].mxu0 }
 0x220   : > { %v2418_v62 = vpop.f32.mrb[59].mxu1  ;;  %5172 = vst [vmem:[%s6532_s12 + $0xd8] sm:$0xff] %v5124_v55   ;;  %v5630_v63 = vadd.f32 %v3717_v61, %v2415_v53  ;;  %v5568_v0 = vpop.f32.mrb[58].mxu0 }
 0x221   : > { %5171 = vst [vmem:[%s6532_s12 + $0xd0] sm:$0xff] %v5119_v59   ;;  %v3934_v1 = vmul.f32 0.2, %v5629_v60  ;;  %v5631_v2 = vadd.f32 %v5568_v0, %v5436_v58  ;;  %v3720_v3 = vpop.f32.mrb[59].mxu0  ;;  %vm3870_vm9 = vcmp.ge.f32.partialorder %v5629_v60, 0.0 }
 0x222   : > { %v3932_v4 = vmul.f32 0.2, %v5630_v63  ;;  %v5632_v5 = vadd.f32 %v3720_v3, %v2418_v62  ;;  %vm3868_vm10 = vcmp.ge.f32.partialorder %v5630_v63, 0.0 }
 0x223   : > { %vm3871_vm11 = vcmp.ge.f32.partialorder %v5631_v2, 0.0  ;;  %v3935_v6 = vmul.f32 0.2, %v5631_v2  ;;  %v3998_v9 = vsel %vm3870_vm9, %v5629_v60, %v3934_v1 }
 0x224   : > { %vm3869_vm12 = vcmp.ge.f32.partialorder %v5632_v5, 0.0  ;;  %v3933_v7 = vmul.f32 0.2, %v5632_v5  ;;  %v3996_v12 = vsel %vm3868_vm10, %v5630_v63, %v3932_v4 }
 0x225   : > { %v5439_v8 = vpop.f32.mrb[60].mxu1  ;;  %v3999_v10 = vsel %vm3871_vm11, %v5631_v2, %v3935_v6 }
 0x226   : > { %v2431_v11 = vpop.f32.mrb[61].mxu1  ;;  %v5134_v13 = vpack.c.bf16 %v3999_v10, %v3998_v9  ;;  %v3997_v14 = vsel %vm3869_vm12, %v5632_v5, %v3933_v7  ;;  %v5571_v15 = vpop.f32.mrb[60].mxu0 }
 0x227   : > { %v5440_v16 = vpop.f32.mrb[62].mxu1  ;;  %v5129_v17 = vpack.c.bf16 %v3997_v14, %v3996_v12  ;;  %v5633_v18 = vadd.f32 %v5571_v15, %v5439_v8  ;;  %v3733_v19 = vpop.f32.mrb[61].mxu0 }
 0x228   : > { %v2434_v20 = vpop.f32.mrb[63].mxu1  ;;  %5174 = vst [vmem:[%s6532_s12 + $0xe8] sm:$0xff] %v5134_v13   ;;  %v5634_v21 = vadd.f32 %v3733_v19, %v2431_v11  ;;  %v5572_v22 = vpop.f32.mrb[62].mxu0 }
 0x229   : > { %5173 = vst [vmem:[%s6532_s12 + $0xe0] sm:$0xff] %v5129_v17   ;;  %v3938_v23 = vmul.f32 0.2, %v5633_v18  ;;  %v5635_v24 = vadd.f32 %v5572_v22, %v5440_v16  ;;  %v3736_v25 = vpop.f32.mrb[63].mxu0  ;;  %vm3874_vm13 = vcmp.ge.f32.partialorder %v5633_v18, 0.0 }
 0x22a   : > { %v3936_v26 = vmul.f32 0.2, %v5634_v21  ;;  %v5636_v27 = vadd.f32 %v3736_v25, %v2434_v20  ;;  %vm3872_vm14 = vcmp.ge.f32.partialorder %v5634_v21, 0.0 }
 0x22b   : > { %vm3875_vm15 = vcmp.ge.f32.partialorder %v5635_v24, 0.0  ;;  %v3939_v28 = vmul.f32 0.2, %v5635_v24  ;;  %v4002_v30 = vsel %vm3874_vm13, %v5633_v18, %v3938_v23 }
 0x22c   : > { %vm3873_vm0 = vcmp.ge.f32.partialorder %v5636_v27, 0.0  ;;  %v3937_v29 = vmul.f32 0.2, %v5636_v27  ;;  %v4000_v32 = vsel %vm3872_vm14, %v5634_v21, %v3936_v26 }
 0x22d   : > { %v4003_v31 = vsel %vm3875_vm15, %v5635_v24, %v3939_v28 }
 0x22e   : > { %v5144_v33 = vpack.c.bf16 %v4003_v31, %v4002_v30  ;;  %v4001_v34 = vsel %vm3873_vm0, %v5636_v27, %v3937_v29 }
 0x22f   : > { %v5139_v35 = vpack.c.bf16 %v4001_v34, %v4000_v32 }
 0x230   : > { %5176 = vst [vmem:[%s6532_s12 + $0xf8] sm:$0xff] %v5144_v33  }
 0x231   : > { %5175 = vst [vmem:[%s6532_s12 + $0xf0] sm:$0xff] %v5139_v35  }
 0x232 PF: > { %p9_p9 = scmp.ge.s32.totalorder %s5977_s13, 6   ;;  %s6579_s9 = smov %s5939_s10 }
 0x233   : > { %s6580_s10 = smov %s5986_s16  ;;  %s6581_s11 = smov %s5977_s13 }
 0x234   :  { %11 = sbr.rel (!%p9_p9) target bundleno = 2 (0x2), region = 110 }

// kernel: net_a_forward.9
= control target key start
LH: loop header
LB: loop body
LE: loop exit
PB: predicated region body
PF: predicated region fallthrough
CT: control target
= control target key end

     0   :  { %s915_s12 = smov 0   ;;  %s1050_s0 = inlined_call_operand.vmem [shape: bf16[512,128], index: 0, kind: input, shape index: {}]   ;;  %s1051_s1 = inlined_call_operand.vmem [shape: f32[1,128], index: 1, kind: input, shape index: {}]   ;;  %s1052_s2 = inlined_call_operand.vmem [shape: f32[1,128], index: 2, kind: input, shape index: {}]   ;;  %s1053_s3 = inlined_call_operand.vmem [shape: bf16[512,128], index: 3, kind: output, shape index: {}]  }
   0x1 LB: > { %s628_s13 = sadd.s32 4294967295, %s893_s12   ;;  %p632_p0 = scmp.ge.s32.totalorder %s893_s12, 1  ;;  %s893_s12 = sphi %s915_s12, %s13_s12  }
   0x2   : > { %p138_p1 = scmp.lt.s32.totalorder %s893_s12, 3 }
   0x4   : > { %p139_p2 = pnand %p632_p0, %p138_p1 }
   0x5   : > { %s633_s14 = sshll.u32 (!%p139_p2), %s628_s13, 5  ;;  %v936_v0 = vld [vmem:[%s1051_s1] ss:$0 sm:$0xff] (!%p139_p2) }
   0x6   : > { %142 = sbr.rel (%p139_p2) target bundleno = 76 (0x4c), region = 32  ;;  %p163_p3 = scmp.lt.s32.totalorder (!%p139_p2), %s633_s14, 63  ;;  %v945_v9 = vld [vmem:[%s1052_s2] ss:$0 sm:$0xff] (!%p139_p2) }
   0xd   : > { %s1055_s14 = smov (!%p163_p3, %s633_s14), 63 }
   0xe   : > { %s634_s15 = sshll.u32 %s1055_s14, 2 }
   0xf   : > { %s931_s18 = scalar_lea.vmem %s1050_s0, %s634_s15  ;;  %s968_s25 = scalar_lea.vmem %s1053_s3, %s634_s15 }
  0x10   : > { %v706_v1 = vld [vmem:[%s931_s18] sm:$0xff]   ;;  %v849_v2 = vld [vmem:[%s931_s18 + $0x8] sm:$0xff]   ;;  %v850_v3 = vld [vmem:[%s931_s18 + $0x10] sm:$0xff]  }
  0x11   : > { %v707_v4 = vunpack.c.l.bf16 %v706_v1  ;;  %v708_v5 = vunpack.c.h.bf16 %v706_v1  ;;  %v711_v6 = vunpack.c.l.bf16 %v849_v2  ;;  %v712_v7 = vunpack.c.h.bf16 %v849_v2  ;;  %v851_v8 = vld [vmem:[%s931_s18 + $0x18] sm:$0xff]   ;;  %v852_v36 = vld [vmem:[%s931_s18 + $0x20] sm:$0xff]   ;;  %v853_v41 = vld [vmem:[%s931_s18 + $0x28] sm:$0xff]  }
  0x12   : > { %v715_v10 = vunpack.c.l.bf16 %v850_v3  ;;  %v716_v11 = vunpack.c.h.bf16 %v850_v3  ;;  %v719_v12 = vunpack.c.l.bf16 %v851_v8  ;;  %v720_v13 = vunpack.c.h.bf16 %v851_v8  ;;  %v854_v52 = vld [vmem:[%s931_s18 + $0x30] sm:$0xff]   ;;  %v855_v53 = vld [vmem:[%s931_s18 + $0x38] sm:$0xff]  }
  0x13   : > { %v245_v14 = vmul.f32 %v707_v4, %v936_v0  ;;  %v246_v15 = vmul.f32 %v708_v5, %v936_v0  ;;  %v247_v16 = vmul.f32 %v711_v6, %v936_v0  ;;  %v248_v17 = vmul.f32 %v712_v7, %v936_v0 }
  0x14   : > { %v249_v18 = vmul.f32 %v715_v10, %v936_v0  ;;  %v250_v19 = vmul.f32 %v716_v11, %v936_v0  ;;  %v251_v20 = vmul.f32 %v719_v12, %v936_v0  ;;  %v252_v21 = vmul.f32 %v720_v13, %v936_v0 }
  0x15   : > { %v284_v22 = vadd.f32 %v945_v9, %v245_v14  ;;  %v285_v23 = vadd.f32 %v945_v9, %v246_v15  ;;  %v286_v24 = vadd.f32 %v945_v9, %v247_v16  ;;  %v287_v25 = vadd.f32 %v945_v9, %v248_v17 }
  0x16   : > { %v288_v26 = vadd.f32 %v945_v9, %v249_v18  ;;  %v289_v27 = vadd.f32 %v945_v9, %v250_v19  ;;  %v290_v28 = vadd.f32 %v945_v9, %v251_v20  ;;  %v291_v29 = vadd.f32 %v945_v9, %v252_v21  ;;  %v856_v20 = vld [vmem:[%s931_s18 + $0x40] sm:$0xff]  }
  0x17   : > { %vm316_vm0 = vcmp.ge.f32.partialorder %v284_v22, 0.0  ;;  %vm317_vm1 = vcmp.ge.f32.partialorder %v285_v23, 0.0  ;;  %v348_v30 = vmul.f32 0.2, %v284_v22  ;;  %v349_v31 = vmul.f32 0.2, %v285_v23 }
  0x18   : > { %vm318_vm2 = vcmp.ge.f32.partialorder %v286_v24, 0.0  ;;  %vm319_vm3 = vcmp.ge.f32.partialorder %v287_v25, 0.0  ;;  %v350_v32 = vmul.f32 0.2, %v286_v24  ;;  %v351_v33 = vmul.f32 0.2, %v287_v25 }
  0x19   : > { %v380_v34 = vsel %vm316_vm0, %v284_v22, %v348_v30  ;;  %v381_v35 = vsel %vm317_vm1, %v285_v23, %v349_v31  ;;  %vm320_vm4 = vcmp.ge.f32.partialorder %v288_v26, 0.0  ;;  %vm321_vm5 = vcmp.ge.f32.partialorder %v289_v27, 0.0 }
  0x1a   : > { %v772_v37 = vpack.c.bf16 %v381_v35, %v380_v34  ;;  %v382_v38 = vsel %vm318_vm2, %v286_v24, %v350_v32  ;;  %v383_v39 = vsel %vm319_vm3, %v287_v25, %v351_v33  ;;  %v352_v40 = vmul.f32 0.2, %v288_v26  ;;  %v857_v24 = vld [vmem:[%s931_s18 + $0x48] sm:$0xff]  }
  0x1b   : > { %v777_v42 = vpack.c.bf16 %v383_v39, %v382_v38  ;;  %v353_v43 = vmul.f32 0.2, %v289_v27  ;;  %vm322_vm6 = vcmp.ge.f32.partialorder %v290_v28, 0.0  ;;  %vm323_vm7 = vcmp.ge.f32.partialorder %v291_v29, 0.0 }
  0x1c   : > { %773 = vst [vmem:[%s968_s25] sm:$0xff] %v772_v37   ;;  %v384_v44 = vsel %vm320_vm4, %v288_v26, %v352_v40  ;;  %v354_v45 = vmul.f32 0.2, %v290_v28  ;;  %v355_v46 = vmul.f32 0.2, %v291_v29  ;;  %v723_v47 = vunpack.c.l.bf16 %v852_v36 }
  0x1d   : > { %864 = vst [vmem:[%s968_s25 + $0x8] sm:$0xff] %v777_v42   ;;  %v385_v48 = vsel %vm321_vm5, %v289_v27, %v353_v43  ;;  %v724_v49 = vunpack.c.h.bf16 %v852_v36  ;;  %v727_v50 = vunpack.c.l.bf16 %v853_v41  ;;  %v728_v51 = vunpack.c.h.bf16 %v853_v41  ;;  %v858_v36 = vld [vmem:[%s931_s18 + $0x50] sm:$0xff]  }
  0x1e   : > { %v782_v54 = vpack.c.bf16 %v385_v48, %v384_v44  ;;  %v386_v55 = vsel %vm322_vm6, %v290_v28, %v354_v45  ;;  %v387_v56 = vsel %vm323_vm7, %v291_v29, %v355_v46  ;;  %v253_v57 = vmul.f32 %v723_v47, %v936_v0 }
  0x1f   : > { %v787_v58 = vpack.c.bf16 %v387_v56, %v386_v55  ;;  %v254_v59 = vmul.f32 %v724_v49, %v936_v0  ;;  %v255_v60 = vmul.f32 %v727_v50, %v936_v0  ;;  %v256_v61 = vmul.f32 %v728_v51, %v936_v0  ;;  %v859_v55 = vld [vmem:[%s931_s18 + $0x58] sm:$0xff]  }
  0x20   : > { %865 = vst [vmem:[%s968_s25 + $0x10] sm:$0xff] %v782_v54   ;;  %v292_v62 = vadd.f32 %v945_v9, %v253_v57  ;;  %v731_v63 = vunpack.c.l.bf16 %v854_v52  ;;  %v732_v1 = vunpack.c.h.bf16 %v854_v52  ;;  %v735_v2 = vunpack.c.l.bf16 %v855_v53 }
  0x21   : > { %866 = vst [vmem:[%s968_s25 + $0x18] sm:$0xff] %v787_v58   ;;  %v293_v3 = vadd.f32 %v945_v9, %v254_v59  ;;  %v294_v4 = vadd.f32 %v945_v9, %v255_v60  ;;  %v295_v5 = vadd.f32 %v945_v9, %v256_v61  ;;  %v736_v6 = vunpack.c.h.bf16 %v855_v53 }
  0x22   : > { %vm324_vm8 = vcmp.ge.f32.partialorder %v292_v62, 0.0  ;;  %v356_v7 = vmul.f32 0.2, %v292_v62  ;;  %v257_v8 = vmul.f32 %v731_v63, %v936_v0  ;;  %v258_v10 = vmul.f32 %v732_v1, %v936_v0  ;;  %v860_v1 = vld [vmem:[%s931_s18 + $0x60] sm:$0xff]  }
  0x23   : > { %vm325_vm9 = vcmp.ge.f32.partialorder %v293_v3, 0.0  ;;  %v357_v11 = vmul.f32 0.2, %v293_v3  ;;  %vm326_vm10 = vcmp.ge.f32.partialorder %v294_v4, 0.0  ;;  %vm327_vm11 = vcmp.ge.f32.partialorder %v295_v5, 0.0 }
  0x24   : > { %v388_v12 = vsel %vm324_vm8, %v292_v62, %v356_v7  ;;  %v358_v13 = vmul.f32 0.2, %v294_v4  ;;  %v359_v14 = vmul.f32 0.2, %v295_v5  ;;  %v296_v15 = vadd.f32 %v945_v9, %v257_v8 }
  0x25   : > { %v389_v16 = vsel %vm325_vm9, %v293_v3, %v357_v11  ;;  %v297_v17 = vadd.f32 %v945_v9, %v258_v10  ;;  %v259_v18 = vmul.f32 %v735_v2, %v936_v0  ;;  %v260_v19 = vmul.f32 %v736_v6, %v936_v0  ;;  %v861_v6 = vld [vmem:[%s931_s18 + $0x68] sm:$0xff]  }
  0x26   : > { %v792_v21 = vpack.c.bf16 %v389_v16, %v388_v12  ;;  %v390_v22 = vsel %vm326_vm10, %v294_v4, %v358_v13  ;;  %v391_v23 = vsel %vm327_vm11, %v295_v5, %v359_v14  ;;  %vm328_vm12 = vcmp.ge.f32.partialorder %v296_v15, 0.0 }
  0x27   : > { %v797_v25 = vpack.c.bf16 %v391_v23, %v390_v22  ;;  %vm329_vm13 = vcmp.ge.f32.partialorder %v297_v17, 0.0  ;;  %v360_v26 = vmul.f32 0.2, %v296_v15  ;;  %v361_v27 = vmul.f32 0.2, %v297_v17  ;;  %v862_v22 = vld [vmem:[%s931_s18 + $0x70] sm:$0xff]  }
  0x28   : > { %867 = vst [vmem:[%s968_s25 + $0x20] sm:$0xff] %v792_v21   ;;  %v298_v28 = vadd.f32 %v945_v9, %v259_v18  ;;  %v299_v29 = vadd.f32 %v945_v9, %v260_v19  ;;  %v739_v30 = vunpack.c.l.bf16 %v856_v20  ;;  %v740_v31 = vunpack.c.h.bf16 %v856_v20 }
  0x29   : > { %868 = vst [vmem:[%s968_s25 + $0x28] sm:$0xff] %v797_v25   ;;  %v392_v32 = vsel %vm328_vm12, %v296_v15, %v360_v26  ;;  %v393_v33 = vsel %vm329_vm13, %v297_v17, %v361_v27  ;;  %v743_v34 = vunpack.c.l.bf16 %v857_v24  ;;  %v744_v35 = vunpack.c.h.bf16 %v857_v24 }
  0x2a   : > { %v802_v37 = vpack.c.bf16 %v393_v33, %v392_v32  ;;  %vm330_vm14 = vcmp.ge.f32.partialorder %v298_v28, 0.0  ;;  %vm331_vm15 = vcmp.ge.f32.partialorder %v299_v29, 0.0  ;;  %v362_v38 = vmul.f32 0.2, %v298_v28 }
  0x2b   : > { %v363_v39 = vmul.f32 0.2, %v299_v29  ;;  %v261_v40 = vmul.f32 %v739_v30, %v936_v0  ;;  %v262_v41 = vmul.f32 %v740_v31, %v936_v0  ;;  %v263_v42 = vmul.f32 %v743_v34, %v936_v0 }
  0x2c   : > { %869 = vst [vmem:[%s968_s25 + $0x30] sm:$0xff] %v802_v37   ;;  %v394_v43 = vsel %vm330_vm14, %v298_v28, %v362_v38  ;;  %v264_v44 = vmul.f32 %v744_v35, %v936_v0  ;;  %v747_v45 = vunpack.c.l.bf16 %v858_v36  ;;  %v748_v46 = vunpack.c.h.bf16 %v858_v36 }
  0x2d   : > { %v395_v47 = vsel %vm331_vm15, %v299_v29, %v363_v39  ;;  %v300_v48 = vadd.f32 %v945_v9, %v261_v40  ;;  %v301_v49 = vadd.f32 %v945_v9, %v262_v41  ;;  %v302_v50 = vadd.f32 %v945_v9, %v263_v42  ;;  %v863_v41 = vld [vmem:[%s931_s18 + $0x78] sm:$0xff]  }
  0x2e   : > { %v807_v51 = vpack.c.bf16 %v395_v47, %v394_v43  ;;  %v303_v52 = vadd.f32 %v945_v9, %v264_v44  ;;  %v265_v53 = vmul.f32 %v747_v45, %v936_v0  ;;  %v266_v54 = vmul.f32 %v748_v46, %v936_v0 }
  0x2f   : > { %vm332_vm0 = vcmp.ge.f32.partialorder %v300_v48, 0.0  ;;  %vm333_vm1 = vcmp.ge.f32.partialorder %v301_v49, 0.0  ;;  %v364_v56 = vmul.f32 0.2, %v300_v48  ;;  %v365_v57 = vmul.f32 0.2, %v301_v49 }
  0x30   : > { %870 = vst [vmem:[%s968_s25 + $0x38] sm:$0xff] %v807_v51   ;;  %vm334_vm2 = vcmp.ge.f32.partialorder %v302_v50, 0.0  ;;  %vm335_vm3 = vcmp.ge.f32.partialorder %v303_v52, 0.0  ;;  %v366_v58 = vmul.f32 0.2, %v302_v50  ;;  %v304_v62 = vadd.f32 %v945_v9, %v265_v53 }
  0x31   : > { %v367_v59 = vmul.f32 0.2, %v303_v52  ;;  %v396_v60 = vsel %vm332_vm0, %v300_v48, %v364_v56  ;;  %v397_v61 = vsel %vm333_vm1, %v301_v49, %v365_v57  ;;  %v305_v63 = vadd.f32 %v945_v9, %v266_v54 }
  0x32   : > { %v812_v2 = vpack.c.bf16 %v397_v61, %v396_v60  ;;  %v398_v3 = vsel %vm334_vm2, %v302_v50, %v366_v58  ;;  %v751_v5 = vunpack.c.l.bf16 %v859_v55  ;;  %vm336_vm4 = vcmp.ge.f32.partialorder %v304_v62, 0.0 }
  0x33   : > { %v399_v4 = vsel %vm335_vm3, %v303_v52, %v367_v59  ;;  %vm337_vm5 = vcmp.ge.f32.partialorder %v305_v63, 0.0  ;;  %v368_v8 = vmul.f32 0.2, %v304_v62  ;;  %v369_v10 = vmul.f32 0.2, %v305_v63 }
  0x34   : > { %v817_v7 = vpack.c.bf16 %v399_v4, %v398_v3  ;;  %871 = vst [vmem:[%s968_s25 + $0x40] sm:$0xff] %v812_v2   ;;  %v752_v11 = vunpack.c.h.bf16 %v859_v55  ;;  %v267_v12 = vmul.f32 %v751_v5, %v936_v0  ;;  %v755_v13 = vunpack.c.l.bf16 %v860_v1 }
  0x35   : > { %v400_v14 = vsel %vm336_vm4, %v304_v62, %v368_v8  ;;  %v756_v15 = vunpack.c.h.bf16 %v860_v1  ;;  %v759_v16 = vunpack.c.l.bf16 %v861_v6  ;;  %v760_v17 = vunpack.c.h.bf16 %v861_v6 }
  0x36   : > { %872 = vst [vmem:[%s968_s25 + $0x48] sm:$0xff] %v817_v7   ;;  %v401_v18 = vsel %vm337_vm5, %v305_v63, %v369_v10  ;;  %v268_v19 = vmul.f32 %v752_v11, %v936_v0  ;;  %v306_v20 = vadd.f32 %v945_v9, %v267_v12  ;;  %v269_v21 = vmul.f32 %v755_v13, %v936_v0 }
  0x37   : > { %v822_v23 = vpack.c.bf16 %v401_v18, %v400_v14  ;;  %v270_v24 = vmul.f32 %v756_v15, %v936_v0  ;;  %v271_v25 = vmul.f32 %v759_v16, %v936_v0  ;;  %v272_v26 = vmul.f32 %v760_v17, %v936_v0 }
  0x38   : > { %v307_v27 = vadd.f32 %v945_v9, %v268_v19  ;;  %vm338_vm6 = vcmp.ge.f32.partialorder %v306_v20, 0.0  ;;  %v370_v28 = vmul.f32 0.2, %v306_v20  ;;  %v308_v29 = vadd.f32 %v945_v9, %v269_v21 }
  0x39   : > { %873 = vst [vmem:[%s968_s25 + $0x50] sm:$0xff] %v822_v23   ;;  %v309_v30 = vadd.f32 %v945_v9, %v270_v24  ;;  %v310_v31 = vadd.f32 %v945_v9, %v271_v25  ;;  %v311_v32 = vadd.f32 %v945_v9, %v272_v26  ;;  %v763_v33 = vunpack.c.l.bf16 %v862_v22 }
  0x3a   : > { %vm339_vm7 = vcmp.ge.f32.partialorder %v307_v27, 0.0  ;;  %v371_v34 = vmul.f32 0.2, %v307_v27  ;;  %v402_v35 = vsel %vm338_vm6, %v306_v20, %v370_v28  ;;  %vm340_vm8 = vcmp.ge.f32.partialorder %v308_v29, 0.0 }
  0x3b   : > { %vm341_vm9 = vcmp.ge.f32.partialorder %v309_v30, 0.0  ;;  %v372_v36 = vmul.f32 0.2, %v308_v29  ;;  %v373_v37 = vmul.f32 0.2, %v309_v30  ;;  %vm342_vm10 = vcmp.ge.f32.partialorder %v310_v31, 0.0 }
  0x3c   : > { %v403_v38 = vsel %vm339_vm7, %v307_v27, %v371_v34  ;;  %vm343_vm11 = vcmp.ge.f32.partialorder %v311_v32, 0.0  ;;  %v374_v39 = vmul.f32 0.2, %v310_v31  ;;  %v375_v40 = vmul.f32 0.2, %v311_v32 }
  0x3d   : > { %v827_v42 = vpack.c.bf16 %v403_v38, %v402_v35  ;;  %v404_v43 = vsel %vm340_vm8, %v308_v29, %v372_v36  ;;  %v405_v44 = vsel %vm341_vm9, %v309_v30, %v373_v37  ;;  %v764_v45 = vunpack.c.h.bf16 %v862_v22 }
  0x3e   : > { %v832_v46 = vpack.c.bf16 %v405_v44, %v404_v43  ;;  %v406_v47 = vsel %vm342_vm10, %v310_v31, %v374_v39  ;;  %v407_v48 = vsel %vm343_vm11, %v311_v32, %v375_v40  ;;  %v273_v49 = vmul.f32 %v763_v33, %v936_v0 }
  0x3f   : > { %874 = vst [vmem:[%s968_s25 + $0x58] sm:$0xff] %v827_v42   ;;  %v837_v50 = vpack.c.bf16 %v407_v48, %v406_v47  ;;  %v274_v51 = vmul.f32 %v764_v45, %v936_v0  ;;  %v767_v52 = vunpack.c.l.bf16 %v863_v41  ;;  %v768_v53 = vunpack.c.h.bf16 %v863_v41 }
  0x40   : > { %875 = vst [vmem:[%s968_s25 + $0x60] sm:$0xff] %v832_v46   ;;  %v312_v54 = vadd.f32 %v945_v9, %v273_v49 }
  0x41   : > { %876 = vst [vmem:[%s968_s25 + $0x68] sm:$0xff] %v837_v50   ;;  %v313_v55 = vadd.f32 %v945_v9, %v274_v51  ;;  %v275_v56 = vmul.f32 %v767_v52, %v936_v0  ;;  %v276_v57 = vmul.f32 %v768_v53, %v936_v0 }
  0x42   : > { %vm344_vm12 = vcmp.ge.f32.partialorder %v312_v54, 0.0  ;;  %v376_v58 = vmul.f32 0.2, %v312_v54 }
  0x43   : > { %vm345_vm13 = vcmp.ge.f32.partialorder %v313_v55, 0.0  ;;  %v377_v59 = vmul.f32 0.2, %v313_v55  ;;  %v314_v60 = vadd.f32 %v945_v9, %v275_v56  ;;  %v315_v61 = vadd.f32 %v945_v9, %v276_v57 }
  0x44   : > { %v408_v62 = vsel %vm344_vm12, %v312_v54, %v376_v58 }
  0x45   : > { %v409_v63 = vsel %vm345_vm13, %v313_v55, %v377_v59  ;;  %vm346_vm14 = vcmp.ge.f32.partialorder %v314_v60, 0.0  ;;  %vm347_vm15 = vcmp.ge.f32.partialorder %v315_v61, 0.0  ;;  %v378_v1 = vmul.f32 0.2, %v314_v60 }
  0x46   : > { %v842_v2 = vpack.c.bf16 %v409_v63, %v408_v62  ;;  %v379_v3 = vmul.f32 0.2, %v315_v61 }
  0x47   : > { %v410_v4 = vsel %vm346_vm14, %v314_v60, %v378_v1 }
  0x48   : > { %877 = vst [vmem:[%s968_s25 + $0x70] sm:$0xff] %v842_v2   ;;  %v411_v5 = vsel %vm347_vm15, %v315_v61, %v379_v3 }
  0x49   : > { %v847_v0 = vpack.c.bf16 %v411_v5, %v410_v4 }
  0x4b   : > { %878 = vst [vmem:[%s968_s25 + $0x78] sm:$0xff] %v847_v0  }
  0x4c PF: > { %s13_s12 = sadd.s32 1, %s893_s12  }
  0x4d   : > { %p10_p4 = scmp.ge.s32.totalorder %s13_s12, 4  }
  0x4f   :  { %12 = sbr.rel (!%p10_p4) target bundleno = 1 (0x1), region = 62 }

// kernel: net_a_forward.8
= control target key start
LH: loop header
LB: loop body
LE: loop exit
PB: predicated region body
PF: predicated region fallthrough
CT: control target
= control target key end

     0   :  { %s3447_s15 = smov 0   ;;  %s3449_s16 = smov 0   ;;  %s3814_s0 = inlined_call_operand.vmem [shape: bf16[4,512,32], index: 0, kind: input, shape index: {}]   ;;  %s3815_s1 = inlined_call_operand.vmem [shape: bf16[4,32,128], index: 1, kind: input, shape index: {}]   ;;  %s3816_s2 = inlined_call_operand.vmem [shape: bf16[512,128], index: 2, kind: output, shape index: {0}]   ;;  %s3817_s3 = inlined_call_operand.vmem [shape: f32[16,128], index: 3, kind: output, shape index: {1}]   ;;  %s3818_s4 = inlined_call_operand.vmem [shape: f32[16,128], index: 4, kind: output, shape index: {2}]  }
   0x1   :  { %s3451_s17 = smov 0  }
   0x2 LB: > { %s3463_s18 = sadd.s32 4294967295, %s3420_s17   ;;  %s3466_s19 = sadd.s32 1, %s3420_s17   ;;  %s3420_s17 = sphi %s3451_s17, %s3821_s17   ;;  %s3416_s16 = sphi %s3449_s16, %s3820_s16   ;;  %s3412_s15 = sphi %s3447_s15, %s3819_s15  }
   0x3   : > { %s19_s20 = ssub.s32 %s3420_s17, %s3466_s19  ;;  %s22_s21 = sadd.s32 1, %s3416_s16 }
   0x4   : > { %p20_p0 = scmp.eq.s32.totalorder %s19_s20, 0  ;;  %p29_p1 = scmp.ne.s32.totalorder %s3416_s16, %s3412_s15 }
   0x5   : > { %p30_p2 = scmp.eq.s32.totalorder %s3420_s17, 0  ;;  %p2574_p4 = scmp.ge.s32.totalorder %s3420_s17, 2 }
   0x6   : > { %s3475_s22 = scalar_select %p20_p0, %s3416_s16, %s22_s21  }
   0x7   : > { %p31_p3 = por %p30_p2, %p29_p1  ;;  %157 = sbr.rel (%p2574_p4) target bundleno = 50 (0x32), region = 20 }
   0xe   : > { %160 = sbr.rel (!%p31_p3) target bundleno = 50 (0x32), region = 24  ;;  %s162_s23 = sand.u32 (%p31_p3), 1, %s3416_s16  }
   0xf   : > { %s2862_s24 = sshll.u32 (%p31_p3), %s3420_s17, 7  ;;  %s2575_s25 = sshll.u32 (%p31_p3), %s162_s23, 9 }
  0x10   : > { %s3483_s28 = scalar_lea.vmem (%p31_p3), %s3814_s0, %s2862_s24  ;;  %s3488_s29 = scalar_lea.vmem (%p31_p3), [#allocation2], %s2575_s25 }
  0x11   : > { %v183_v0 = vld [vmem:[%s3483_s28] sm:$0xff] (%p31_p3)   ;;  %v187_v1 = vld [vmem:[%s3483_s28 + $0x8] sm:$0xff] (%p31_p3)   ;;  %v191_v2 = vld [vmem:[%s3483_s28 + $0x10] sm:$0xff] (%p31_p3)  }
  0x12   : > { %184 = vst [vmem:[%s3488_s29] sm:$0xff] (%p31_p3), %v183_v0   ;;  %188 = vst [vmem:[%s3488_s29 + $0x8] sm:$0xff] (%p31_p3), %v187_v1   ;;  %v195_v3 = vld [vmem:[%s3483_s28 + $0x18] sm:$0xff] (%p31_p3)   ;;  %v199_v4 = vld [vmem:[%s3483_s28 + $0x20] sm:$0xff] (%p31_p3)  }
  0x13   : > { %192 = vst [vmem:[%s3488_s29 + $0x10] sm:$0xff] (%p31_p3), %v191_v2   ;;  %v203_v5 = vld [vmem:[%s3483_s28 + $0x28] sm:$0xff] (%p31_p3)   ;;  %196 = vst [vmem:[%s3488_s29 + $0x18] sm:$0xff] (%p31_p3), %v195_v3   ;;  %v207_v6 = vld [vmem:[%s3483_s28 + $0x30] sm:$0xff] (%p31_p3)  }
  0x14   : > { %200 = vst [vmem:[%s3488_s29 + $0x20] sm:$0xff] (%p31_p3), %v199_v4   ;;  %204 = vst [vmem:[%s3488_s29 + $0x28] sm:$0xff] (%p31_p3), %v203_v5   ;;  %v211_v7 = vld [vmem:[%s3483_s28 + $0x38] sm:$0xff] (%p31_p3)   ;;  %v215_v8 = vld [vmem:[%s3483_s28 + $0x40] sm:$0xff] (%p31_p3)  }
  0x15   : > { %208 = vst [vmem:[%s3488_s29 + $0x30] sm:$0xff] %v207_v6   ;;  %212 = vst [vmem:[%s3488_s29 + $0x38] sm:$0xff] %v211_v7   ;;  %v219_v9 = vld [vmem:[%s3483_s28 + $0x48] sm:$0xff]   ;;  %v223_v10 = vld [vmem:[%s3483_s28 + $0x50] sm:$0xff]  }
  0x16   : > { %216 = vst [vmem:[%s3488_s29 + $0x40] sm:$0xff] %v215_v8   ;;  %v227_v11 = vld [vmem:[%s3483_s28 + $0x58] sm:$0xff]   ;;  %220 = vst [vmem:[%s3488_s29 + $0x48] sm:$0xff] %v219_v9   ;;  %v231_v12 = vld [vmem:[%s3483_s28 + $0x60] sm:$0xff]  }
  0x17   : > { %224 = vst [vmem:[%s3488_s29 + $0x50] sm:$0xff] %v223_v10   ;;  %228 = vst [vmem:[%s3488_s29 + $0x58] sm:$0xff] %v227_v11   ;;  %v235_v13 = vld [vmem:[%s3483_s28 + $0x68] sm:$0xff]   ;;  %v239_v14 = vld [vmem:[%s3483_s28 + $0x70] sm:$0xff]  }
  0x18   : > { %232 = vst [vmem:[%s3488_s29 + $0x60] sm:$0xff] %v231_v12   ;;  %236 = vst [vmem:[%s3488_s29 + $0x68] sm:$0xff] %v235_v13   ;;  %v243_v15 = vld [vmem:[%s3483_s28 + $0x78] sm:$0xff]   ;;  %v247_v16 = vld [vmem:[%s3483_s28 + $0x100] sm:$0xff]  }
  0x19   : > { %240 = vst [vmem:[%s3488_s29 + $0x70] sm:$0xff] %v239_v14   ;;  %v251_v17 = vld [vmem:[%s3483_s28 + $0x108] sm:$0xff]   ;;  %244 = vst [vmem:[%s3488_s29 + $0x78] sm:$0xff] %v243_v15   ;;  %v255_v18 = vld [vmem:[%s3483_s28 + $0x110] sm:$0xff]  }
  0x1a   : > { %248 = vst [vmem:[%s3488_s29 + $0x80] sm:$0xff] %v247_v16   ;;  %252 = vst [vmem:[%s3488_s29 + $0x88] sm:$0xff] %v251_v17   ;;  %v259_v19 = vld [vmem:[%s3483_s28 + $0x118] sm:$0xff]   ;;  %v263_v20 = vld [vmem:[%s3483_s28 + $0x120] sm:$0xff]  }
  0x1b   : > { %256 = vst [vmem:[%s3488_s29 + $0x90] sm:$0xff] %v255_v18   ;;  %260 = vst [vmem:[%s3488_s29 + $0x98] sm:$0xff] %v259_v19   ;;  %v267_v21 = vld [vmem:[%s3483_s28 + $0x128] sm:$0xff]   ;;  %v271_v22 = vld [vmem:[%s3483_s28 + $0x130] sm:$0xff]  }
  0x1c   : > { %264 = vst [vmem:[%s3488_s29 + $0xa0] sm:$0xff] %v263_v20   ;;  %v275_v23 = vld [vmem:[%s3483_s28 + $0x138] sm:$0xff]   ;;  %268 = vst [vmem:[%s3488_s29 + $0xa8] sm:$0xff] %v267_v21   ;;  %v279_v24 = vld [vmem:[%s3483_s28 + $0x140] sm:$0xff]  }
  0x1d   : > { %272 = vst [vmem:[%s3488_s29 + $0xb0] sm:$0xff] %v271_v22   ;;  %276 = vst [vmem:[%s3488_s29 + $0xb8] sm:$0xff] %v275_v23   ;;  %v283_v25 = vld [vmem:[%s3483_s28 + $0x148] sm:$0xff]   ;;  %v287_v26 = vld [vmem:[%s3483_s28 + $0x150] sm:$0xff]  }
  0x1e   : > { %280 = vst [vmem:[%s3488_s29 + $0xc0] sm:$0xff] %v279_v24   ;;  %284 = vst [vmem:[%s3488_s29 + $0xc8] sm:$0xff] %v283_v25   ;;  %v291_v27 = vld [vmem:[%s3483_s28 + $0x158] sm:$0xff]   ;;  %v295_v28 = vld [vmem:[%s3483_s28 + $0x160] sm:$0xff]  }
  0x1f   : > { %288 = vst [vmem:[%s3488_s29 + $0xd0] sm:$0xff] %v287_v26   ;;  %v299_v29 = vld [vmem:[%s3483_s28 + $0x168] sm:$0xff]   ;;  %292 = vst [vmem:[%s3488_s29 + $0xd8] sm:$0xff] %v291_v27   ;;  %v303_v30 = vld [vmem:[%s3483_s28 + $0x170] sm:$0xff]  }
  0x20   : > { %296 = vst [vmem:[%s3488_s29 + $0xe0] sm:$0xff] %v295_v28   ;;  %300 = vst [vmem:[%s3488_s29 + $0xe8] sm:$0xff] %v299_v29   ;;  %v307_v31 = vld [vmem:[%s3483_s28 + $0x178] sm:$0xff]   ;;  %v311_v32 = vld [vmem:[%s3483_s28 + $0x200] sm:$0xff]  }
  0x21   : > { %304 = vst [vmem:[%s3488_s29 + $0xf0] sm:$0xff] %v303_v30   ;;  %308 = vst [vmem:[%s3488_s29 + $0xf8] sm:$0xff] %v307_v31   ;;  %v315_v33 = vld [vmem:[%s3483_s28 + $0x208] sm:$0xff]   ;;  %v319_v34 = vld [vmem:[%s3483_s28 + $0x210] sm:$0xff]  }
  0x22   : > { %312 = vst [vmem:[%s3488_s29 + $0x100] sm:$0xff] %v311_v32   ;;  %v323_v35 = vld [vmem:[%s3483_s28 + $0x218] sm:$0xff]   ;;  %316 = vst [vmem:[%s3488_s29 + $0x108] sm:$0xff] %v315_v33   ;;  %v327_v36 = vld [vmem:[%s3483_s28 + $0x220] sm:$0xff]  }
  0x23   : > { %320 = vst [vmem:[%s3488_s29 + $0x110] sm:$0xff] %v319_v34   ;;  %324 = vst [vmem:[%s3488_s29 + $0x118] sm:$0xff] %v323_v35   ;;  %v331_v37 = vld [vmem:[%s3483_s28 + $0x228] sm:$0xff]   ;;  %v335_v38 = vld [vmem:[%s3483_s28 + $0x230] sm:$0xff]  }
  0x24   : > { %328 = vst [vmem:[%s3488_s29 + $0x120] sm:$0xff] %v327_v36   ;;  %332 = vst [vmem:[%s3488_s29 + $0x128] sm:$0xff] %v331_v37   ;;  %v339_v39 = vld [vmem:[%s3483_s28 + $0x238] sm:$0xff]   ;;  %v343_v40 = vld [vmem:[%s3483_s28 + $0x240] sm:$0xff]  }
  0x25   : > { %336 = vst [vmem:[%s3488_s29 + $0x130] sm:$0xff] %v335_v38   ;;  %v347_v41 = vld [vmem:[%s3483_s28 + $0x248] sm:$0xff]   ;;  %340 = vst [vmem:[%s3488_s29 + $0x138] sm:$0xff] %v339_v39   ;;  %v351_v42 = vld [vmem:[%s3483_s28 + $0x250] sm:$0xff]  }
  0x26   : > { %344 = vst [vmem:[%s3488_s29 + $0x140] sm:$0xff] %v343_v40   ;;  %348 = vst [vmem:[%s3488_s29 + $0x148] sm:$0xff] %v347_v41   ;;  %v355_v43 = vld [vmem:[%s3483_s28 + $0x258] sm:$0xff]   ;;  %v359_v44 = vld [vmem:[%s3483_s28 + $0x260] sm:$0xff]  }
  0x27   : > { %352 = vst [vmem:[%s3488_s29 + $0x150] sm:$0xff] %v351_v42   ;;  %356 = vst [vmem:[%s3488_s29 + $0x158] sm:$0xff] %v355_v43   ;;  %v363_v45 = vld [vmem:[%s3483_s28 + $0x268] sm:$0xff]   ;;  %v367_v46 = vld [vmem:[%s3483_s28 + $0x270] sm:$0xff]  }
  0x28   : > { %360 = vst [vmem:[%s3488_s29 + $0x160] sm:$0xff] %v359_v44   ;;  %v371_v47 = vld [vmem:[%s3483_s28 + $0x278] sm:$0xff]   ;;  %364 = vst [vmem:[%s3488_s29 + $0x168] sm:$0xff] %v363_v45   ;;  %v375_v48 = vld [vmem:[%s3483_s28 + $0x300] sm:$0xff]  }
  0x29   : > { %368 = vst [vmem:[%s3488_s29 + $0x170] sm:$0xff] %v367_v46   ;;  %372 = vst [vmem:[%s3488_s29 + $0x178] sm:$0xff] %v371_v47   ;;  %v379_v49 = vld [vmem:[%s3483_s28 + $0x308] sm:$0xff]   ;;  %v383_v50 = vld [vmem:[%s3483_s28 + $0x310] sm:$0xff]  }
  0x2a   : > { %376 = vst [vmem:[%s3488_s29 + $0x180] sm:$0xff] %v375_v48   ;;  %380 = vst [vmem:[%s3488_s29 + $0x188] sm:$0xff] %v379_v49   ;;  %v387_v51 = vld [vmem:[%s3483_s28 + $0x318] sm:$0xff]   ;;  %v391_v52 = vld [vmem:[%s3483_s28 + $0x320] sm:$0xff]  }
  0x2b   : > { %384 = vst [vmem:[%s3488_s29 + $0x190] sm:$0xff] %v383_v50   ;;  %v395_v53 = vld [vmem:[%s3483_s28 + $0x328] sm:$0xff]   ;;  %388 = vst [vmem:[%s3488_s29 + $0x198] sm:$0xff] %v387_v51   ;;  %v399_v54 = vld [vmem:[%s3483_s28 + $0x330] sm:$0xff]  }
  0x2c   : > { %392 = vst [vmem:[%s3488_s29 + $0x1a0] sm:$0xff] %v391_v52   ;;  %396 = vst [vmem:[%s3488_s29 + $0x1a8] sm:$0xff] %v395_v53   ;;  %v403_v55 = vld [vmem:[%s3483_s28 + $0x338] sm:$0xff]   ;;  %v407_v56 = vld [vmem:[%s3483_s28 + $0x340] sm:$0xff]  }
  0x2d   : > { %400 = vst [vmem:[%s3488_s29 + $0x1b0] sm:$0xff] %v399_v54   ;;  %404 = vst [vmem:[%s3488_s29 + $0x1b8] sm:$0xff] %v403_v55   ;;  %v411_v57 = vld [vmem:[%s3483_s28 + $0x348] sm:$0xff]   ;;  %v415_v58 = vld [vmem:[%s3483_s28 + $0x350] sm:$0xff]  }
  0x2e   : > { %408 = vst [vmem:[%s3488_s29 + $0x1c0] sm:$0xff] %v407_v56   ;;  %v419_v59 = vld [vmem:[%s3483_s28 + $0x358] sm:$0xff]   ;;  %412 = vst [vmem:[%s3488_s29 + $0x1c8] sm:$0xff] %v411_v57   ;;  %v423_v60 = vld [vmem:[%s3483_s28 + $0x360] sm:$0xff]  }
  0x2f   : > { %416 = vst [vmem:[%s3488_s29 + $0x1d0] sm:$0xff] %v415_v58   ;;  %420 = vst [vmem:[%s3488_s29 + $0x1d8] sm:$0xff] %v419_v59   ;;  %v427_v61 = vld [vmem:[%s3483_s28 + $0x368] sm:$0xff]   ;;  %v431_v62 = vld [vmem:[%s3483_s28 + $0x370] sm:$0xff]  }
  0x30   : > { %424 = vst [vmem:[%s3488_s29 + $0x1e0] sm:$0xff] %v423_v60   ;;  %428 = vst [vmem:[%s3488_s29 + $0x1e8] sm:$0xff] %v427_v61   ;;  %v435_v63 = vld [vmem:[%s3483_s28 + $0x378] sm:$0xff]  }
  0x31   : > { %432 = vst [vmem:[%s3488_s29 + $0x1f0] sm:$0xff] %v431_v62   ;;  %436 = vst [vmem:[%s3488_s29 + $0x1f8] sm:$0xff] %v435_v63  }
  0x32 PF: > { %p2578_p5 = scmp.ge.s32.totalorder %s3420_s17, 1  ;;  %p716_p6 = scmp.lt.s32.totalorder %s3420_s17, 3 }
  0x34   : > { %p717_p7 = pnand %p2578_p5, %p716_p6 }
  0x35   : > { %v3326_v0 = vld [vmem:[%s3815_s1 + $0x10] sm:$0xff] (!%p717_p7)   ;;  %s723_s6 = sand.u32 (!%p717_p7), 1, %s3412_s15   ;;  %v3327_v1 = vld [vmem:[%s3815_s1 + $0x20] sm:$0xff] (!%p717_p7)   ;;  %v3328_v2 = vld [vmem:[%s3815_s1 + $0x18] sm:$0xff] (!%p717_p7)   ;;  %vm938_vm0 = vcmask (!%p717_p7), 261120   ;;  %s2580_s27 = sshll.u32 (!%p717_p7), %s3463_s18, 5 }
  0x36   : > { %720 = sbr.rel (%p717_p7) target bundleno = 408 (0x198), region = 65  ;;  %s2579_s9 = sshll.u32 (!%p717_p7), %s723_s6, 9  ;;  %3062 = vmatprep.subr.bf16.mxu1 (!%p717_p7), %v3326_v0  ;;  %3134 = vmatprep.subr.bf16.mxu0 (!%p717_p7), %v3327_v1  ;;  %v3329_v3 = vld [vmem:[%s3815_s1 + $0x28] sm:$0xff] (!%p717_p7)   ;;  %v3333_v7 = vld [vmem:[%s3815_s1] sm:$0xff] (!%p717_p7)   ;;  %v3335_v9 = vld [vmem:[%s3815_s1 + $0x30] sm:$0xff] (!%p717_p7)  }
  0x37   : > { %3063 = vmatpush3.bf16.msra.mxu1 (!%p717_p7), %v3326_v0  ;;  %3135 = vmatpush3.bf16.msra.mxu0 (!%p717_p7), %v3327_v1  ;;  %s3630_s14 = scalar_lea.vmem (!%p717_p7), [#allocation2], %s2579_s9  ;;  %v3351_v20 = vld [vmem:[%s3815_s1 + $0x8] sm:$0xff] (!%p717_p7)   ;;  %v3353_v21 = vld [vmem:[%s3815_s1 + $0x38] sm:$0xff] (!%p717_p7)   ;;  %p758_p8 = scmp.lt.s32.totalorder (!%p717_p7), %s2580_s27, 63 }
  0x38   : > { %3064 = vmatprep.subr.bf16.mxu1 (!%p717_p7), %v3328_v2  ;;  %v3330_v4 = vld [vmem:[%s3630_s14 + $0x80] sm:$0xff] (!%p717_p7)   ;;  %3136 = vmatprep.subr.bf16.mxu0 (!%p717_p7), %v3329_v3  ;;  %v3332_v6 = vld [vmem:[%s3630_s14 + $0x88] sm:$0xff] (!%p717_p7)   ;;  %v3336_v10 = vld [vmem:[%s3630_s14 + $0x90] sm:$0xff] (!%p717_p7)   ;;  %p763_p9 = scmp.lt.s32.totalorder (!%p717_p7), %s3463_s18, 1 }
  0x39   : > { %v3331_v5 = vld [vmem:[%s3630_s14 + $0x100] sm:$0xff] (!%p717_p7)   ;;  %3066 = vmatprep.mubr.msk.bf16.mxu1 (!%p717_p7), %vm938_vm0, %v3330_v4  ;;  %v3334_v8 = vld [vmem:[%s3630_s14 + $0x108] sm:$0xff] (!%p717_p7)   ;;  %v3337_v11 = vld [vmem:[%s3630_s14 + $0x110] sm:$0xff] (!%p717_p7)  }
  0x3a   : > { %3138 = vmatprep.mubr.msk.bf16.mxu0 (!%p717_p7), %vm938_vm0, %v3331_v5  ;;  %v3338_v12 = vld [vmem:[%s3630_s14 + $0x98] sm:$0xff] (!%p717_p7)   ;;  %v3340_v14 = vld [vmem:[%s3630_s14 + $0xa0] sm:$0xff] (!%p717_p7)   ;;  %v3342_v16 = vld [vmem:[%s3630_s14 + $0xa8] sm:$0xff] (!%p717_p7)  }
  0x3b   : > { %3065 = vmatpush3.bf16.msra.mxu1 (!%p717_p7), %v3328_v2  ;;  %3137 = vmatpush3.bf16.msra.mxu0 (!%p717_p7), %v3329_v3  ;;  %v3339_v13 = vld [vmem:[%s3630_s14 + $0x118] sm:$0xff] (!%p717_p7)   ;;  %v3341_v15 = vld [vmem:[%s3630_s14 + $0x120] sm:$0xff] (!%p717_p7)   ;;  %v3343_v17 = vld [vmem:[%s3630_s14 + $0x128] sm:$0xff] (!%p717_p7)  }
  0x3c   : > { %3098 = vmatprep.subr.bf16.mxu1 (!%p717_p7), %v3333_v7  ;;  %3170 = vmatprep.subr.bf16.mxu0 (!%p717_p7), %v3335_v9  ;;  %v3344_v18 = vld [vmem:[%s3630_s14 + $0xb0] sm:$0xff] (!%p717_p7)   ;;  %v3346_v22 = vld [vmem:[%s3630_s14 + $0xb8] sm:$0xff] (!%p717_p7)   ;;  %v3348_v24 = vld [vmem:[%s3630_s14 + $0xc0] sm:$0xff] (!%p717_p7)  }
  0x3d   : > { %v3345_v19 = vld [vmem:[%s3630_s14 + $0x130] sm:$0xff]   ;;  %v3347_v23 = vld [vmem:[%s3630_s14 + $0x138] sm:$0xff]   ;;  %v3349_v25 = vld [vmem:[%s3630_s14 + $0x140] sm:$0xff]   ;;  %s3823_s27 = smov (!%p758_p8, %s2580_s27), 63  ;;  %s3825_s18 = smov (!%p763_p9, %s3463_s18), 1 }
  0x3e   : > { %3067 = vmatmul.mubr.msk.bf16.vlgmr.msra.gmra.mrb[0].mxu1 %vm938_vm0, %v3332_v6  ;;  %3139 = vmatmul.mubr.msk.bf16.vlgmr.msra.gmra.mrb[0].mxu0 %vm938_vm0, %v3334_v8  ;;  %v3350_v26 = vld [vmem:[%s3630_s14 + $0xc8] sm:$0xff]   ;;  %v3354_v28 = vld [vmem:[%s3630_s14 + $0xd0] sm:$0xff]   ;;  %v3356_v30 = vld [vmem:[%s3630_s14 + $0xd8] sm:$0xff]   ;;  %s2581_s28 = sshll.u32 %s3823_s27, 2  ;;  %s2582_s6 = sshll.u32 %s3825_s18, 3 }
  0x3f   : > { %3099 = vmatpush3.bf16.msra.mxu1 %v3333_v7  ;;  %3171 = vmatpush3.bf16.msra.mxu0 %v3335_v9  ;;  %v3352_v27 = vld [vmem:[%s3630_s14 + $0x148] sm:$0xff]   ;;  %v3355_v29 = vld [vmem:[%s3630_s14 + $0x150] sm:$0xff]   ;;  %v3357_v31 = vld [vmem:[%s3630_s14 + $0x158] sm:$0xff]   ;;  %s3776_s5 = scalar_lea.vmem %s3816_s2, %s2581_s28  ;;  %s766_s9 = scalar_lea.vmem %s3817_s3, %s2582_s6 }
  0x40   : > { %3070 = vmatprep.mubr.msk.bf16.mxu1 %vm938_vm0, %v3336_v10  ;;  %3142 = vmatprep.mubr.msk.bf16.mxu0 %vm938_vm0, %v3337_v11  ;;  %v3358_v32 = vld [vmem:[%s3630_s14 + $0xe0] sm:$0xff]   ;;  %v3360_v34 = vld [vmem:[%s3630_s14 + $0xe8] sm:$0xff]   ;;  %v3362_v36 = vld [vmem:[%s3630_s14 + $0xf0] sm:$0xff]   ;;  %s770_s12 = scalar_lea.vmem %s3818_s4, %s2582_s6 }
  0x41   : > { %3100 = vmatprep.subr.bf16.mxu1 %v3351_v20  ;;  %3172 = vmatprep.subr.bf16.mxu0 %v3353_v21  ;;  %v3359_v33 = vld [vmem:[%s3630_s14 + $0x160] sm:$0xff]   ;;  %v3361_v35 = vld [vmem:[%s3630_s14 + $0x168] sm:$0xff]   ;;  %v3363_v37 = vld [vmem:[%s3630_s14 + $0x170] sm:$0xff]  }
  0x42   : > { %v3364_v38 = vld [vmem:[%s3630_s14 + $0xf8] sm:$0xff]   ;;  %v3366_v40 = vld [vmem:[%s3630_s14] sm:$0xff]   ;;  %v3368_v42 = vld [vmem:[%s3630_s14 + $0x8] sm:$0xff]  }
  0x43   : > { %3101 = vmatpush3.bf16.msra.mxu1 %v3351_v20  ;;  %3173 = vmatpush3.bf16.msra.mxu0 %v3353_v21  ;;  %v3365_v39 = vld [vmem:[%s3630_s14 + $0x178] sm:$0xff]   ;;  %v3367_v41 = vld [vmem:[%s3630_s14 + $0x180] sm:$0xff]   ;;  %v3369_v43 = vld [vmem:[%s3630_s14 + $0x188] sm:$0xff]  }
  0x44   : > { %v3370_v44 = vld [vmem:[%s3630_s14 + $0x10] sm:$0xff]   ;;  %v3372_v46 = vld [vmem:[%s3630_s14 + $0x18] sm:$0xff]   ;;  %v3374_v48 = vld [vmem:[%s3630_s14 + $0x20] sm:$0xff]  }
  0x45   : > { %v3371_v45 = vld [vmem:[%s3630_s14 + $0x190] sm:$0xff]   ;;  %v3373_v47 = vld [vmem:[%s3630_s14 + $0x198] sm:$0xff]   ;;  %v3375_v49 = vld [vmem:[%s3630_s14 + $0x1a0] sm:$0xff]  }
  0x46   : > { %3071 = vmatmul.mubr.msk.bf16.gmra.mrb[4].mxu1 %vm938_vm0, %v3338_v12  ;;  %3143 = vmatmul.mubr.msk.bf16.gmra.mrb[4].mxu0 %vm938_vm0, %v3339_v13  ;;  %v3376_v50 = vld [vmem:[%s3630_s14 + $0x28] sm:$0xff]   ;;  %v3378_v52 = vld [vmem:[%s3630_s14 + $0x30] sm:$0xff]   ;;  %v3380_v54 = vld [vmem:[%s3630_s14 + $0x38] sm:$0xff]  }
  0x47   : > { %3074 = vmatprep.mubr.msk.bf16.mxu1 %vm938_vm0, %v3340_v14  ;;  %3146 = vmatprep.mubr.msk.bf16.mxu0 %vm938_vm0, %v3341_v15  ;;  %v3377_v51 = vld [vmem:[%s3630_s14 + $0x1a8] sm:$0xff]   ;;  %v3379_v53 = vld [vmem:[%s3630_s14 + $0x1b0] sm:$0xff]   ;;  %v3381_v55 = vld [vmem:[%s3630_s14 + $0x1b8] sm:$0xff]  }
  0x48   : > { %v3382_v56 = vld [vmem:[%s3630_s14 + $0x40] sm:$0xff]   ;;  %v3384_v58 = vld [vmem:[%s3630_s14 + $0x48] sm:$0xff]   ;;  %v3386_v60 = vld [vmem:[%s3630_s14 + $0x50] sm:$0xff]  }
  0x49   : > { %v3383_v57 = vld [vmem:[%s3630_s14 + $0x1c0] sm:$0xff]   ;;  %v3385_v59 = vld [vmem:[%s3630_s14 + $0x1c8] sm:$0xff]   ;;  %v3387_v61 = vld [vmem:[%s3630_s14 + $0x1d0] sm:$0xff]  }
  0x4a   : > { %v3388_v62 = vld [vmem:[%s3630_s14 + $0x58] sm:$0xff]   ;;  %v3390_v0 = vld [vmem:[%s3630_s14 + $0x60] sm:$0xff]   ;;  %v3392_v2 = vld [vmem:[%s3630_s14 + $0x68] sm:$0xff]  }
  0x4b   : > { %v3389_v63 = vld [vmem:[%s3630_s14 + $0x1d8] sm:$0xff]   ;;  %v3391_v1 = vld [vmem:[%s3630_s14 + $0x1e0] sm:$0xff]   ;;  %v3393_v3 = vld [vmem:[%s3630_s14 + $0x1e8] sm:$0xff]  }
  0x4c   : > { %v3394_v4 = vld [vmem:[%s3630_s14 + $0x70] sm:$0xff]   ;;  %v3396_v6 = vld [vmem:[%s3630_s14 + $0x78] sm:$0xff]  }
  0x4d   : > { %v3395_v5 = vld [vmem:[%s3630_s14 + $0x1f0] sm:$0xff]   ;;  %v3397_v7 = vld [vmem:[%s3630_s14 + $0x1f8] sm:$0xff]  }
  0x4e   : > { %3075 = vmatmul.mubr.msk.bf16.gmra.mrb[8].mxu1 %vm938_vm0, %v3342_v16  ;;  %3147 = vmatmul.mubr.msk.bf16.gmra.mrb[8].mxu0 %vm938_vm0, %v3343_v17 }
  0x4f   : > { %3078 = vmatprep.mubr.msk.bf16.mxu1 %vm938_vm0, %v3344_v18  ;;  %3150 = vmatprep.mubr.msk.bf16.mxu0 %vm938_vm0, %v3345_v19 }
  0x56   : > { %3079 = vmatmul.mubr.msk.bf16.gmra.mrb[12].mxu1 %vm938_vm0, %v3346_v22  ;;  %3151 = vmatmul.mubr.msk.bf16.gmra.mrb[12].mxu0 %vm938_vm0, %v3347_v23 }
  0x57   : > { %3082 = vmatprep.mubr.msk.bf16.mxu1 %vm938_vm0, %v3348_v24  ;;  %3154 = vmatprep.mubr.msk.bf16.mxu0 %vm938_vm0, %v3349_v25 }
  0x5e   : > { %3083 = vmatmul.mubr.msk.bf16.gmra.mrb[16].mxu1 %vm938_vm0, %v3350_v26  ;;  %3155 = vmatmul.mubr.msk.bf16.gmra.mrb[16].mxu0 %vm938_vm0, %v3352_v27 }
  0x5f   : > { %3086 = vmatprep.mubr.msk.bf16.mxu1 %vm938_vm0, %v3354_v28  ;;  %3158 = vmatprep.mubr.msk.bf16.mxu0 %vm938_vm0, %v3355_v29 }
  0x66   : > { %3087 = vmatmul.mubr.msk.bf16.gmra.mrb[20].mxu1 %vm938_vm0, %v3356_v30  ;;  %3159 = vmatmul.mubr.msk.bf16.gmra.mrb[20].mxu0 %vm938_vm0, %v3357_v31 }
  0x67   : > { %3090 = vmatprep.mubr.msk.bf16.mxu1 %vm938_vm0, %v3358_v32  ;;  %3162 = vmatprep.mubr.msk.bf16.mxu0 %vm938_vm0, %v3359_v33 }
  0x6e   : > { %3091 = vmatmul.mubr.msk.bf16.gmra.mrb[24].mxu1 %vm938_vm0, %v3360_v34  ;;  %3163 = vmatmul.mubr.msk.bf16.gmra.mrb[24].mxu0 %vm938_vm0, %v3361_v35 }
  0x6f   : > { %3094 = vmatprep.mubr.msk.bf16.mxu1 %vm938_vm0, %v3362_v36  ;;  %3166 = vmatprep.mubr.msk.bf16.mxu0 %vm938_vm0, %v3363_v37 }
  0x76   : > { %3095 = vmatmul.mubr.msk.bf16.gmra.mrb[28].mxu1 %vm938_vm0, %v3364_v38  ;;  %3167 = vmatmul.mubr.msk.bf16.gmra.mrb[28].mxu0 %vm938_vm0, %v3365_v39 }
  0x77   : > { %3102 = vmatprep.mubr.msk.bf16.mxu1 %vm938_vm0, %v3366_v40  ;;  %3174 = vmatprep.mubr.msk.bf16.mxu0 %vm938_vm0, %v3367_v41 }
  0x7e   : > { %3103 = vmatmul.mubr.msk.bf16.vlgmr.msra.gmra.mrb[0].mxu1 %vm938_vm0, %v3368_v42  ;;  %3175 = vmatmul.mubr.msk.bf16.vlgmr.msra.gmra.mrb[0].mxu0 %vm938_vm0, %v3369_v43 }
  0x7f   : > { %3106 = vmatprep.mubr.msk.bf16.mxu1 %vm938_vm0, %v3370_v44  ;;  %3178 = vmatprep.mubr.msk.bf16.mxu0 %vm938_vm0, %v3371_v45 }
  0x86   : > { %3107 = vmatmul.mubr.msk.bf16.gmra.mrb[4].mxu1 %vm938_vm0, %v3372_v46  ;;  %3179 = vmatmul.mubr.msk.bf16.gmra.mrb[4].mxu0 %vm938_vm0, %v3373_v47 }
  0x87   : > { %3110 = vmatprep.mubr.msk.bf16.mxu1 %vm938_vm0, %v3374_v48  ;;  %3182 = vmatprep.mubr.msk.bf16.mxu0 %vm938_vm0, %v3375_v49 }
  0x8e   : > { %3111 = vmatmul.mubr.msk.bf16.gmra.mrb[8].mxu1 %vm938_vm0, %v3376_v50  ;;  %3183 = vmatmul.mubr.msk.bf16.gmra.mrb[8].mxu0 %vm938_vm0, %v3377_v51 }
  0x8f   : > { %3114 = vmatprep.mubr.msk.bf16.mxu1 %vm938_vm0, %v3378_v52  ;;  %3186 = vmatprep.mubr.msk.bf16.mxu0 %vm938_vm0, %v3379_v53 }
  0x96   : > { %3115 = vmatmul.mubr.msk.bf16.gmra.mrb[12].mxu1 %vm938_vm0, %v3380_v54  ;;  %3187 = vmatmul.mubr.msk.bf16.gmra.mrb[12].mxu0 %vm938_vm0, %v3381_v55 }
  0x97   : > { %3118 = vmatprep.mubr.msk.bf16.mxu1 %vm938_vm0, %v3382_v56  ;;  %3190 = vmatprep.mubr.msk.bf16.mxu0 %vm938_vm0, %v3383_v57 }
  0x9e   : > { %3119 = vmatmul.mubr.msk.bf16.gmra.mrb[16].mxu1 %vm938_vm0, %v3384_v58  ;;  %3191 = vmatmul.mubr.msk.bf16.gmra.mrb[16].mxu0 %vm938_vm0, %v3385_v59 }
  0x9f   : > { %3122 = vmatprep.mubr.msk.bf16.mxu1 %vm938_vm0, %v3386_v60  ;;  %3194 = vmatprep.mubr.msk.bf16.mxu0 %vm938_vm0, %v3387_v61 }
  0xa6   : > { %3123 = vmatmul.mubr.msk.bf16.gmra.mrb[20].mxu1 %vm938_vm0, %v3388_v62  ;;  %3195 = vmatmul.mubr.msk.bf16.gmra.mrb[20].mxu0 %vm938_vm0, %v3389_v63 }
  0xa7   : > { %3126 = vmatprep.mubr.msk.bf16.mxu1 %vm938_vm0, %v3390_v0  ;;  %3198 = vmatprep.mubr.msk.bf16.mxu0 %vm938_vm0, %v3391_v1 }
  0xae   : > { %3127 = vmatmul.mubr.msk.bf16.gmra.mrb[24].mxu1 %vm938_vm0, %v3392_v2  ;;  %3199 = vmatmul.mubr.msk.bf16.gmra.mrb[24].mxu0 %vm938_vm0, %v3393_v3 }
  0xaf   : > { %3130 = vmatprep.mubr.msk.bf16.mxu1 %vm938_vm0, %v3394_v4  ;;  %3202 = vmatprep.mubr.msk.bf16.mxu0 %vm938_vm0, %v3395_v5 }
  0xb6   : > { %3131 = vmatmul.mubr.msk.bf16.gmra.mrb[28].mxu1 %vm938_vm0, %v3396_v6  ;;  %3203 = vmatmul.mubr.msk.bf16.gmra.mrb[28].mxu0 %vm938_vm0, %v3397_v7 }
 0x151   : > { %v3104_v8 = vpop.f32.mrb[0].mxu1  ;;  %v3176_v9 = vpop.f32.mrb[0].mxu0 }
 0x152   : > { %v1322_v10 = vpop.f32.mrb[1].mxu1  ;;  %v3206_v11 = vadd.f32 %v3176_v9, %v3104_v8  ;;  %v2032_v12 = vpop.f32.mrb[1].mxu0 }
 0x153   : > { %v3105_v13 = vpop.f32.mrb[2].mxu1  ;;  %v3207_v14 = vadd.f32 %v2032_v12, %v1322_v10  ;;  %v3177_v15 = vpop.f32.mrb[2].mxu0 }
 0x154   : > { %v1325_v16 = vpop.f32.mrb[3].mxu1  ;;  %v3208_v17 = vadd.f32 %v3177_v15, %v3105_v13  ;;  %v2035_v18 = vpop.f32.mrb[3].mxu0  ;;  %v2225_v26 = vmul.f32 %v3206_v11, %v3206_v11 }
 0x155   : > { %v3209_v19 = vadd.f32 %v2035_v18, %v1325_v16  ;;  %v2223_v21 = vmul.f32 %v3207_v14, %v3207_v14 }
 0x156   : > { %v2903_v20 = vpack.c.bf16 %v3208_v17, %v3206_v11  ;;  %v2226_v34 = vmul.f32 %v3208_v17, %v3208_v17 }
 0x157   : > { %v2191_v22 = vadd.f32 %v3209_v19, %v3207_v14  ;;  %v2224_v23 = vmul.f32 %v3209_v19, %v3209_v19  ;;  %v2898_v24 = vpack.c.bf16 %v3209_v19, %v3207_v14 }
 0x158   : > { %2975 = vst [vmem:[%s3776_s5 + $0x8] sm:$0xff] %v2903_v20  }
 0x159   : > { %v3108_v25 = vpop.f32.mrb[4].mxu1  ;;  %v2192_v27 = vadd.f32 %v3206_v11, %v2191_v22  ;;  %v2255_v28 = vadd.f32 %v2224_v23, %v2223_v21  ;;  %2899 = vst [vmem:[%s3776_s5] sm:$0xff] %v2898_v24   ;;  %v3180_v29 = vpop.f32.mrb[4].mxu0 }
 0x15a   : > { %v1338_v30 = vpop.f32.mrb[5].mxu1  ;;  %v3210_v31 = vadd.f32 %v3180_v29, %v3108_v25  ;;  %v2048_v32 = vpop.f32.mrb[5].mxu0 }
 0x15b   : > { %v3109_v33 = vpop.f32.mrb[6].mxu1  ;;  %v2256_v35 = vadd.f32 %v2255_v28, %v2225_v26  ;;  %v3211_v36 = vadd.f32 %v2048_v32, %v1338_v30  ;;  %v2193_v37 = vadd.f32 %v3208_v17, %v2192_v27  ;;  %v3181_v38 = vpop.f32.mrb[6].mxu0 }
 0x15c   : > { %v1341_v39 = vpop.f32.mrb[7].mxu1  ;;  %v3212_v40 = vadd.f32 %v3181_v38, %v3109_v33  ;;  %v2051_v41 = vpop.f32.mrb[7].mxu0  ;;  %v2229_v52 = vmul.f32 %v3210_v31, %v3210_v31 }
 0x15d   : > { %v2194_v42 = vadd.f32 %v3211_v36, %v2193_v37  ;;  %v2227_v43 = vmul.f32 %v3211_v36, %v3211_v36  ;;  %v2257_v44 = vadd.f32 %v2256_v35, %v2226_v34  ;;  %v3213_v45 = vadd.f32 %v2051_v41, %v1341_v39 }
 0x15e   : > { %v2913_v46 = vpack.c.bf16 %v3212_v40, %v3210_v31  ;;  %v2230_v60 = vmul.f32 %v3212_v40, %v3212_v40 }
 0x15f   : > { %v2258_v47 = vadd.f32 %v2257_v44, %v2227_v43  ;;  %v2195_v48 = vadd.f32 %v3213_v45, %v2194_v42  ;;  %v2228_v49 = vmul.f32 %v3213_v45, %v3213_v45  ;;  %v2908_v50 = vpack.c.bf16 %v3213_v45, %v3211_v36 }
 0x160   : > { %2977 = vst [vmem:[%s3776_s5 + $0x18] sm:$0xff] %v2913_v46  }
 0x161   : > { %v3112_v51 = vpop.f32.mrb[8].mxu1  ;;  %v2196_v53 = vadd.f32 %v3210_v31, %v2195_v48  ;;  %v2259_v54 = vadd.f32 %v2258_v47, %v2228_v49  ;;  %2976 = vst [vmem:[%s3776_s5 + $0x10] sm:$0xff] %v2908_v50   ;;  %v3184_v55 = vpop.f32.mrb[8].mxu0 }
 0x162   : > { %v1354_v56 = vpop.f32.mrb[9].mxu1  ;;  %v3214_v57 = vadd.f32 %v3184_v55, %v3112_v51  ;;  %v2064_v58 = vpop.f32.mrb[9].mxu0 }
 0x163   : > { %v3113_v59 = vpop.f32.mrb[10].mxu1  ;;  %v2260_v61 = vadd.f32 %v2259_v54, %v2229_v52  ;;  %v3215_v62 = vadd.f32 %v2064_v58, %v1354_v56  ;;  %v2197_v63 = vadd.f32 %v3212_v40, %v2196_v53  ;;  %v3185_v0 = vpop.f32.mrb[10].mxu0 }
 0x164   : > { %v1357_v1 = vpop.f32.mrb[11].mxu1  ;;  %v3216_v2 = vadd.f32 %v3185_v0, %v3113_v59  ;;  %v2067_v3 = vpop.f32.mrb[11].mxu0  ;;  %v2233_v14 = vmul.f32 %v3214_v57, %v3214_v57 }
 0x165   : > { %v2198_v4 = vadd.f32 %v3215_v62, %v2197_v63  ;;  %v2231_v5 = vmul.f32 %v3215_v62, %v3215_v62  ;;  %v2261_v6 = vadd.f32 %v2260_v61, %v2230_v60  ;;  %v3217_v7 = vadd.f32 %v2067_v3, %v1357_v1 }
 0x166   : > { %v2923_v8 = vpack.c.bf16 %v3216_v2, %v3214_v57  ;;  %v2234_v22 = vmul.f32 %v3216_v2, %v3216_v2 }
 0x167   : > { %v2262_v9 = vadd.f32 %v2261_v6, %v2231_v5  ;;  %v2199_v10 = vadd.f32 %v3217_v7, %v2198_v4  ;;  %v2232_v11 = vmul.f32 %v3217_v7, %v3217_v7  ;;  %v2918_v12 = vpack.c.bf16 %v3217_v7, %v3215_v62 }
 0x168   : > { %2979 = vst [vmem:[%s3776_s5 + $0x28] sm:$0xff] %v2923_v8  }
 0x169   : > { %v3116_v13 = vpop.f32.mrb[12].mxu1  ;;  %v2200_v15 = vadd.f32 %v3214_v57, %v2199_v10  ;;  %v2263_v16 = vadd.f32 %v2262_v9, %v2232_v11  ;;  %2978 = vst [vmem:[%s3776_s5 + $0x20] sm:$0xff] %v2918_v12   ;;  %v3188_v17 = vpop.f32.mrb[12].mxu0 }
 0x16a   : > { %v1370_v18 = vpop.f32.mrb[13].mxu1  ;;  %v3218_v19 = vadd.f32 %v3188_v17, %v3116_v13  ;;  %v2080_v20 = vpop.f32.mrb[13].mxu0 }
 0x16b   : > { %v3117_v21 = vpop.f32.mrb[14].mxu1  ;;  %v2264_v23 = vadd.f32 %v2263_v16, %v2233_v14  ;;  %v3219_v24 = vadd.f32 %v2080_v20, %v1370_v18  ;;  %v2201_v25 = vadd.f32 %v3216_v2, %v2200_v15  ;;  %v3189_v26 = vpop.f32.mrb[14].mxu0 }
 0x16c   : > { %v1373_v27 = vpop.f32.mrb[15].mxu1  ;;  %v3220_v28 = vadd.f32 %v3189_v26, %v3117_v21  ;;  %v2083_v29 = vpop.f32.mrb[15].mxu0  ;;  %v2237_v40 = vmul.f32 %v3218_v19, %v3218_v19 }
 0x16d   : > { %v2202_v30 = vadd.f32 %v3219_v24, %v2201_v25  ;;  %v2235_v31 = vmul.f32 %v3219_v24, %v3219_v24  ;;  %v2265_v32 = vadd.f32 %v2264_v23, %v2234_v22  ;;  %v3221_v33 = vadd.f32 %v2083_v29, %v1373_v27 }
 0x16e   : > { %v2933_v34 = vpack.c.bf16 %v3220_v28, %v3218_v19  ;;  %v2238_v48 = vmul.f32 %v3220_v28, %v3220_v28 }
 0x16f   : > { %v2266_v35 = vadd.f32 %v2265_v32, %v2235_v31  ;;  %v2203_v36 = vadd.f32 %v3221_v33, %v2202_v30  ;;  %v2236_v37 = vmul.f32 %v3221_v33, %v3221_v33  ;;  %v2928_v38 = vpack.c.bf16 %v3221_v33, %v3219_v24 }
 0x170   : > { %2981 = vst [vmem:[%s3776_s5 + $0x38] sm:$0xff] %v2933_v34  }
 0x171   : > { %v3120_v39 = vpop.f32.mrb[16].mxu1  ;;  %v2204_v41 = vadd.f32 %v3218_v19, %v2203_v36  ;;  %v2267_v42 = vadd.f32 %v2266_v35, %v2236_v37  ;;  %2980 = vst [vmem:[%s3776_s5 + $0x30] sm:$0xff] %v2928_v38   ;;  %v3192_v43 = vpop.f32.mrb[16].mxu0 }
 0x172   : > { %v1386_v44 = vpop.f32.mrb[17].mxu1  ;;  %v3222_v45 = vadd.f32 %v3192_v43, %v3120_v39  ;;  %v2096_v46 = vpop.f32.mrb[17].mxu0 }
 0x173   : > { %v3121_v47 = vpop.f32.mrb[18].mxu1  ;;  %v2268_v49 = vadd.f32 %v2267_v42, %v2237_v40  ;;  %v3223_v50 = vadd.f32 %v2096_v46, %v1386_v44  ;;  %v2205_v51 = vadd.f32 %v3220_v28, %v2204_v41  ;;  %v3193_v52 = vpop.f32.mrb[18].mxu0 }
 0x174   : > { %v1389_v53 = vpop.f32.mrb[19].mxu1  ;;  %v3224_v54 = vadd.f32 %v3193_v52, %v3121_v47  ;;  %v2099_v55 = vpop.f32.mrb[19].mxu0  ;;  %v2241_v2 = vmul.f32 %v3222_v45, %v3222_v45 }
 0x175   : > { %v2206_v56 = vadd.f32 %v3223_v50, %v2205_v51  ;;  %v2239_v57 = vmul.f32 %v3223_v50, %v3223_v50  ;;  %v2269_v58 = vadd.f32 %v2268_v49, %v2238_v48  ;;  %v3225_v59 = vadd.f32 %v2099_v55, %v1389_v53 }
 0x176   : > { %v2943_v60 = vpack.c.bf16 %v3224_v54, %v3222_v45  ;;  %v2242_v10 = vmul.f32 %v3224_v54, %v3224_v54 }
 0x177   : > { %v2270_v61 = vadd.f32 %v2269_v58, %v2239_v57  ;;  %v2207_v62 = vadd.f32 %v3225_v59, %v2206_v56  ;;  %v2240_v63 = vmul.f32 %v3225_v59, %v3225_v59  ;;  %v2938_v0 = vpack.c.bf16 %v3225_v59, %v3223_v50 }
 0x178   : > { %2983 = vst [vmem:[%s3776_s5 + $0x48] sm:$0xff] %v2943_v60  }
 0x179   : > { %v3124_v1 = vpop.f32.mrb[20].mxu1  ;;  %v2208_v3 = vadd.f32 %v3222_v45, %v2207_v62  ;;  %v2271_v4 = vadd.f32 %v2270_v61, %v2240_v63  ;;  %2982 = vst [vmem:[%s3776_s5 + $0x40] sm:$0xff] %v2938_v0   ;;  %v3196_v5 = vpop.f32.mrb[20].mxu0 }
 0x17a   : > { %v1402_v6 = vpop.f32.mrb[21].mxu1  ;;  %v3226_v7 = vadd.f32 %v3196_v5, %v3124_v1  ;;  %v2112_v8 = vpop.f32.mrb[21].mxu0 }
 0x17b   : > { %v3125_v9 = vpop.f32.mrb[22].mxu1  ;;  %v2272_v11 = vadd.f32 %v2271_v4, %v2241_v2  ;;  %v3227_v12 = vadd.f32 %v2112_v8, %v1402_v6  ;;  %v2209_v13 = vadd.f32 %v3224_v54, %v2208_v3  ;;  %v3197_v14 = vpop.f32.mrb[22].mxu0 }
 0x17c   : > { %v1405_v15 = vpop.f32.mrb[23].mxu1  ;;  %v3228_v16 = vadd.f32 %v3197_v14, %v3125_v9  ;;  %v2115_v17 = vpop.f32.mrb[23].mxu0  ;;  %v2245_v28 = vmul.f32 %v3226_v7, %v3226_v7 }
 0x17d   : > { %v2210_v18 = vadd.f32 %v3227_v12, %v2209_v13  ;;  %v2243_v19 = vmul.f32 %v3227_v12, %v3227_v12  ;;  %v2273_v20 = vadd.f32 %v2272_v11, %v2242_v10  ;;  %v3229_v21 = vadd.f32 %v2115_v17, %v1405_v15 }
 0x17e   : > { %v2953_v22 = vpack.c.bf16 %v3228_v16, %v3226_v7  ;;  %v2246_v36 = vmul.f32 %v3228_v16, %v3228_v16 }
 0x17f   : > { %v2274_v23 = vadd.f32 %v2273_v20, %v2243_v19  ;;  %v2211_v24 = vadd.f32 %v3229_v21, %v2210_v18  ;;  %v2244_v25 = vmul.f32 %v3229_v21, %v3229_v21  ;;  %v2948_v26 = vpack.c.bf16 %v3229_v21, %v3227_v12 }
 0x180   : > { %2985 = vst [vmem:[%s3776_s5 + $0x58] sm:$0xff] %v2953_v22  }
 0x181   : > { %v3128_v27 = vpop.f32.mrb[24].mxu1  ;;  %v2212_v29 = vadd.f32 %v3226_v7, %v2211_v24  ;;  %v2275_v30 = vadd.f32 %v2274_v23, %v2244_v25  ;;  %2984 = vst [vmem:[%s3776_s5 + $0x50] sm:$0xff] %v2948_v26   ;;  %v3200_v31 = vpop.f32.mrb[24].mxu0 }
 0x182   : > { %v1418_v32 = vpop.f32.mrb[25].mxu1  ;;  %v3230_v33 = vadd.f32 %v3200_v31, %v3128_v27  ;;  %v2128_v34 = vpop.f32.mrb[25].mxu0 }
 0x183   : > { %v3129_v35 = vpop.f32.mrb[26].mxu1  ;;  %v2276_v37 = vadd.f32 %v2275_v30, %v2245_v28  ;;  %v3231_v38 = vadd.f32 %v2128_v34, %v1418_v32  ;;  %v2213_v39 = vadd.f32 %v3228_v16, %v2212_v29  ;;  %v3201_v40 = vpop.f32.mrb[26].mxu0 }
 0x184   : > { %v1421_v41 = vpop.f32.mrb[27].mxu1  ;;  %v3232_v42 = vadd.f32 %v3201_v40, %v3129_v35  ;;  %v2131_v43 = vpop.f32.mrb[27].mxu0  ;;  %v2249_v54 = vmul.f32 %v3230_v33, %v3230_v33 }
 0x185   : > { %v2214_v44 = vadd.f32 %v3231_v38, %v2213_v39  ;;  %v2247_v45 = vmul.f32 %v3231_v38, %v3231_v38  ;;  %v2277_v46 = vadd.f32 %v2276_v37, %v2246_v36  ;;  %v3233_v47 = vadd.f32 %v2131_v43, %v1421_v41 }
 0x186   : > { %v2963_v48 = vpack.c.bf16 %v3232_v42, %v3230_v33  ;;  %v2250_v62 = vmul.f32 %v3232_v42, %v3232_v42 }
 0x187   : > { %v2278_v49 = vadd.f32 %v2277_v46, %v2247_v45  ;;  %v2215_v50 = vadd.f32 %v3233_v47, %v2214_v44  ;;  %v2248_v51 = vmul.f32 %v3233_v47, %v3233_v47  ;;  %v2958_v52 = vpack.c.bf16 %v3233_v47, %v3231_v38 }
 0x188   : > { %2987 = vst [vmem:[%s3776_s5 + $0x68] sm:$0xff] %v2963_v48  }
 0x189   : > { %v3132_v53 = vpop.f32.mrb[28].mxu1  ;;  %v2216_v55 = vadd.f32 %v3230_v33, %v2215_v50  ;;  %v2279_v56 = vadd.f32 %v2278_v49, %v2248_v51  ;;  %2986 = vst [vmem:[%s3776_s5 + $0x60] sm:$0xff] %v2958_v52   ;;  %v3204_v57 = vpop.f32.mrb[28].mxu0 }
 0x18a   : > { %v1434_v58 = vpop.f32.mrb[29].mxu1  ;;  %v3234_v59 = vadd.f32 %v3204_v57, %v3132_v53  ;;  %v2144_v60 = vpop.f32.mrb[29].mxu0 }
 0x18b   : > { %v3133_v61 = vpop.f32.mrb[30].mxu1  ;;  %v2280_v63 = vadd.f32 %v2279_v56, %v2249_v54  ;;  %v3235_v0 = vadd.f32 %v2144_v60, %v1434_v58  ;;  %v2217_v1 = vadd.f32 %v3232_v42, %v2216_v55  ;;  %v3205_v2 = vpop.f32.mrb[30].mxu0 }
 0x18c   : > { %v1437_v3 = vpop.f32.mrb[31].mxu1  ;;  %v3236_v4 = vadd.f32 %v3205_v2, %v3133_v61  ;;  %v2147_v5 = vpop.f32.mrb[31].mxu0  ;;  %v2253_v15 = vmul.f32 %v3234_v59, %v3234_v59 }
 0x18d   : > { %v2218_v6 = vadd.f32 %v3235_v0, %v2217_v1  ;;  %v2251_v7 = vmul.f32 %v3235_v0, %v3235_v0  ;;  %v2281_v8 = vadd.f32 %v2280_v63, %v2250_v62  ;;  %v3237_v9 = vadd.f32 %v2147_v5, %v1437_v3 }
 0x18e   : > { %v2973_v10 = vpack.c.bf16 %v3236_v4, %v3234_v59  ;;  %v2254_v18 = vmul.f32 %v3236_v4, %v3236_v4 }
 0x18f   : > { %v2282_v11 = vadd.f32 %v2281_v8, %v2251_v7  ;;  %v2219_v12 = vadd.f32 %v3237_v9, %v2218_v6  ;;  %v2252_v13 = vmul.f32 %v3237_v9, %v3237_v9  ;;  %v2968_v14 = vpack.c.bf16 %v3237_v9, %v3235_v0 }
 0x190   : > { %2989 = vst [vmem:[%s3776_s5 + $0x78] sm:$0xff] %v2973_v10  }
 0x191   : > { %v2220_v16 = vadd.f32 %v3234_v59, %v2219_v12  ;;  %v2283_v17 = vadd.f32 %v2282_v11, %v2252_v13  ;;  %2988 = vst [vmem:[%s3776_s5 + $0x70] sm:$0xff] %v2968_v14  }
 0x193   : > { %v2221_v19 = vadd.f32 %v3236_v4, %v2220_v16  ;;  %v2284_v20 = vadd.f32 %v2283_v17, %v2253_v15 }
 0x195   : > { %2222 = vst [vmem:[%s766_s9] sm:$0xff] %v2221_v19  ;;  %v2285_v21 = vadd.f32 %v2284_v20, %v2254_v18 }
 0x197   : > { %2286 = vst [vmem:[%s770_s12] sm:$0xff] %v2285_v21 }
 0x198 PF: > { %p12_p10 = scmp.ge.s32.totalorder %s3466_s19, 4   ;;  %s3819_s15 = smov %s3416_s16 }
 0x199   : > { %s3820_s16 = smov %s3475_s22  ;;  %s3821_s17 = smov %s3466_s19 }
 0x19a   :  { %14 = sbr.rel (!%p12_p10) target bundleno = 2 (0x2), region = 134 }

// kernel: net_a_forward.11
= control target key start
LH: loop header
LB: loop body
LE: loop exit
PB: predicated region body
PF: predicated region fallthrough
CT: control target
= control target key end

     0   :  { %s447_s12 = smov 0   ;;  %s477_s0 = inlined_call_operand.vmem [shape: bf16[128,128], index: 0, kind: input, shape index: {}]   ;;  %s478_s1 = inlined_call_operand.vmem [shape: f32[1,128], index: 1, kind: input, shape index: {}]   ;;  %s479_s2 = inlined_call_operand.vmem [shape: f32[1,128], index: 2, kind: input, shape index: {}]   ;;  %s480_s3 = inlined_call_operand.vmem [shape: bf16[128,128], index: 3, kind: output, shape index: {}]  }
   0x1 LB: > { %s340_s13 = sadd.s32 4294967295, %s425_s12   ;;  %p344_p0 = scmp.ge.s32.totalorder %s425_s12, 1  ;;  %s425_s12 = sphi %s447_s12, %s13_s12  }
   0x2   : > { %p138_p1 = scmp.lt.s32.totalorder %s425_s12, 3 }
   0x4   : > { %p139_p2 = pnand %p344_p0, %p138_p1 }
   0x5   : > { %s345_s14 = sshll.u32 (!%p139_p2), %s340_s13, 3  ;;  %v349_v0 = vld [vmem:[%s478_s1] ss:$0 sm:$0xff] (!%p139_p2) }
   0x6   : > { %142 = sbr.rel (%p139_p2) target bundleno = 34 (0x22), region = 32  ;;  %p163_p3 = scmp.lt.s32.totalorder (!%p139_p2), %s345_s14, 15  ;;  %v350_v13 = vld [vmem:[%s479_s2] ss:$0 sm:$0xff] (!%p139_p2) }
   0xd   : > { %s482_s14 = smov (!%p163_p3, %s345_s14), 15 }
   0xe   : > { %s346_s15 = sshll.u32 %s482_s14, 2 }
   0xf   : > { %s166_s18 = scalar_lea.vmem %s477_s0, %s346_s15  ;;  %s172_s25 = scalar_lea.vmem %s480_s3, %s346_s15 }
  0x10   : > { %v370_v1 = vld [vmem:[%s166_s18] sm:$0xff]   ;;  %v405_v2 = vld [vmem:[%s166_s18 + $0x8] sm:$0xff]   ;;  %v406_v3 = vld [vmem:[%s166_s18 + $0x10] sm:$0xff]  }
  0x11   : > { %v371_v4 = vunpack.c.l.bf16 %v370_v1  ;;  %v372_v5 = vunpack.c.h.bf16 %v370_v1  ;;  %v375_v6 = vunpack.c.l.bf16 %v405_v2  ;;  %v376_v7 = vunpack.c.h.bf16 %v405_v2  ;;  %v407_v8 = vld [vmem:[%s166_s18 + $0x18] sm:$0xff]  }
  0x12   : > { %v379_v9 = vunpack.c.l.bf16 %v406_v3  ;;  %v380_v10 = vunpack.c.h.bf16 %v406_v3  ;;  %v383_v11 = vunpack.c.l.bf16 %v407_v8  ;;  %v384_v12 = vunpack.c.h.bf16 %v407_v8 }
  0x13   : > { %v197_v14 = vmul.f32 %v371_v4, %v349_v0  ;;  %v198_v15 = vmul.f32 %v372_v5, %v349_v0  ;;  %v199_v16 = vmul.f32 %v375_v6, %v349_v0  ;;  %v200_v17 = vmul.f32 %v376_v7, %v349_v0 }
  0x14   : > { %v201_v18 = vmul.f32 %v379_v9, %v349_v0  ;;  %v202_v19 = vmul.f32 %v380_v10, %v349_v0  ;;  %v203_v20 = vmul.f32 %v383_v11, %v349_v0  ;;  %v204_v21 = vmul.f32 %v384_v12, %v349_v0 }
  0x15   : > { %v212_v22 = vadd.f32 %v350_v13, %v197_v14  ;;  %v213_v23 = vadd.f32 %v350_v13, %v198_v15  ;;  %v214_v24 = vadd.f32 %v350_v13, %v199_v16  ;;  %v215_v25 = vadd.f32 %v350_v13, %v200_v17 }
  0x16   : > { %v216_v26 = vadd.f32 %v350_v13, %v201_v18  ;;  %v217_v27 = vadd.f32 %v350_v13, %v202_v19  ;;  %v218_v28 = vadd.f32 %v350_v13, %v203_v20  ;;  %v219_v29 = vadd.f32 %v350_v13, %v204_v21 }
  0x17   : > { %vm220_vm0 = vcmp.ge.f32.partialorder %v212_v22, 0.0  ;;  %vm221_vm1 = vcmp.ge.f32.partialorder %v213_v23, 0.0  ;;  %v228_v30 = vmul.f32 0.2, %v212_v22  ;;  %v229_v31 = vmul.f32 0.2, %v213_v23 }
  0x18   : > { %vm222_vm2 = vcmp.ge.f32.partialorder %v214_v24, 0.0  ;;  %vm223_vm3 = vcmp.ge.f32.partialorder %v215_v25, 0.0  ;;  %v230_v32 = vmul.f32 0.2, %v214_v24  ;;  %v231_v33 = vmul.f32 0.2, %v215_v25 }
  0x19   : > { %v236_v34 = vsel %vm220_vm0, %v212_v22, %v228_v30  ;;  %v237_v35 = vsel %vm221_vm1, %v213_v23, %v229_v31  ;;  %vm224_vm4 = vcmp.ge.f32.partialorder %v216_v26, 0.0  ;;  %vm225_vm5 = vcmp.ge.f32.partialorder %v217_v27, 0.0 }
  0x1a   : > { %v388_v36 = vpack.c.bf16 %v237_v35, %v236_v34  ;;  %v238_v37 = vsel %vm222_vm2, %v214_v24, %v230_v32  ;;  %v239_v38 = vsel %vm223_vm3, %v215_v25, %v231_v33  ;;  %v232_v39 = vmul.f32 0.2, %v216_v26 }
  0x1b   : > { %v393_v40 = vpack.c.bf16 %v239_v38, %v238_v37  ;;  %v233_v41 = vmul.f32 0.2, %v217_v27  ;;  %vm226_vm6 = vcmp.ge.f32.partialorder %v218_v28, 0.0  ;;  %vm227_vm7 = vcmp.ge.f32.partialorder %v219_v29, 0.0 }
  0x1c   : > { %389 = vst [vmem:[%s172_s25] sm:$0xff] %v388_v36   ;;  %v240_v42 = vsel %vm224_vm4, %v216_v26, %v232_v39  ;;  %v234_v43 = vmul.f32 0.2, %v218_v28  ;;  %v235_v44 = vmul.f32 0.2, %v219_v29 }
  0x1d   : > { %408 = vst [vmem:[%s172_s25 + $0x8] sm:$0xff] %v393_v40   ;;  %v241_v45 = vsel %vm225_vm5, %v217_v27, %v233_v41 }
  0x1e   : > { %v398_v46 = vpack.c.bf16 %v241_v45, %v240_v42  ;;  %v242_v47 = vsel %vm226_vm6, %v218_v28, %v234_v43  ;;  %v243_v48 = vsel %vm227_vm7, %v219_v29, %v235_v44 }
  0x1f   : > { %v403_v49 = vpack.c.bf16 %v243_v48, %v242_v47 }
  0x20   : > { %409 = vst [vmem:[%s172_s25 + $0x10] sm:$0xff] %v398_v46  }
  0x21   : > { %410 = vst [vmem:[%s172_s25 + $0x18] sm:$0xff] %v403_v49  }
  0x22 PF: > { %s13_s12 = sadd.s32 1, %s425_s12  }
  0x23   : > { %p10_p4 = scmp.ge.s32.totalorder %s13_s12, 4  }
  0x25   :  { %12 = sbr.rel (!%p10_p4) target bundleno = 1 (0x1), region = 62 }

// kernel: net_a_forward.10
= control target key start
LH: loop header
LB: loop body
LE: loop exit
PB: predicated region body
PF: predicated region fallthrough
CT: control target
= control target key end

     0   :  { %s1523_s15 = smov 0   ;;  %s1525_s16 = smov 0   ;;  %s1692_s0 = inlined_call_operand.vmem [shape: bf16[4,128,64], index: 0, kind: input, shape index: {}]   ;;  %s1693_s1 = inlined_call_operand.vmem [shape: bf16[4,64,128], index: 1, kind: input, shape index: {}]   ;;  %s1694_s2 = inlined_call_operand.vmem [shape: bf16[128,128], index: 2, kind: output, shape index: {0}]   ;;  %s1695_s3 = inlined_call_operand.vmem [shape: f32[16,128], index: 3, kind: output, shape index: {1}]   ;;  %s1696_s4 = inlined_call_operand.vmem [shape: f32[16,128], index: 4, kind: output, shape index: {2}]  }
   0x1   :  { %s1527_s17 = smov 0  }
   0x2 LB: > { %s1539_s18 = sadd.s32 4294967295, %s1496_s17   ;;  %s1542_s19 = sadd.s32 1, %s1496_s17   ;;  %s1496_s17 = sphi %s1527_s17, %s1699_s17   ;;  %s1492_s16 = sphi %s1525_s16, %s1698_s16   ;;  %s1488_s15 = sphi %s1523_s15, %s1697_s15  }
   0x3   : > { %s19_s20 = ssub.s32 %s1496_s17, %s1542_s19  ;;  %s22_s21 = sadd.s32 1, %s1492_s16 }
   0x4   : > { %p20_p0 = scmp.eq.s32.totalorder %s19_s20, 0  ;;  %p29_p1 = scmp.ne.s32.totalorder %s1492_s16, %s1488_s15 }
   0x5   : > { %p30_p2 = scmp.eq.s32.totalorder %s1496_s17, 0  ;;  %p1150_p4 = scmp.ge.s32.totalorder %s1496_s17, 2 }
   0x6   : > { %s1551_s22 = scalar_select %p20_p0, %s1492_s16, %s22_s21  }
   0x7   : > { %p31_p3 = por %p30_p2, %p29_p1  ;;  %157 = sbr.rel (%p1150_p4) target bundleno = 26 (0x1a), region = 20 }
   0xe   : > { %160 = sbr.rel (!%p31_p3) target bundleno = 26 (0x1a), region = 24  ;;  %s162_s23 = sand.u32 (%p31_p3), 1, %s1492_s16  }
   0xf   : > { %s1266_s24 = sshll.u32 (%p31_p3), %s1496_s17, 5  ;;  %s1151_s25 = sshll.u32 (%p31_p3), %s162_s23, 7 }
  0x10   : > { %s1559_s28 = scalar_lea.vmem (%p31_p3), %s1692_s0, %s1266_s24  ;;  %s164_s29 = scalar_lea.vmem (%p31_p3), [#allocation2], %s1151_s25 }
  0x11   : > { %v183_v0 = vld [vmem:[%s1559_s28] sm:$0xff] (%p31_p3)   ;;  %v187_v1 = vld [vmem:[%s1559_s28 + $0x8] sm:$0xff] (%p31_p3)   ;;  %v191_v2 = vld [vmem:[%s1559_s28 + $0x10] sm:$0xff] (%p31_p3)  }
  0x12   : > { %184 = vst [vmem:[%s164_s29] sm:$0xff] (%p31_p3), %v183_v0   ;;  %188 = vst [vmem:[%s164_s29 + $0x8] sm:$0xff] (%p31_p3), %v187_v1   ;;  %v195_v3 = vld [vmem:[%s1559_s28 + $0x18] sm:$0xff] (%p31_p3)   ;;  %v199_v4 = vld [vmem:[%s1559_s28 + $0x40] sm:$0xff] (%p31_p3)  }
  0x13   : > { %192 = vst [vmem:[%s164_s29 + $0x10] sm:$0xff] (%p31_p3), %v191_v2   ;;  %v203_v5 = vld [vmem:[%s1559_s28 + $0x48] sm:$0xff] (%p31_p3)   ;;  %196 = vst [vmem:[%s164_s29 + $0x18] sm:$0xff] (%p31_p3), %v195_v3   ;;  %v207_v6 = vld [vmem:[%s1559_s28 + $0x50] sm:$0xff] (%p31_p3)  }
  0x14   : > { %200 = vst [vmem:[%s164_s29 + $0x20] sm:$0xff] (%p31_p3), %v199_v4   ;;  %204 = vst [vmem:[%s164_s29 + $0x28] sm:$0xff] (%p31_p3), %v203_v5   ;;  %v211_v7 = vld [vmem:[%s1559_s28 + $0x58] sm:$0xff] (%p31_p3)   ;;  %v215_v8 = vld [vmem:[%s1559_s28 + $0x80] sm:$0xff] (%p31_p3)  }
  0x15   : > { %208 = vst [vmem:[%s164_s29 + $0x30] sm:$0xff] %v207_v6   ;;  %212 = vst [vmem:[%s164_s29 + $0x38] sm:$0xff] %v211_v7   ;;  %v219_v9 = vld [vmem:[%s1559_s28 + $0x88] sm:$0xff]   ;;  %v223_v10 = vld [vmem:[%s1559_s28 + $0x90] sm:$0xff]  }
  0x16   : > { %216 = vst [vmem:[%s164_s29 + $0x40] sm:$0xff] %v215_v8   ;;  %v227_v11 = vld [vmem:[%s1559_s28 + $0x98] sm:$0xff]   ;;  %220 = vst [vmem:[%s164_s29 + $0x48] sm:$0xff] %v219_v9   ;;  %v231_v12 = vld [vmem:[%s1559_s28 + $0xc0] sm:$0xff]  }
  0x17   : > { %224 = vst [vmem:[%s164_s29 + $0x50] sm:$0xff] %v223_v10   ;;  %228 = vst [vmem:[%s164_s29 + $0x58] sm:$0xff] %v227_v11   ;;  %v235_v13 = vld [vmem:[%s1559_s28 + $0xc8] sm:$0xff]   ;;  %v239_v14 = vld [vmem:[%s1559_s28 + $0xd0] sm:$0xff]  }
  0x18   : > { %232 = vst [vmem:[%s164_s29 + $0x60] sm:$0xff] %v231_v12   ;;  %236 = vst [vmem:[%s164_s29 + $0x68] sm:$0xff] %v235_v13   ;;  %v243_v15 = vld [vmem:[%s1559_s28 + $0xd8] sm:$0xff]  }
  0x19   : > { %240 = vst [vmem:[%s164_s29 + $0x70] sm:$0xff] %v239_v14   ;;  %244 = vst [vmem:[%s164_s29 + $0x78] sm:$0xff] %v243_v15  }
  0x1a PF: > { %p1154_p5 = scmp.ge.s32.totalorder %s1496_s17, 1  ;;  %p332_p6 = scmp.lt.s32.totalorder %s1496_s17, 3 }
  0x1c   : > { %p333_p7 = pnand %p1154_p5, %p332_p6 }
  0x1d   : > { %v1442_v16 = vld [vmem:[%s1693_s1 + $0x20] sm:$0xff] (!%p333_p7)   ;;  %s339_s6 = sand.u32 (!%p333_p7), 1, %s1488_s15   ;;  %v1444_v18 = vld [vmem:[%s1693_s1 + $0x28] sm:$0xff] (!%p333_p7)   ;;  %v1446_v20 = vld [vmem:[%s1693_s1 + $0x30] sm:$0xff] (!%p333_p7)   ;;  %vm466_vm0 = vcmask (!%p333_p7), 523264   ;;  %s1156_s20 = sshll.u32 (!%p333_p7), %s1539_s18, 3 }
  0x1e   : > { %336 = sbr.rel (%p333_p7) target bundleno = 297 (0x129), region = 65  ;;  %v1443_v17 = vld [vmem:[%s1693_s1 + $0x40] sm:$0xff] (!%p333_p7)   ;;  %1330 = vmatprep.subr.bf16.mxu1 (!%p333_p7), %v1442_v16  ;;  %s1155_s11 = sshll.u32 (!%p333_p7), %s339_s6, 7  ;;  %v1445_v19 = vld [vmem:[%s1693_s1 + $0x48] sm:$0xff] (!%p333_p7)   ;;  %v1447_v21 = vld [vmem:[%s1693_s1 + $0x50] sm:$0xff] (!%p333_p7)  }
  0x1f   : > { %1362 = vmatprep.subr.bf16.mxu0 (!%p333_p7), %v1443_v17  ;;  %1331 = vmatpush3.bf16.msra.mxu1 (!%p333_p7), %v1442_v16  ;;  %v1448_v22 = vld [vmem:[%s1693_s1 + $0x38] sm:$0xff] (!%p333_p7)   ;;  %s1604_s26 = scalar_lea.vmem (!%p333_p7), [#allocation2], %s1155_s11  ;;  %v1453_v27 = vld [vmem:[%s1693_s1] sm:$0xff] (!%p333_p7)   ;;  %v1456_v30 = vld [vmem:[%s1693_s1 + $0x8] sm:$0xff] (!%p333_p7)   ;;  %p374_p8 = scmp.lt.s32.totalorder (!%p333_p7), %s1156_s20, 15 }
  0x20   : > { %1363 = vmatpush3.bf16.msra.mxu0 (!%p333_p7), %v1443_v17  ;;  %1332 = vmatprep.subr.bf16.mxu1 (!%p333_p7), %v1444_v18  ;;  %v1449_v23 = vld [vmem:[%s1693_s1 + $0x58] sm:$0xff] (!%p333_p7)   ;;  %v1450_v24 = vld [vmem:[%s1604_s26 + $0x20] sm:$0xff] (!%p333_p7)   ;;  %v1452_v26 = vld [vmem:[%s1604_s26 + $0x28] sm:$0xff] (!%p333_p7)   ;;  %p379_p9 = scmp.lt.s32.totalorder (!%p333_p7), %s1539_s18, 1 }
  0x21   : > { %1364 = vmatprep.subr.bf16.mxu0 (!%p333_p7), %v1445_v19  ;;  %v1451_v25 = vld [vmem:[%s1604_s26 + $0x40] sm:$0xff] (!%p333_p7)   ;;  %1338 = vmatprep.mubr.msk.bf16.mxu1 (!%p333_p7), %vm466_vm0, %v1450_v24  ;;  %v1454_v29 = vld [vmem:[%s1604_s26 + $0x48] sm:$0xff] (!%p333_p7)   ;;  %v1458_v32 = vld [vmem:[%s1604_s26 + $0x30] sm:$0xff] (!%p333_p7)  }
  0x22   : > { %1370 = vmatprep.mubr.msk.bf16.mxu0 (!%p333_p7), %vm466_vm0, %v1451_v25  ;;  %v1455_v28 = vld [vmem:[%s1693_s1 + $0x60] sm:$0xff] (!%p333_p7)   ;;  %v1457_v31 = vld [vmem:[%s1693_s1 + $0x68] sm:$0xff] (!%p333_p7)   ;;  %v1459_v33 = vld [vmem:[%s1604_s26 + $0x50] sm:$0xff] (!%p333_p7)  }
  0x23   : > { %1333 = vmatpush3.bf16.msra.mxu1 (!%p333_p7), %v1444_v18  ;;  %v1460_v34 = vld [vmem:[%s1604_s26 + $0x38] sm:$0xff] (!%p333_p7)   ;;  %v1461_v35 = vld [vmem:[%s1693_s1 + $0x10] sm:$0xff] (!%p333_p7)   ;;  %v1466_v40 = vld [vmem:[%s1604_s26] sm:$0xff] (!%p333_p7)  }
  0x24   : > { %1365 = vmatpush3.bf16.msra.mxu0 (!%p333_p7), %v1445_v19  ;;  %1334 = vmatprep.subr.bf16.mxu1 (!%p333_p7), %v1446_v20  ;;  %v1463_v36 = vld [vmem:[%s1693_s1 + $0x70] sm:$0xff] (!%p333_p7)   ;;  %v1462_v37 = vld [vmem:[%s1604_s26 + $0x58] sm:$0xff] (!%p333_p7)   ;;  %v1467_v41 = vld [vmem:[%s1604_s26 + $0x60] sm:$0xff] (!%p333_p7)  }
  0x25   : > { %1366 = vmatprep.subr.bf16.mxu0 %v1447_v21  ;;  %v1464_v38 = vld [vmem:[%s1693_s1 + $0x18] sm:$0xff]   ;;  %v1468_v42 = vld [vmem:[%s1604_s26 + $0x8] sm:$0xff]   ;;  %v1470_v44 = vld [vmem:[%s1604_s26 + $0x10] sm:$0xff]   ;;  %s1701_s20 = smov (!%p374_p8, %s1156_s20), 15  ;;  %s1703_s18 = smov (!%p379_p9, %s1539_s18), 1 }
  0x26   : > { %v1465_v39 = vld [vmem:[%s1693_s1 + $0x78] sm:$0xff]   ;;  %v1469_v43 = vld [vmem:[%s1604_s26 + $0x68] sm:$0xff]   ;;  %v1471_v45 = vld [vmem:[%s1604_s26 + $0x70] sm:$0xff]   ;;  %s1157_s21 = sshll.u32 %s1701_s20, 2 }
  0x27   : > { %1335 = vmatpush3.bf16.msra.mxu1 %v1446_v20  ;;  %v1472_v46 = vld [vmem:[%s1604_s26 + $0x18] sm:$0xff]   ;;  %s1666_s25 = scalar_lea.vmem %s1694_s2, %s1157_s21 }
  0x28   : > { %1367 = vmatpush3.bf16.msra.mxu0 %v1447_v21  ;;  %1336 = vmatprep.subr.bf16.mxu1 %v1448_v22  ;;  %v1473_v47 = vld [vmem:[%s1604_s26 + $0x78] sm:$0xff]   ;;  %s1158_s26 = sshll.u32 %s1703_s18, 3 }
  0x29   : > { %1368 = vmatprep.subr.bf16.mxu0 %v1449_v23  ;;  %s382_s29 = scalar_lea.vmem %s1695_s3, %s1158_s26  ;;  %s386_s6 = scalar_lea.vmem %s1696_s4, %s1158_s26 }
  0x2b   : > { %1337 = vmatpush3.bf16.msra.mxu1 %v1448_v22 }
  0x2c   : > { %1369 = vmatpush3.bf16.msra.mxu0 %v1449_v23  ;;  %1346 = vmatprep.subr.bf16.mxu1 %v1453_v27 }
  0x2d   : > { %1378 = vmatprep.subr.bf16.mxu0 %v1455_v28 }
  0x2e   : > { %1339 = vmatmul.mubr.msk.bf16.vlgmr.msra.gmra.mrb[0].mxu1 %vm466_vm0, %v1452_v26 }
  0x2f   : > { %1371 = vmatmul.mubr.msk.bf16.vlgmr.msra.gmra.mrb[0].mxu0 %vm466_vm0, %v1454_v29  ;;  %1347 = vmatpush3.bf16.msra.mxu1 %v1453_v27 }
  0x30   : > { %1379 = vmatpush3.bf16.msra.mxu0 %v1455_v28  ;;  %1348 = vmatprep.subr.bf16.mxu1 %v1456_v30 }
  0x31   : > { %1380 = vmatprep.subr.bf16.mxu0 %v1457_v31  ;;  %1342 = vmatprep.mubr.msk.bf16.mxu1 %vm466_vm0, %v1458_v32 }
  0x32   : > { %1374 = vmatprep.mubr.msk.bf16.mxu0 %vm466_vm0, %v1459_v33 }
  0x33   : > { %1349 = vmatpush3.bf16.msra.mxu1 %v1456_v30 }
  0x34   : > { %1381 = vmatpush3.bf16.msra.mxu0 %v1457_v31  ;;  %1350 = vmatprep.subr.bf16.mxu1 %v1461_v35 }
  0x35   : > { %1382 = vmatprep.subr.bf16.mxu0 %v1463_v36 }
  0x36   : > { %1343 = vmatmul.mubr.msk.bf16.gmra.mrb[4].mxu1 %vm466_vm0, %v1460_v34 }
  0x37   : > { %1375 = vmatmul.mubr.msk.bf16.gmra.mrb[4].mxu0 %vm466_vm0, %v1462_v37  ;;  %1351 = vmatpush3.bf16.msra.mxu1 %v1461_v35 }
  0x38   : > { %1383 = vmatpush3.bf16.msra.mxu0 %v1463_v36  ;;  %1352 = vmatprep.subr.bf16.mxu1 %v1464_v38 }
  0x39   : > { %1384 = vmatprep.subr.bf16.mxu0 %v1465_v39  ;;  %1354 = vmatprep.mubr.msk.bf16.mxu1 %vm466_vm0, %v1466_v40 }
  0x3a   : > { %1386 = vmatprep.mubr.msk.bf16.mxu0 %vm466_vm0, %v1467_v41 }
  0x3b   : > { %1353 = vmatpush3.bf16.msra.mxu1 %v1464_v38 }
  0x3c   : > { %1385 = vmatpush3.bf16.msra.mxu0 %v1465_v39 }
  0x3e   : > { %1355 = vmatmul.mubr.msk.bf16.vlgmr.msra.gmra.mrb[0].mxu1 %vm466_vm0, %v1468_v42 }
  0x3f   : > { %1387 = vmatmul.mubr.msk.bf16.vlgmr.msra.gmra.mrb[0].mxu0 %vm466_vm0, %v1469_v43  ;;  %1358 = vmatprep.mubr.msk.bf16.mxu1 %vm466_vm0, %v1470_v44 }
  0x40   : > { %1390 = vmatprep.mubr.msk.bf16.mxu0 %vm466_vm0, %v1471_v45 }
  0x46   : > { %1359 = vmatmul.mubr.msk.bf16.gmra.mrb[4].mxu1 %vm466_vm0, %v1472_v46 }
  0x47   : > { %1391 = vmatmul.mubr.msk.bf16.gmra.mrb[4].mxu0 %vm466_vm0, %v1473_v47 }
 0x111   : > { %v1356_v48 = vpop.f32.mrb[0].mxu1 }
 0x112   : > { %v1388_v49 = vpop.f32.mrb[0].mxu0  ;;  %v634_v50 = vpop.f32.mrb[1].mxu1 }
 0x113   : > { %v1394_v51 = vadd.f32 %v1388_v49, %v1356_v48  ;;  %v920_v52 = vpop.f32.mrb[1].mxu0  ;;  %v1357_v53 = vpop.f32.mrb[2].mxu1 }
 0x114   : > { %v1395_v54 = vadd.f32 %v920_v52, %v634_v50  ;;  %v1389_v55 = vpop.f32.mrb[2].mxu0  ;;  %v637_v56 = vpop.f32.mrb[3].mxu1 }
 0x115   : > { %v1396_v57 = vadd.f32 %v1389_v55, %v1357_v53  ;;  %v923_v58 = vpop.f32.mrb[3].mxu0  ;;  %v969_v2 = vmul.f32 %v1394_v51, %v1394_v51 }
 0x116   : > { %v1397_v59 = vadd.f32 %v923_v58, %v637_v56  ;;  %v967_v61 = vmul.f32 %v1395_v54, %v1395_v54 }
 0x117   : > { %v1283_v60 = vpack.c.bf16 %v1396_v57, %v1394_v51  ;;  %v970_v10 = vmul.f32 %v1396_v57, %v1396_v57 }
 0x118   : > { %v959_v62 = vadd.f32 %v1397_v59, %v1395_v54  ;;  %v968_v63 = vmul.f32 %v1397_v59, %v1397_v59  ;;  %v1278_v0 = vpack.c.bf16 %v1397_v59, %v1395_v54 }
 0x119   : > { %1295 = vst [vmem:[%s1666_s25 + $0x8] sm:$0xff] %v1283_v60   ;;  %v1360_v1 = vpop.f32.mrb[4].mxu1 }
 0x11a   : > { %v960_v3 = vadd.f32 %v1394_v51, %v959_v62  ;;  %v975_v4 = vadd.f32 %v968_v63, %v967_v61  ;;  %1279 = vst [vmem:[%s1666_s25] sm:$0xff] %v1278_v0   ;;  %v1392_v5 = vpop.f32.mrb[4].mxu0  ;;  %v650_v6 = vpop.f32.mrb[5].mxu1 }
 0x11b   : > { %v1398_v7 = vadd.f32 %v1392_v5, %v1360_v1  ;;  %v936_v8 = vpop.f32.mrb[5].mxu0  ;;  %v1361_v9 = vpop.f32.mrb[6].mxu1 }
 0x11c   : > { %v976_v11 = vadd.f32 %v975_v4, %v969_v2  ;;  %v1399_v12 = vadd.f32 %v936_v8, %v650_v6  ;;  %v961_v13 = vadd.f32 %v1396_v57, %v960_v3  ;;  %v1393_v14 = vpop.f32.mrb[6].mxu0  ;;  %v653_v15 = vpop.f32.mrb[7].mxu1 }
 0x11d   : > { %v1400_v16 = vadd.f32 %v1393_v14, %v1361_v9  ;;  %v939_v17 = vpop.f32.mrb[7].mxu0  ;;  %v973_v27 = vmul.f32 %v1398_v7, %v1398_v7 }
 0x11e   : > { %v962_v18 = vadd.f32 %v1399_v12, %v961_v13  ;;  %v971_v19 = vmul.f32 %v1399_v12, %v1399_v12  ;;  %v977_v20 = vadd.f32 %v976_v11, %v970_v10  ;;  %v1401_v21 = vadd.f32 %v939_v17, %v653_v15 }
 0x11f   : > { %v1293_v22 = vpack.c.bf16 %v1400_v16, %v1398_v7  ;;  %v974_v30 = vmul.f32 %v1400_v16, %v1400_v16 }
 0x120   : > { %v978_v23 = vadd.f32 %v977_v20, %v971_v19  ;;  %v963_v24 = vadd.f32 %v1401_v21, %v962_v18  ;;  %v972_v25 = vmul.f32 %v1401_v21, %v1401_v21  ;;  %v1288_v26 = vpack.c.bf16 %v1401_v21, %v1399_v12 }
 0x121   : > { %1297 = vst [vmem:[%s1666_s25 + $0x18] sm:$0xff] %v1293_v22  }
 0x122   : > { %v964_v28 = vadd.f32 %v1398_v7, %v963_v24  ;;  %v979_v29 = vadd.f32 %v978_v23, %v972_v25  ;;  %1296 = vst [vmem:[%s1666_s25 + $0x10] sm:$0xff] %v1288_v26  }
 0x124   : > { %v965_v31 = vadd.f32 %v1400_v16, %v964_v28  ;;  %v980_v32 = vadd.f32 %v979_v29, %v973_v27 }
 0x126   : > { %966 = vst [vmem:[%s382_s29] sm:$0xff] %v965_v31  ;;  %v981_v33 = vadd.f32 %v980_v32, %v974_v30 }
 0x128   : > { %982 = vst [vmem:[%s386_s6] sm:$0xff] %v981_v33 }
 0x129 PF: > { %p12_p10 = scmp.ge.s32.totalorder %s1542_s19, 4   ;;  %s1697_s15 = smov %s1492_s16 }
 0x12a   : > { %s1698_s16 = smov %s1551_s22  ;;  %s1699_s17 = smov %s1542_s19 }
 0x12b   :  { %14 = sbr.rel (!%p12_p10) target bundleno = 2 (0x2), region = 134 }

// kernel: net_a_forward.13
= control target key start
LH: loop header
LB: loop body
LE: loop exit
PB: predicated region body
PF: predicated region fallthrough
CT: control target
= control target key end

     0   :  { %s330_s12 = smov 0   ;;  %s353_s0 = inlined_call_operand.vmem [shape: bf16[32,128], index: 0, kind: input, shape index: {}]   ;;  %s354_s1 = inlined_call_operand.vmem [shape: f32[1,128], index: 1, kind: input, shape index: {}]   ;;  %s355_s2 = inlined_call_operand.vmem [shape: f32[1,128], index: 2, kind: input, shape index: {}]   ;;  %s356_s3 = inlined_call_operand.vmem [shape: bf16[32,128], index: 3, kind: output, shape index: {}]  }
   0x1 LB: > { %s268_s13 = sadd.s32 4294967295, %s308_s12   ;;  %p272_p0 = scmp.ge.s32.totalorder %s308_s12, 1  ;;  %s308_s12 = sphi %s330_s12, %s13_s12  }
   0x2   : > { %p138_p1 = scmp.lt.s32.totalorder %s308_s12, 3 }
   0x4   : > { %p139_p2 = pnand %p272_p0, %p138_p1 }
   0x5   : > { %s273_s14 = sshll.u32 (!%p139_p2), %s268_s13, 1  ;;  %v277_v1 = vld [vmem:[%s354_s1] ss:$0 sm:$0xff] (!%p139_p2) }
   0x6   : > { %142 = sbr.rel (%p139_p2) target bundleno = 29 (0x1d), region = 32  ;;  %p163_p3 = scmp.lt.s32.totalorder (!%p139_p2), %s273_s14, 3  ;;  %v278_v4 = vld [vmem:[%s355_s2] ss:$0 sm:$0xff] (!%p139_p2) }
   0xd   : > { %s358_s14 = smov (!%p163_p3, %s273_s14), 3 }
   0xe   : > { %s274_s15 = sshll.u32 %s358_s14, 2 }
   0xf   : > { %s166_s18 = scalar_lea.vmem %s353_s0, %s274_s15  ;;  %s172_s25 = scalar_lea.vmem %s356_s3, %s274_s15 }
  0x10   : > { %v286_v0 = vld [vmem:[%s166_s18] sm:$0xff]  }
  0x11   : > { %v287_v2 = vunpack.c.l.bf16 %v286_v0  ;;  %v288_v3 = vunpack.c.h.bf16 %v286_v0 }
  0x13   : > { %v185_v5 = vmul.f32 %v287_v2, %v277_v1  ;;  %v186_v6 = vmul.f32 %v288_v3, %v277_v1 }
  0x15   : > { %v194_v7 = vadd.f32 %v278_v4, %v185_v5  ;;  %v195_v8 = vadd.f32 %v278_v4, %v186_v6 }
  0x17   : > { %vm196_vm0 = vcmp.ge.f32.partialorder %v194_v7, 0.0  ;;  %vm197_vm1 = vcmp.ge.f32.partialorder %v195_v8, 0.0  ;;  %v198_v9 = vmul.f32 0.2, %v194_v7  ;;  %v199_v10 = vmul.f32 0.2, %v195_v8 }
  0x19   : > { %v200_v11 = vsel %vm196_vm0, %v194_v7, %v198_v9  ;;  %v201_v12 = vsel %vm197_vm1, %v195_v8, %v199_v10 }
  0x1a   : > { %v292_v13 = vpack.c.bf16 %v201_v12, %v200_v11 }
  0x1c   : > { %293 = vst [vmem:[%s172_s25] sm:$0xff] %v292_v13  }
  0x1d PF: > { %s13_s12 = sadd.s32 1, %s308_s12  }
  0x1e   : > { %p10_p4 = scmp.ge.s32.totalorder %s13_s12, 4  }
  0x20   :  { %12 = sbr.rel (!%p10_p4) target bundleno = 1 (0x1), region = 62 }

// kernel: net_a_forward.12
= control target key start
LH: loop header
LB: loop body
LE: loop exit
PB: predicated region body
PF: predicated region fallthrough
CT: control target
= control target key end

     0   :  { %s1248_s15 = smov 0   ;;  %s1250_s16 = smov 0   ;;  %s1451_s0 = inlined_call_operand.vmem [shape: bf16[4,32,128], index: 0, kind: input, shape index: {}]   ;;  %s1452_s1 = inlined_call_operand.vmem [shape: bf16[4,128,128], index: 1, kind: input, shape index: {}]   ;;  %s1453_s2 = inlined_call_operand.vmem [shape: bf16[32,128], index: 2, kind: output, shape index: {0}]   ;;  %s1454_s3 = inlined_call_operand.vmem [shape: f32[16,128], index: 3, kind: output, shape index: {1}]   ;;  %s1455_s4 = inlined_call_operand.vmem [shape: f32[16,128], index: 4, kind: output, shape index: {2}]  }
   0x1   :  { %s1252_s17 = smov 0  }
   0x2 LB: > { %s1264_s18 = sadd.s32 4294967295, %s1219_s17   ;;  %s1267_s19 = sadd.s32 1, %s1219_s17   ;;  %s1219_s17 = sphi %s1252_s17, %s1458_s17   ;;  %s1215_s16 = sphi %s1250_s16, %s1457_s16   ;;  %s1211_s15 = sphi %s1248_s15, %s1456_s15  }
   0x3   : > { %s19_s20 = ssub.s32 %s1219_s17, %s1267_s19  ;;  %s22_s21 = sadd.s32 1, %s1215_s16 }
   0x4   : > { %p20_p0 = scmp.eq.s32.totalorder %s19_s20, 0  ;;  %p29_p1 = scmp.ne.s32.totalorder %s1215_s16, %s1211_s15 }
   0x5   : > { %p30_p2 = scmp.eq.s32.totalorder %s1219_s17, 0  ;;  %p897_p4 = scmp.ge.s32.totalorder %s1219_s17, 2 }
   0x6   : > { %s1276_s22 = scalar_select %p20_p0, %s1215_s16, %s22_s21  }
   0x7   : > { %p31_p3 = por %p30_p2, %p29_p1  ;;  %157 = sbr.rel (%p897_p4) target bundleno = 21 (0x15), region = 20 }
   0xe   : > { %160 = sbr.rel (!%p31_p3) target bundleno = 21 (0x15), region = 24  ;;  %s162_s23 = sand.u32 (%p31_p3), 1, %s1215_s16  }
   0xf   : > { %s1001_s24 = sshll.u32 (%p31_p3), %s1219_s17, 3  ;;  %s898_s25 = sshll.u32 (%p31_p3), %s162_s23, 5 }
  0x10   : > { %s167_s28 = scalar_lea.vmem (%p31_p3), %s1451_s0, %s1001_s24  ;;  %s164_s29 = scalar_lea.vmem (%p31_p3), [#allocation2], %s898_s25 }
  0x11   : > { %v183_v0 = vld [vmem:[%s167_s28] sm:$0xff] (%p31_p3)   ;;  %v187_v1 = vld [vmem:[%s167_s28 + $0x10] sm:$0xff] (%p31_p3)  }
  0x12   : > { %v191_v2 = vld [vmem:[%s167_s28 + $0x20] sm:$0xff] (%p31_p3)   ;;  %184 = vst [vmem:[%s164_s29] sm:$0xff] (%p31_p3), %v183_v0   ;;  %188 = vst [vmem:[%s164_s29 + $0x8] sm:$0xff] (%p31_p3), %v187_v1   ;;  %v195_v3 = vld [vmem:[%s167_s28 + $0x30] sm:$0xff] (%p31_p3)  }
  0x13   : > { %192 = vst [vmem:[%s164_s29 + $0x10] sm:$0xff] (%p31_p3), %v191_v2   ;;  %196 = vst [vmem:[%s164_s29 + $0x18] sm:$0xff] (%p31_p3), %v195_v3  }
  0x15 PF: > { %p901_p5 = scmp.ge.s32.totalorder %s1219_s17, 1  ;;  %p236_p6 = scmp.lt.s32.totalorder %s1219_s17, 3 }
  0x17   : > { %p237_p7 = pnand %p901_p5, %p236_p6 }
  0x18   : > { %v1161_v4 = vld [vmem:[%s1452_s1 + $0x40] sm:$0xff] (!%p237_p7)   ;;  %v1221_v5 = vmov (!%p237_p7), 0.0   ;;  %v1163_v7 = vld [vmem:[%s1452_s1 + $0x48] sm:$0xff] (!%p237_p7)   ;;  %vm1222_vm0 = vmmov (!%p237_p7), 0   ;;  %v1165_v9 = vld [vmem:[%s1452_s1 + $0x50] sm:$0xff] (!%p237_p7)   ;;  %s243_s20 = sand.u32 (!%p237_p7), 1, %s1211_s15  }
  0x19   : > { %240 = sbr.rel (%p237_p7) target bundleno = 311 (0x137), region = 65  ;;  %1045 = vmatprep.subr.bf16.mxu1 (!%p237_p7), %v1221_v5  ;;  %1085 = vmatprep.subr.bf16.mxu0 (!%p237_p7), %v1221_v5  ;;  %v1162_v6 = vld [vmem:[%s1452_s1 + $0x80] sm:$0xff] (!%p237_p7)   ;;  %v1164_v8 = vld [vmem:[%s1452_s1 + $0x88] sm:$0xff] (!%p237_p7)   ;;  %v1166_v10 = vld [vmem:[%s1452_s1 + $0x90] sm:$0xff] (!%p237_p7)   ;;  %s902_s26 = sshll.u32 (!%p237_p7), %s243_s20, 5 }
  0x1a   : > { %1046 = vmatpush3.bf16.msra.mxu1 (!%p237_p7), %v1161_v4  ;;  %1061 = vmatprep.mubr.msk.bf16.mxu1 (!%p237_p7), %vm1222_vm0, %v1221_v5  ;;  %v1167_v11 = vld [vmem:[%s1452_s1 + $0x58] sm:$0xff] (!%p237_p7)   ;;  %v1169_v13 = vld [vmem:[%s1452_s1 + $0x60] sm:$0xff] (!%p237_p7)   ;;  %s1331_s30 = scalar_lea.vmem (!%p237_p7), [#allocation2], %s902_s26  ;;  %v1171_v15 = vld [vmem:[%s1452_s1 + $0x68] sm:$0xff] (!%p237_p7)   ;;  %s903_s7 = sshll.u32 (!%p237_p7), %s1264_s18, 1 }
  0x1b   : > { %1086 = vmatpush3.bf16.msra.mxu0 (!%p237_p7), %v1162_v6  ;;  %1047 = vmatprep.subr.bf16.mxu1 (!%p237_p7), %v1221_v5  ;;  %v1168_v12 = vld [vmem:[%s1452_s1 + $0x98] sm:$0xff] (!%p237_p7)   ;;  %v1170_v14 = vld [vmem:[%s1452_s1 + $0xa0] sm:$0xff] (!%p237_p7)   ;;  %v1172_v16 = vld [vmem:[%s1452_s1 + $0xa8] sm:$0xff] (!%p237_p7)   ;;  %p278_p8 = scmp.lt.s32.totalorder (!%p237_p7), %s903_s7, 3  ;;  %p283_p9 = scmp.lt.s32.totalorder (!%p237_p7), %s1264_s18, 1 }
  0x1c   : > { %1087 = vmatprep.subr.bf16.mxu0 (!%p237_p7), %v1221_v5  ;;  %1101 = vmatprep.mubr.msk.bf16.mxu0 (!%p237_p7), %vm1222_vm0, %v1221_v5  ;;  %v1173_v17 = vld [vmem:[%s1452_s1 + $0x70] sm:$0xff] (!%p237_p7)   ;;  %v1175_v19 = vld [vmem:[%s1452_s1 + $0x78] sm:$0xff] (!%p237_p7)   ;;  %v1177_v21 = vld [vmem:[%s1331_s30 + $0x8] sm:$0xff] (!%p237_p7)  }
  0x1d   : > { %v1174_v18 = vld [vmem:[%s1452_s1 + $0xb0] sm:$0xff] (!%p237_p7)   ;;  %v1176_v20 = vld [vmem:[%s1452_s1 + $0xb8] sm:$0xff] (!%p237_p7)   ;;  %v1178_v22 = vld [vmem:[%s1452_s1] sm:$0xff] (!%p237_p7)  }
  0x1e   : > { %1048 = vmatpush3.bf16.msra.mxu1 (!%p237_p7), %v1163_v7  ;;  %v1179_v23 = vld [vmem:[%s1331_s30 + $0x10] sm:$0xff] (!%p237_p7)   ;;  %v1180_v24 = vld [vmem:[%s1452_s1 + $0xc0] sm:$0xff] (!%p237_p7)   ;;  %v1181_v25 = vld [vmem:[%s1452_s1 + $0x8] sm:$0xff] (!%p237_p7)  }
  0x1f   : > { %1088 = vmatpush3.bf16.msra.mxu0 (!%p237_p7), %v1164_v8  ;;  %1049 = vmatprep.subr.bf16.mxu1 (!%p237_p7), %v1221_v5  ;;  %v1182_v26 = vld [vmem:[%s1452_s1 + $0xc8] sm:$0xff] (!%p237_p7)   ;;  %v1183_v27 = vld [vmem:[%s1452_s1 + $0x10] sm:$0xff] (!%p237_p7)   ;;  %v1185_v29 = vld [vmem:[%s1452_s1 + $0x18] sm:$0xff] (!%p237_p7)  }
  0x20   : > { %1089 = vmatprep.subr.bf16.mxu0 %v1221_v5  ;;  %v1184_v28 = vld [vmem:[%s1452_s1 + $0xd0] sm:$0xff]   ;;  %v1186_v30 = vld [vmem:[%s1452_s1 + $0xd8] sm:$0xff]   ;;  %v1187_v31 = vld [vmem:[%s1452_s1 + $0x20] sm:$0xff]   ;;  %s1460_s7 = smov (!%p278_p8, %s903_s7), 3  ;;  %s1462_s18 = smov (!%p283_p9, %s1264_s18), 1 }
  0x21   : > { %v1188_v32 = vld [vmem:[%s1452_s1 + $0xe0] sm:$0xff]   ;;  %v1189_v33 = vld [vmem:[%s1452_s1 + $0x28] sm:$0xff]   ;;  %v1191_v35 = vld [vmem:[%s1452_s1 + $0x30] sm:$0xff]   ;;  %s904_s8 = sshll.u32 %s1460_s7, 2  ;;  %s905_s9 = sshll.u32 %s1462_s18, 3 }
  0x22   : > { %1050 = vmatpush3.bf16.msra.mxu1 %v1165_v9  ;;  %v1190_v34 = vld [vmem:[%s1452_s1 + $0xe8] sm:$0xff]   ;;  %v1192_v36 = vld [vmem:[%s1452_s1 + $0xf0] sm:$0xff]   ;;  %v1193_v37 = vld [vmem:[%s1452_s1 + $0x38] sm:$0xff]   ;;  %s281_s11 = scalar_lea.vmem %s1453_s2, %s904_s8  ;;  %s286_s14 = scalar_lea.vmem %s1454_s3, %s905_s9 }
  0x23   : > { %1090 = vmatpush3.bf16.msra.mxu0 %v1166_v10  ;;  %1051 = vmatprep.subr.bf16.mxu1 %v1221_v5  ;;  %v1194_v38 = vld [vmem:[%s1452_s1 + $0xf8] sm:$0xff]   ;;  %v1195_v39 = vld [vmem:[%s1331_s30] sm:$0xff]   ;;  %s290_s18 = scalar_lea.vmem %s1455_s4, %s905_s9 }
  0x24   : > { %1091 = vmatprep.subr.bf16.mxu0 %v1221_v5  ;;  %v1196_v40 = vld [vmem:[%s1331_s30 + $0x18] sm:$0xff]  }
  0x26   : > { %1052 = vmatpush3.bf16.msra.mxu1 %v1167_v11 }
  0x27   : > { %1092 = vmatpush3.bf16.msra.mxu0 %v1168_v12  ;;  %1053 = vmatprep.subr.bf16.mxu1 %v1221_v5 }
  0x28   : > { %1093 = vmatprep.subr.bf16.mxu0 %v1221_v5 }
  0x2a   : > { %1054 = vmatpush3.bf16.msra.mxu1 %v1169_v13 }
  0x2b   : > { %1094 = vmatpush3.bf16.msra.mxu0 %v1170_v14  ;;  %1055 = vmatprep.subr.bf16.mxu1 %v1221_v5 }
  0x2c   : > { %1095 = vmatprep.subr.bf16.mxu0 %v1221_v5 }
  0x2e   : > { %1056 = vmatpush3.bf16.msra.mxu1 %v1171_v15 }
  0x2f   : > { %1096 = vmatpush3.bf16.msra.mxu0 %v1172_v16  ;;  %1057 = vmatprep.subr.bf16.mxu1 %v1221_v5 }
  0x30   : > { %1097 = vmatprep.subr.bf16.mxu0 %v1221_v5 }
  0x32   : > { %1058 = vmatpush3.bf16.msra.mxu1 %v1173_v17 }
  0x33   : > { %1098 = vmatpush3.bf16.msra.mxu0 %v1174_v18  ;;  %1059 = vmatprep.subr.bf16.mxu1 %v1221_v5 }
  0x34   : > { %1099 = vmatprep.subr.bf16.mxu0 %v1221_v5 }
  0x36   : > { %1060 = vmatpush3.bf16.msra.mxu1 %v1175_v19 }
  0x37   : > { %1100 = vmatpush3.bf16.msra.mxu0 %v1176_v20  ;;  %1065 = vmatprep.subr.bf16.mxu1 %v1221_v5 }
  0x38   : > { %1105 = vmatprep.subr.bf16.mxu0 %v1221_v5 }
  0x39   : > { %1062 = vmatmul.mubr.bf16.vlgmr.msra.gmra.mrb[0].mxu1 %v1177_v21 }
  0x3a   : > { %1066 = vmatpush3.bf16.msra.mxu1 %v1178_v22  ;;  %1102 = vmatmul.mubr.bf16.vlgmr.msra.gmra.mrb[0].mxu0 %v1179_v23 }
  0x3b   : > { %1106 = vmatpush3.bf16.msra.mxu0 %v1180_v24  ;;  %1067 = vmatprep.subr.bf16.mxu1 %v1221_v5 }
  0x3c   : > { %1107 = vmatprep.subr.bf16.mxu0 %v1221_v5  ;;  %1081 = vmatprep.mubr.msk.bf16.mxu1 %vm1222_vm0, %v1221_v5 }
  0x3d   : > { %1121 = vmatprep.mubr.msk.bf16.mxu0 %vm1222_vm0, %v1221_v5 }
  0x3e   : > { %1068 = vmatpush3.bf16.msra.mxu1 %v1181_v25 }
  0x3f   : > { %1108 = vmatpush3.bf16.msra.mxu0 %v1182_v26  ;;  %1069 = vmatprep.subr.bf16.mxu1 %v1221_v5 }
  0x40   : > { %1109 = vmatprep.subr.bf16.mxu0 %v1221_v5 }
  0x42   : > { %1070 = vmatpush3.bf16.msra.mxu1 %v1183_v27 }
  0x43   : > { %1110 = vmatpush3.bf16.msra.mxu0 %v1184_v28  ;;  %1071 = vmatprep.subr.bf16.mxu1 %v1221_v5 }
  0x44   : > { %1111 = vmatprep.subr.bf16.mxu0 %v1221_v5 }
  0x46   : > { %1072 = vmatpush3.bf16.msra.mxu1 %v1185_v29 }
  0x47   : > { %1112 = vmatpush3.bf16.msra.mxu0 %v1186_v30  ;;  %1073 = vmatprep.subr.bf16.mxu1 %v1221_v5 }
  0x48   : > { %1113 = vmatprep.subr.bf16.mxu0 %v1221_v5 }
  0x4a   : > { %1074 = vmatpush3.bf16.msra.mxu1 %v1187_v31 }
  0x4b   : > { %1114 = vmatpush3.bf16.msra.mxu0 %v1188_v32  ;;  %1075 = vmatprep.subr.bf16.mxu1 %v1221_v5 }
  0x4c   : > { %1115 = vmatprep.subr.bf16.mxu0 %v1221_v5 }
  0x4e   : > { %1076 = vmatpush3.bf16.msra.mxu1 %v1189_v33 }
  0x4f   : > { %1116 = vmatpush3.bf16.msra.mxu0 %v1190_v34  ;;  %1077 = vmatprep.subr.bf16.mxu1 %v1221_v5 }
  0x50   : > { %1117 = vmatprep.subr.bf16.mxu0 %v1221_v5 }
  0x52   : > { %1078 = vmatpush3.bf16.msra.mxu1 %v1191_v35 }
  0x53   : > { %1118 = vmatpush3.bf16.msra.mxu0 %v1192_v36  ;;  %1079 = vmatprep.subr.bf16.mxu1 %v1221_v5 }
  0x54   : > { %1119 = vmatprep.subr.bf16.mxu0 %v1221_v5 }
  0x56   : > { %1080 = vmatpush3.bf16.msra.mxu1 %v1193_v37 }
  0x57   : > { %1120 = vmatpush3.bf16.msra.mxu0 %v1194_v38 }
  0x59   : > { %1082 = vmatmul.mubr.bf16.vlgmr.msra.gmra.mrb[0].mxu1 %v1195_v39 }
  0x5a   : > { %1122 = vmatmul.mubr.bf16.vlgmr.msra.gmra.mrb[0].mxu0 %v1196_v40 }
 0x12c   : > { %v513_v41 = vpop.f32.mrb[0].mxu1 }
 0x12d   : > { %v745_v42 = vpop.f32.mrb[0].mxu0  ;;  %v1083_v43 = vpop.f32.mrb[1].mxu1 }
 0x12e   : > { %v1125_v44 = vadd.f32 %v745_v42, %v513_v41  ;;  %v1123_v45 = vpop.f32.mrb[1].mxu0  ;;  %v516_v46 = vpop.f32.mrb[2].mxu1 }
 0x12f   : > { %v748_v47 = vpop.f32.mrb[2].mxu0  ;;  %v1084_v48 = vpop.f32.mrb[3].mxu1 }
 0x130   : > { %v1126_v49 = vadd.f32 %v748_v47, %v516_v46  ;;  %v1124_v50 = vpop.f32.mrb[3].mxu0  ;;  %v756_v51 = vmul.f32 %v1125_v44, %v1125_v44 }
 0x132   : > { %v754_v52 = vadd.f32 %v1126_v49, %v1125_v44  ;;  %v757_v53 = vmul.f32 %v1126_v49, %v1126_v49  ;;  %v1007_v54 = vpack.c.bf16 %v1126_v49, %v1125_v44 }
 0x134   : > { %755 = vst [vmem:[%s286_s14] sm:$0xff] %v754_v52  ;;  %v758_v55 = vadd.f32 %v757_v53, %v756_v51  ;;  %1008 = vst [vmem:[%s281_s11] sm:$0xff] %v1007_v54  }
 0x136   : > { %759 = vst [vmem:[%s290_s18] sm:$0xff] %v758_v55 }
 0x137 PF: > { %p12_p10 = scmp.ge.s32.totalorder %s1267_s19, 4   ;;  %s1456_s15 = smov %s1215_s16 }
 0x138   : > { %s1457_s16 = smov %s1276_s22  ;;  %s1458_s17 = smov %s1267_s19 }
 0x139   :  { %14 = sbr.rel (!%p12_p10) target bundleno = 2 (0x2), region = 134 }

</bundles_post_ra>
